<compile_context>
chip_gen: v7x
topology: tpu7x:2x2x1
jax: 0.10.0
libtpu: 0.0.40
codegen_flags: <defaults>
</compile_context>

<pallas_src>
import jax
import jax.numpy as jnp
import numpy as np
from jax import lax
from jax.experimental import pallas as pl
from jax.experimental.pallas import tpu as pltpu


VMEM_LIMIT = 32 * 1024 * 1024  # well within scoped VMEM on v5e/v6e/v7x; kernels use <2 MiB


def _pick_tile(total, target, multiple=8):
    """Largest divisor of `total` that is a multiple of `multiple` and <= target.
    Falls back to `total` (block == full dim is always legal)."""
    best = None
    for d in range(multiple, min(total, target) + 1, multiple):
        if total % d == 0:
            best = d
    return best if best is not None else total


# --------------------------------------------------------------------------- #
# Kernel 1: fused conv-as-GEMM + bias + ReLU + 2x2 max-pool.
#   a_ref: (4, TM, K)  -- 4 im2col rows (one per pool-window element) per pooled pixel
#   w_ref: (K, Cout)   -- full weight matrix (K = 27 / 288, fits in one step)
#   o_ref: (TM, Cout)  -- pooled + activated output tile
# --------------------------------------------------------------------------- #
def _conv_pool_kernel(a_ref, w_ref, bias_ref, o_ref):
    w = w_ref[...]
    m = jnp.dot(a_ref[0], w, preferred_element_type=jnp.float32)
    for widx in range(1, 4):
        m = jnp.maximum(
            m, jnp.dot(a_ref[widx], w, preferred_element_type=jnp.float32))
    r = jnp.maximum(m + bias_ref[...], 0.0)
    o_ref[...] = r.astype(o_ref.dtype)


def conv3x3_relu_pool(x, w, b, *, tm_pool_target=384):
    """x: (N,H,W,Cin) NHWC (bf16), w: (3,3,Cin,Cout) HWIO (bf16), b: (Cout,) f32.
    VALID 3x3 conv + bias + ReLU + 2x2/2 max-pool -> (N, Ho//2, Wo//2, Cout)."""
    N, H, W, Cin = x.shape
    kh, kw, _, Cout = w.shape
    Ho, Wo = H - kh + 1, W - kw + 1
    Hp, Wp = Ho // 2, Wo // 2
    K = kh * kw * Cin
    M = N * Hp * Wp

    # im2col in pool-window order (XLA glue; < 2 MB for these shapes).
    cols = jnp.stack(
        [x[:, i:i + Ho, j:j + Wo, :] for i in range(kh) for j in range(kw)],
        axis=3)                                              # (N,Ho,Wo,9,Cin)
    cols = cols.reshape(N, Hp, 2, Wp, 2, K)
    a4 = cols.transpose(2, 4, 0, 1, 3, 5).reshape(4, M, K)    # (4, M_pool, K)

    wm = w.reshape(K, Cout)
    tm = _pick_tile(M, tm_pool_target)

    out = pl.pallas_call(
        _conv_pool_kernel,
        out_shape=jax.ShapeDtypeStruct((M, Cout), x.dtype),
        grid_spec=pltpu.PrefetchScalarGridSpec(
            num_scalar_prefetch=0,
            grid=(M // tm,),
            in_specs=[
                pl.BlockSpec((4, tm, K), lambda i: (0, i, 0)),
                pl.BlockSpec((K, Cout), lambda i: (0, 0)),
                pl.BlockSpec((1, Cout), lambda i: (0, 0)),
            ],
            out_specs=pl.BlockSpec((tm, Cout), lambda i: (i, 0)),
        ),
        compiler_params=pltpu.CompilerParams(
            dimension_semantics=("parallel",),
            vmem_limit_bytes=VMEM_LIMIT),
    )(a4, wm, b.reshape(1, Cout).astype(jnp.float32))
    return out.reshape(N, Hp, Wp, Cout)


# --------------------------------------------------------------------------- #
# Kernel 2: fused fc1 (+bias+ReLU) and fc2.
#   Grid: (N1 tiles "parallel", K tiles "arbitrary").  f32 accumulator per N-tile;
#   finalize applies bias+ReLU and multiplies the h tile by the matching slice of the
#   fc2 weights, writing a per-N-tile partial logit block (summed in JAX).
# --------------------------------------------------------------------------- #
def _fc_fused_kernel(x_ref, w1_ref, b1_ref, w2_ref, o_ref, acc_ref):
    k = pl.program_id(1)

    @pl.when(k == 0)
    def _init():
        acc_ref[...] = jnp.zeros_like(acc_ref)

    acc_ref[...] += jnp.dot(x_ref[...], w1_ref[...],
                            preferred_element_type=jnp.float32)

    @pl.when(k == pl.num_programs(1) - 1)
    def _finalize():
        h = jnp.maximum(acc_ref[...] + b1_ref[...], 0.0)          # relu(fc1) tile
        o_ref[0] = jnp.dot(h.astype(w2_ref.dtype), w2_ref[...],
                           preferred_element_type=jnp.float32)    # partial fc2


def fc1_relu_fc2(xflat, w1, b1, w2, b2, *, tn_target=256, tk_target=1024):
    """xflat: (M,K) bf16, w1: (K,N1) bf16, b1: (N1,) f32, w2: (N1,N2) bf16, b2: (N2,) f32."""
    M, K = xflat.shape
    K1, N1 = w1.shape
    N1b, N2 = w2.shape
    assert K == K1 and N1 == N1b
    tn = _pick_tile(N1, tn_target, multiple=128)
    tk = _pick_tile(K, tk_target, multiple=128)
    nn, nk = N1 // tn, K // tk

    partial = pl.pallas_call(
        _fc_fused_kernel,
        out_shape=jax.ShapeDtypeStruct((nn, M, N2), jnp.float32),
        grid_spec=pltpu.PrefetchScalarGridSpec(
            num_scalar_prefetch=0,
            grid=(nn, nk),                       # K is innermost (reduction)
            in_specs=[
                pl.BlockSpec((M, tk), lambda n, k: (0, k)),
                pl.BlockSpec((tk, tn), lambda n, k: (k, n)),
                pl.BlockSpec((1, tn), lambda n, k: (0, n)),
                pl.BlockSpec((tn, N2), lambda n, k: (n, 0)),
            ],
            out_specs=pl.BlockSpec((1, M, N2), lambda n, k: (n, 0, 0)),
            scratch_shapes=[pltpu.VMEM((M, tn), jnp.float32)],
        ),
        compiler_params=pltpu.CompilerParams(
            dimension_semantics=("parallel", "arbitrary"),
            vmem_limit_bytes=VMEM_LIMIT),
    )(xflat, w1, b1.reshape(1, N1).astype(jnp.float32), w2)
    return partial.sum(axis=0) + b2[None, :].astype(jnp.float32)


# --------------------------------------------------------------------------- #
# Model forward
# --------------------------------------------------------------------------- #
def cnn_forward(x_nchw, params):
    """params: conv/fc weights in bf16, biases in f32 (see to_low_precision)."""
    w1, b1, w2, b2, wfc1, bfc1, wfc2, bfc2 = params
    x = jnp.transpose(x_nchw, (0, 2, 3, 1)).astype(w1.dtype)   # NCHW -> NHWC, bf16
    out = conv3x3_relu_pool(x, w1, b1)                         # (N,30,30,32)
    out = conv3x3_relu_pool(out, w2, b2)                       # (N,14,14,32)
    n = out.shape[0]
    # match PyTorch .view on an NCHW tensor: flatten in (C,H,W) order.
    flat = jnp.transpose(out, (0, 3, 1, 2)).reshape(n, -1)     # (N, 32*14*14)
    return fc1_relu_fc2(flat, wfc1, bfc1, wfc2, bfc2)          # (N, 4) f32


# --------------------------------------------------------------------------- #
# Plain-JAX f32 reference (for correctness check only)
# --------------------------------------------------------------------------- #
def ref_forward(x_nchw, params):
    w1, b1, w2, b2, wfc1, bfc1, wfc2, bfc2 = params
    w1o = jnp.transpose(w1, (3, 2, 0, 1))            # HWIO -> OIHW
    w2o = jnp.transpose(w2, (3, 2, 0, 1))

    def conv(x, w, b):
        y = lax.conv_general_dilated(
            x, w, (1, 1), "VALID",
            dimension_numbers=("NCHW", "OIHW", "NCHW"),
            precision=lax.Precision.HIGHEST)
        return jax.nn.relu(y + b[None, :, None, None])

    def pool(x):
        return lax.reduce_window(x, -jnp.inf, lax.max,
                                 (1, 1, 2, 2), (1, 1, 2, 2), "VALID")

    o = pool(conv(x_nchw, w1o, b1))
    o = pool(conv(o, w2o, b2))
    o = o.reshape(o.shape[0], -1)
    o = jax.nn.relu(jnp.dot(o, wfc1, precision=lax.Precision.HIGHEST) + bfc1)
    return jnp.dot(o, wfc2, precision=lax.Precision.HIGHEST) + bfc2


# --------------------------------------------------------------------------- #
def init_params(key):
    ks = jax.random.split(key, 8)

    def u(k, shape, fan_in):
        bound = 1.0 / np.sqrt(fan_in)
        return jax.random.uniform(k, shape, jnp.float32, -bound, bound)

    w1 = u(ks[0], (3, 3, 3, 32), 3 * 3 * 3)              # conv1, HWIO
    b1 = u(ks[1], (32,), 3 * 3 * 3)
    w2 = u(ks[2], (3, 3, 32, 32), 32 * 3 * 3)            # conv2, HWIO
    b2 = u(ks[3], (32,), 32 * 3 * 3)
    wfc1 = u(ks[4], (32 * 14 * 14, 1024), 32 * 14 * 14)  # fc1 (stored as W^T)
    bfc1 = u(ks[5], (1024,), 32 * 14 * 14)
    wfc2 = u(ks[6], (1024, 4), 1024)                     # fc2 (stored as W^T)
    bfc2 = u(ks[7], (4,), 1024)
    return (w1, b1, w2, b2, wfc1, bfc1, wfc2, bfc2)


def to_low_precision(params):
    """Cast weights to bf16 once, outside jit, so kernels stream bf16 from HBM."""
    w1, b1, w2, b2, wfc1, bfc1, wfc2, bfc2 = params
    bf = jnp.bfloat16
    return (w1.astype(bf), b1, w2.astype(bf), b2,
            wfc1.astype(bf), bfc1, wfc2.astype(bf), bfc2)


if __name__ == "__main__":
    key = jax.random.PRNGKey(0)
    kx, kp = jax.random.split(key)
    # fc1 expects 32*14*14 features -> spatial size must be 62x62 (two VALID 3x3 convs
    # followed by two 2x2 pools); small batch of 2, 3 input channels.
    x = jax.random.normal(kx, (2, 3, 62, 62), dtype=jnp.float32)
    params = init_params(kp)
    params_lp = to_low_precision(params)

    y = jax.block_until_ready(jax.jit(cnn_forward)(x, params_lp))
    assert y.shape == (2, 4) and y.dtype == jnp.float32

    y_ref = jax.block_until_ready(jax.jit(ref_forward)(x, params))
    np.testing.assert_allclose(np.asarray(y), np.asarray(y_ref),
                               rtol=2e-2, atol=2e-2)

    print("KERNEL_OK")
</pallas_src>

<mosaic_0001>
module attributes {stable_mosaic.version = 11 : i64} {
  func.func @_conv_pool_kernel(%arg0: i32, %arg1: memref<4x360x27xbf16, #tpu.memory_space<vmem>>, %arg2: memref<27x32xbf16, #tpu.memory_space<vmem>>, %arg3: memref<1x32xf32, #tpu.memory_space<vmem>>, %arg4: memref<360x32xbf16, #tpu.memory_space<vmem>>) attributes {dimension_semantics = [#tpu.dimension_semantics<parallel>], iteration_bounds = array<i64: 5>, scalar_prefetch = 0 : i64, scratch_operands = 0 : i64, tpu.core_type = #tpu.core_type<tc>, window_params = [{transform_indices = @transform_0, window_bounds = array<i64: 4, 360, 27>}, {pipeline_mode = #tpu.pipeline_mode<synchronous>, transform_indices = @transform_1, window_bounds = array<i64: 27, 32>}, {pipeline_mode = #tpu.pipeline_mode<synchronous>, transform_indices = @transform_2, window_bounds = array<i64: 1, 32>}, {transform_indices = @transform_3, window_bounds = array<i64: 360, 32>}]} {
    %c0 = arith.constant 0 : index
    %c0_0 = arith.constant 0 : index
    %0 = vector.load %arg2[%c0, %c0_0] : memref<27x32xbf16, #tpu.memory_space<vmem>>, vector<27x32xbf16>
    %c0_1 = arith.constant 0 : index
    %c0_2 = arith.constant 0 : index
    %c0_3 = arith.constant 0 : index
    %1 = vector.load %arg1[%c0_1, %c0_2, %c0_3] : memref<4x360x27xbf16, #tpu.memory_space<vmem>>, vector<1x360x27xbf16>
    %2 = vector.shape_cast %1 : vector<1x360x27xbf16> to vector<360x27xbf16>
    %cst = arith.constant dense<0.000000e+00> : vector<360x32xf32>
    %3 = tpu.matmul %2, %0, %cst {dimension_numbers = #tpu.dot_dimension_numbers<[1], [0], [0], [1], [0, 0, 1, 1], [], []>} : vector<360x27xbf16>, vector<27x32xbf16>, vector<360x32xf32> -> vector<360x32xf32>
    %c1 = arith.constant 1 : index
    %c0_4 = arith.constant 0 : index
    %c0_5 = arith.constant 0 : index
    %4 = vector.load %arg1[%c1, %c0_4, %c0_5] : memref<4x360x27xbf16, #tpu.memory_space<vmem>>, vector<1x360x27xbf16>
    %5 = vector.shape_cast %4 : vector<1x360x27xbf16> to vector<360x27xbf16>
    %cst_6 = arith.constant dense<0.000000e+00> : vector<360x32xf32>
    %6 = tpu.matmul %5, %0, %cst_6 {dimension_numbers = #tpu.dot_dimension_numbers<[1], [0], [0], [1], [0, 0, 1, 1], [], []>} : vector<360x27xbf16>, vector<27x32xbf16>, vector<360x32xf32> -> vector<360x32xf32>
    %7 = arith.maximumf %3, %6 : vector<360x32xf32>
    %c2 = arith.constant 2 : index
    %c0_7 = arith.constant 0 : index
    %c0_8 = arith.constant 0 : index
    %8 = vector.load %arg1[%c2, %c0_7, %c0_8] : memref<4x360x27xbf16, #tpu.memory_space<vmem>>, vector<1x360x27xbf16>
    %9 = vector.shape_cast %8 : vector<1x360x27xbf16> to vector<360x27xbf16>
    %cst_9 = arith.constant dense<0.000000e+00> : vector<360x32xf32>
    %10 = tpu.matmul %9, %0, %cst_9 {dimension_numbers = #tpu.dot_dimension_numbers<[1], [0], [0], [1], [0, 0, 1, 1], [], []>} : vector<360x27xbf16>, vector<27x32xbf16>, vector<360x32xf32> -> vector<360x32xf32>
    %11 = arith.maximumf %7, %10 : vector<360x32xf32>
    %c3 = arith.constant 3 : index
    %c0_10 = arith.constant 0 : index
    %c0_11 = arith.constant 0 : index
    %12 = vector.load %arg1[%c3, %c0_10, %c0_11] : memref<4x360x27xbf16, #tpu.memory_space<vmem>>, vector<1x360x27xbf16>
    %13 = vector.shape_cast %12 : vector<1x360x27xbf16> to vector<360x27xbf16>
    %cst_12 = arith.constant dense<0.000000e+00> : vector<360x32xf32>
    %14 = tpu.matmul %13, %0, %cst_12 {dimension_numbers = #tpu.dot_dimension_numbers<[1], [0], [0], [1], [0, 0, 1, 1], [], []>} : vector<360x27xbf16>, vector<27x32xbf16>, vector<360x32xf32> -> vector<360x32xf32>
    %15 = arith.maximumf %11, %14 : vector<360x32xf32>
    %c0_13 = arith.constant 0 : index
    %c0_14 = arith.constant 0 : index
    %16 = vector.load %arg3[%c0_13, %c0_14] : memref<1x32xf32, #tpu.memory_space<vmem>>, vector<1x32xf32>
    %17 = vector.broadcast %16 : vector<1x32xf32> to vector<360x32xf32>
    %18 = arith.addf %15, %17 : vector<360x32xf32>
    %cst_15 = arith.constant 0.000000e+00 : f32
    %19 = vector.broadcast %cst_15 : f32 to vector<360x32xf32>
    %20 = arith.maximumf %18, %19 : vector<360x32xf32>
    %21 = arith.truncf %20 : vector<360x32xf32> to vector<360x32xbf16>
    %c0_16 = arith.constant 0 : index
    %c0_17 = arith.constant 0 : index
    %22 = vector.load %arg4[%c0_16, %c0_17] : memref<360x32xbf16, #tpu.memory_space<vmem>>, vector<360x32xbf16>
    tpu.vector_store %arg4[%c0_16, %c0_17], %21 {strides = array<i32>} : memref<360x32xbf16, #tpu.memory_space<vmem>>, vector<360x32xbf16>,
    return
  }
  func.func @transform_0(%arg0: i32) -> (i32, i32, i32) {
    %c0_i32 = arith.constant 0 : i32
    %c0_i32_0 = arith.constant 0 : i32
    %c0_i32_1 = arith.constant 0 : i32
    return %c0_i32, %arg0, %c0_i32_0 : i32, i32, i32
  }
  func.func @transform_1(%arg0: i32) -> (i32, i32) {
    %c0_i32 = arith.constant 0 : i32
    %c0_i32_0 = arith.constant 0 : i32
    %c0_i32_1 = arith.constant 0 : i32
    return %c0_i32, %c0_i32_0 : i32, i32
  }
  func.func @transform_2(%arg0: i32) -> (i32, i32) {
    %c0_i32 = arith.constant 0 : i32
    %c0_i32_0 = arith.constant 0 : i32
    %c0_i32_1 = arith.constant 0 : i32
    return %c0_i32, %c0_i32_0 : i32, i32
  }
  func.func @transform_3(%arg0: i32) -> (i32, i32) {
    %c0_i32 = arith.constant 0 : i32
    %c0_i32_0 = arith.constant 0 : i32
    return %arg0, %c0_i32 : i32, i32
  }
}

module attributes {stable_mosaic.version = 11 : i64} {
  func.func @_conv_pool_kernel(%arg0: i32, %arg1: memref<4x56x288xbf16, #tpu.memory_space<vmem>>, %arg2: memref<288x32xbf16, #tpu.memory_space<vmem>>, %arg3: memref<1x32xf32, #tpu.memory_space<vmem>>, %arg4: memref<56x32xbf16, #tpu.memory_space<vmem>>) attributes {dimension_semantics = [#tpu.dimension_semantics<parallel>], iteration_bounds = array<i64: 7>, scalar_prefetch = 0 : i64, scratch_operands = 0 : i64, tpu.core_type = #tpu.core_type<tc>, window_params = [{transform_indices = @transform_0, window_bounds = array<i64: 4, 56, 288>}, {pipeline_mode = #tpu.pipeline_mode<synchronous>, transform_indices = @transform_1, window_bounds = array<i64: 288, 32>}, {pipeline_mode = #tpu.pipeline_mode<synchronous>, transform_indices = @transform_2, window_bounds = array<i64: 1, 32>}, {transform_indices = @transform_3, window_bounds = array<i64: 56, 32>}]} {
    %c0 = arith.constant 0 : index
    %c0_0 = arith.constant 0 : index
    %0 = vector.load %arg2[%c0, %c0_0] : memref<288x32xbf16, #tpu.memory_space<vmem>>, vector<288x32xbf16>
    %c0_1 = arith.constant 0 : index
    %c0_2 = arith.constant 0 : index
    %c0_3 = arith.constant 0 : index
    %1 = vector.load %arg1[%c0_1, %c0_2, %c0_3] : memref<4x56x288xbf16, #tpu.memory_space<vmem>>, vector<1x56x288xbf16>
    %2 = vector.shape_cast %1 : vector<1x56x288xbf16> to vector<56x288xbf16>
    %cst = arith.constant dense<0.000000e+00> : vector<56x32xf32>
    %3 = tpu.matmul %2, %0, %cst {dimension_numbers = #tpu.dot_dimension_numbers<[1], [0], [0], [1], [0, 0, 1, 1], [], []>} : vector<56x288xbf16>, vector<288x32xbf16>, vector<56x32xf32> -> vector<56x32xf32>
    %c1 = arith.constant 1 : index
    %c0_4 = arith.constant 0 : index
    %c0_5 = arith.constant 0 : index
    %4 = vector.load %arg1[%c1, %c0_4, %c0_5] : memref<4x56x288xbf16, #tpu.memory_space<vmem>>, vector<1x56x288xbf16>
    %5 = vector.shape_cast %4 : vector<1x56x288xbf16> to vector<56x288xbf16>
    %cst_6 = arith.constant dense<0.000000e+00> : vector<56x32xf32>
    %6 = tpu.matmul %5, %0, %cst_6 {dimension_numbers = #tpu.dot_dimension_numbers<[1], [0], [0], [1], [0, 0, 1, 1], [], []>} : vector<56x288xbf16>, vector<288x32xbf16>, vector<56x32xf32> -> vector<56x32xf32>
    %7 = arith.maximumf %3, %6 : vector<56x32xf32>
    %c2 = arith.constant 2 : index
    %c0_7 = arith.constant 0 : index
    %c0_8 = arith.constant 0 : index
    %8 = vector.load %arg1[%c2, %c0_7, %c0_8] : memref<4x56x288xbf16, #tpu.memory_space<vmem>>, vector<1x56x288xbf16>
    %9 = vector.shape_cast %8 : vector<1x56x288xbf16> to vector<56x288xbf16>
    %cst_9 = arith.constant dense<0.000000e+00> : vector<56x32xf32>
    %10 = tpu.matmul %9, %0, %cst_9 {dimension_numbers = #tpu.dot_dimension_numbers<[1], [0], [0], [1], [0, 0, 1, 1], [], []>} : vector<56x288xbf16>, vector<288x32xbf16>, vector<56x32xf32> -> vector<56x32xf32>
    %11 = arith.maximumf %7, %10 : vector<56x32xf32>
    %c3 = arith.constant 3 : index
    %c0_10 = arith.constant 0 : index
    %c0_11 = arith.constant 0 : index
    %12 = vector.load %arg1[%c3, %c0_10, %c0_11] : memref<4x56x288xbf16, #tpu.memory_space<vmem>>, vector<1x56x288xbf16>
    %13 = vector.shape_cast %12 : vector<1x56x288xbf16> to vector<56x288xbf16>
    %cst_12 = arith.constant dense<0.000000e+00> : vector<56x32xf32>
    %14 = tpu.matmul %13, %0, %cst_12 {dimension_numbers = #tpu.dot_dimension_numbers<[1], [0], [0], [1], [0, 0, 1, 1], [], []>} : vector<56x288xbf16>, vector<288x32xbf16>, vector<56x32xf32> -> vector<56x32xf32>
    %15 = arith.maximumf %11, %14 : vector<56x32xf32>
    %c0_13 = arith.constant 0 : index
    %c0_14 = arith.constant 0 : index
    %16 = vector.load %arg3[%c0_13, %c0_14] : memref<1x32xf32, #tpu.memory_space<vmem>>, vector<1x32xf32>
    %17 = vector.broadcast %16 : vector<1x32xf32> to vector<56x32xf32>
    %18 = arith.addf %15, %17 : vector<56x32xf32>
    %cst_15 = arith.constant 0.000000e+00 : f32
    %19 = vector.broadcast %cst_15 : f32 to vector<56x32xf32>
    %20 = arith.maximumf %18, %19 : vector<56x32xf32>
    %21 = arith.truncf %20 : vector<56x32xf32> to vector<56x32xbf16>
    %c0_16 = arith.constant 0 : index
    %c0_17 = arith.constant 0 : index
    %22 = vector.load %arg4[%c0_16, %c0_17] : memref<56x32xbf16, #tpu.memory_space<vmem>>, vector<56x32xbf16>
    tpu.vector_store %arg4[%c0_16, %c0_17], %21 {strides = array<i32>} : memref<56x32xbf16, #tpu.memory_space<vmem>>, vector<56x32xbf16>,
    return
  }
  func.func @transform_0(%arg0: i32) -> (i32, i32, i32) {
    %c0_i32 = arith.constant 0 : i32
    %c0_i32_0 = arith.constant 0 : i32
    %c0_i32_1 = arith.constant 0 : i32
    return %c0_i32, %arg0, %c0_i32_0 : i32, i32, i32
  }
  func.func @transform_1(%arg0: i32) -> (i32, i32) {
    %c0_i32 = arith.constant 0 : i32
    %c0_i32_0 = arith.constant 0 : i32
    %c0_i32_1 = arith.constant 0 : i32
    return %c0_i32, %c0_i32_0 : i32, i32
  }
  func.func @transform_2(%arg0: i32) -> (i32, i32) {
    %c0_i32 = arith.constant 0 : i32
    %c0_i32_0 = arith.constant 0 : i32
    %c0_i32_1 = arith.constant 0 : i32
    return %c0_i32, %c0_i32_0 : i32, i32
  }
  func.func @transform_3(%arg0: i32) -> (i32, i32) {
    %c0_i32 = arith.constant 0 : i32
    %c0_i32_0 = arith.constant 0 : i32
    return %arg0, %c0_i32 : i32, i32
  }
}

module attributes {stable_mosaic.version = 11 : i64} {
  func.func @_fc_fused_kernel(%arg0: i32, %arg1: i32, %arg2: memref<2x896xbf16, #tpu.memory_space<vmem>>, %arg3: memref<896x256xbf16, #tpu.memory_space<vmem>>, %arg4: memref<1x256xf32, #tpu.memory_space<vmem>>, %arg5: memref<256x4xbf16, #tpu.memory_space<vmem>>, %arg6: memref<1x2x4xf32, #tpu.memory_space<vmem>>, %arg7: memref<2x256xf32, #tpu.memory_space<vmem>>) attributes {dimension_semantics = [#tpu.dimension_semantics<parallel>, #tpu.dimension_semantics<arbitrary>], iteration_bounds = array<i64: 4, 7>, scalar_prefetch = 0 : i64, scratch_operands = 1 : i64, tpu.core_type = #tpu.core_type<tc>, window_params = [{transform_indices = @transform_0, window_bounds = array<i64: 2, 896>}, {transform_indices = @transform_1, window_bounds = array<i64: 896, 256>}, {transform_indices = @transform_2, window_bounds = array<i64: 1, 256>}, {transform_indices = @transform_3, window_bounds = array<i64: 256, 4>}, {transform_indices = @transform_4, window_bounds = array<i64: 1, 2, 4>}]} {
    %c0_i32 = arith.constant 0 : i32
    %0 = arith.cmpi eq, %arg1, %c0_i32 : i32
    %1 = arith.extui %0 : i1 to i32
    %c0_i32_0 = arith.constant 0 : i32
    %2 = arith.cmpi ne, %1, %c0_i32_0 : i32
    scf.if %2 {
      %cst_9 = arith.constant 0.000000e+00 : f32
      %12 = vector.broadcast %cst_9 : f32 to vector<2x256xf32>
      %c0_10 = arith.constant 0 : index
      %c0_11 = arith.constant 0 : index
      %13 = vector.load %arg7[%c0_10, %c0_11] : memref<2x256xf32, #tpu.memory_space<vmem>>, vector<2x256xf32>
      tpu.vector_store %arg7[%c0_10, %c0_11], %12 {strides = array<i32>} : memref<2x256xf32, #tpu.memory_space<vmem>>, vector<2x256xf32>,
    } else {
    }
    %c0 = arith.constant 0 : index
    %c0_1 = arith.constant 0 : index
    %3 = vector.load %arg7[%c0, %c0_1] : memref<2x256xf32, #tpu.memory_space<vmem>>, vector<2x256xf32>
    %c0_2 = arith.constant 0 : index
    %c0_3 = arith.constant 0 : index
    %4 = vector.load %arg2[%c0_2, %c0_3] : memref<2x896xbf16, #tpu.memory_space<vmem>>, vector<2x896xbf16>
    %c0_4 = arith.constant 0 : index
    %c0_5 = arith.constant 0 : index
    %5 = vector.load %arg3[%c0_4, %c0_5] : memref<896x256xbf16, #tpu.memory_space<vmem>>, vector<896x256xbf16>
    %cst = arith.constant dense<0.000000e+00> : vector<2x256xf32>
    %6 = tpu.matmul %4, %5, %cst {dimension_numbers = #tpu.dot_dimension_numbers<[1], [0], [0], [1], [0, 0, 1, 1], [], []>} : vector<2x896xbf16>, vector<896x256xbf16>, vector<2x256xf32> -> vector<2x256xf32>
    %7 = arith.addf %3, %6 : vector<2x256xf32>
    %c0_6 = arith.constant 0 : index
    %c0_7 = arith.constant 0 : index
    %8 = vector.load %arg7[%c0_6, %c0_7] : memref<2x256xf32, #tpu.memory_space<vmem>>, vector<2x256xf32>
    tpu.vector_store %arg7[%c0_6, %c0_7], %7 {strides = array<i32>} : memref<2x256xf32, #tpu.memory_space<vmem>>, vector<2x256xf32>,
    %c6_i32 = arith.constant 6 : i32
    %9 = arith.cmpi eq, %arg1, %c6_i32 : i32
    %10 = arith.extui %9 : i1 to i32
    %c0_i32_8 = arith.constant 0 : i32
    %11 = arith.cmpi ne, %10, %c0_i32_8 : i32
    scf.if %11 {
      %c0_9 = arith.constant 0 : index
      %c0_10 = arith.constant 0 : index
      %12 = vector.load %arg7[%c0_9, %c0_10] : memref<2x256xf32, #tpu.memory_space<vmem>>, vector<2x256xf32>
      %c0_11 = arith.constant 0 : index
      %c0_12 = arith.constant 0 : index
      %13 = vector.load %arg4[%c0_11, %c0_12] : memref<1x256xf32, #tpu.memory_space<vmem>>, vector<1x256xf32>
      %14 = vector.broadcast %13 : vector<1x256xf32> to vector<2x256xf32>
      %15 = arith.addf %12, %14 : vector<2x256xf32>
      %cst_13 = arith.constant 0.000000e+00 : f32
      %16 = vector.broadcast %cst_13 : f32 to vector<2x256xf32>
      %17 = arith.maximumf %15, %16 : vector<2x256xf32>
      %18 = arith.truncf %17 : vector<2x256xf32> to vector<2x256xbf16>
      %c0_14 = arith.constant 0 : index
      %c0_15 = arith.constant 0 : index
      %19 = vector.load %arg5[%c0_14, %c0_15] : memref<256x4xbf16, #tpu.memory_space<vmem>>, vector<256x4xbf16>
      %cst_16 = arith.constant dense<0.000000e+00> : vector<2x4xf32>
      %20 = tpu.matmul %18, %19, %cst_16 {dimension_numbers = #tpu.dot_dimension_numbers<[1], [0], [0], [1], [0, 0, 1, 1], [], []>} : vector<2x256xbf16>, vector<256x4xbf16>, vector<2x4xf32> -> vector<2x4xf32>
      %c0_17 = arith.constant 0 : index
      %c0_18 = arith.constant 0 : index
      %c0_19 = arith.constant 0 : index
      %21 = vector.load %arg6[%c0_17, %c0_18, %c0_19] : memref<1x2x4xf32, #tpu.memory_space<vmem>>, vector<1x2x4xf32>
      %22 = vector.shape_cast %21 : vector<1x2x4xf32> to vector<2x4xf32>
      %23 = vector.shape_cast %20 : vector<2x4xf32> to vector<1x2x4xf32>
      tpu.vector_store %arg6[%c0_17, %c0_18, %c0_19], %23 {strides = array<i32>} : memref<1x2x4xf32, #tpu.memory_space<vmem>>, vector<1x2x4xf32>,
    } else {
    }
    return
  }
  func.func @transform_0(%arg0: i32, %arg1: i32) -> (i32, i32) {
    %c0_i32 = arith.constant 0 : i32
    %c0_i32_0 = arith.constant 0 : i32
    return %c0_i32, %arg1 : i32, i32
  }
  func.func @transform_1(%arg0: i32, %arg1: i32) -> (i32, i32) {
    %c0_i32 = arith.constant 0 : i32
    return %arg1, %arg0 : i32, i32
  }
  func.func @transform_2(%arg0: i32, %arg1: i32) -> (i32, i32) {
    %c0_i32 = arith.constant 0 : i32
    %c0_i32_0 = arith.constant 0 : i32
    return %c0_i32, %arg0 : i32, i32
  }
  func.func @transform_3(%arg0: i32, %arg1: i32) -> (i32, i32) {
    %c0_i32 = arith.constant 0 : i32
    %c0_i32_0 = arith.constant 0 : i32
    return %arg0, %c0_i32 : i32, i32
  }
  func.func @transform_4(%arg0: i32, %arg1: i32) -> (i32, i32, i32) {
    %c0_i32 = arith.constant 0 : i32
    %c0_i32_0 = arith.constant 0 : i32
    %c0_i32_1 = arith.constant 0 : i32
    return %arg0, %c0_i32, %c0_i32_0 : i32, i32, i32
  }
}

</mosaic_0001>

<bundles_post_ra>
// kernel: cnn_forward.3
= control target key start
LH: loop header
LB: loop body
LE: loop exit
PB: predicated region body
PF: predicated region fallthrough
CT: control target
= control target key end

     0   :  { %s4327_s12 = smov 0   ;;  %s4329_s13 = smov 0   ;;  %s5498_s0 = inlined_call_operand.vmem [shape: bf16[4,1800,27], index: 0, kind: input, shape index: {}]   ;;  %s5499_s1 = inlined_call_operand.vmem [shape: bf16[27,32], index: 1, kind: input, shape index: {}]   ;;  %s5500_s2 = inlined_call_operand.vmem [shape: f32[1,32], index: 2, kind: input, shape index: {}]   ;;  %s5501_s3 = inlined_call_operand.vmem [shape: bf16[1800,32], index: 3, kind: output, shape index: {}]  }
   0x1   :  { %s4331_s14 = smov 0  }
   0x2 LB: > { %s3251_s15 = sadd.s32 4294967295, %s4302_s14   ;;  %s4344_s16 = sadd.s32 1, %s4302_s14   ;;  %s4302_s14 = sphi %s4331_s14, %s5672_s14   ;;  %s4298_s13 = sphi %s4329_s13, %s5671_s13   ;;  %s4294_s12 = sphi %s4327_s12, %s5670_s12  }
   0x3   : > { %s17_s17 = ssub.s32 %s4302_s14, %s4344_s16  ;;  %s20_s18 = sadd.s32 1, %s4298_s13 }
   0x4   : > { %p18_p0 = scmp.eq.s32.totalorder %s17_s17, 0  ;;  %p27_p1 = scmp.ne.s32.totalorder %s4298_s13, %s4294_s12 }
   0x5   : > { %p28_p2 = scmp.eq.s32.totalorder %s4302_s14, 0  ;;  %p3254_p4 = scmp.ge.s32.totalorder %s4302_s14, 5 }
   0x6   : > { %s4353_s19 = scalar_select %p18_p0, %s4298_s13, %s20_s18  }
   0x7   : > { %p29_p3 = por %p28_p2, %p27_p1  ;;  %127 = sbr.rel (%p3254_p4) target bundleno = 65 (0x41), region = 24 }
   0xe   : > { %130 = sbr.rel (!%p29_p3) target bundleno = 65 (0x41), region = 28  ;;  %s132_s20 = sand.u32 (%p29_p3), 1, %s4298_s13  }
   0xf   : > { %s3627_s21 = smul.u32 (%p29_p3), 180, %s4302_s14 }
  0x10   : > { %s4157_s22 = smul.u32 (%p29_p3), 720, %s132_s20 }
  0x11   : > { %s4361_s25 = scalar_lea.vmem (%p29_p3), %s5498_s0, %s3627_s21 }
  0x12   : > { %v153_v0 = vld [vmem:[%s4361_s25] sm:$0xff] (%p29_p3)   ;;  %v157_v1 = vld [vmem:[%s4361_s25 + $0x8] sm:$0xff] (%p29_p3)   ;;  %v161_v2 = vld [vmem:[%s4361_s25 + $0x10] sm:$0xff] (%p29_p3)   ;;  %s4366_s26 = scalar_lea.vmem (%p29_p3), [#allocation2], %s4157_s22 }
  0x13   : > { %154 = vst [vmem:[%s4366_s26] sm:$0xff] (%p29_p3), %v153_v0   ;;  %158 = vst [vmem:[%s4366_s26 + $0x8] sm:$0xff] (%p29_p3), %v157_v1   ;;  %v165_v3 = vld [vmem:[%s4361_s25 + $0x18] sm:$0xff] (%p29_p3)   ;;  %v169_v4 = vld [vmem:[%s4361_s25 + $0x20] sm:$0xff] (%p29_p3)  }
  0x14   : > { %162 = vst [vmem:[%s4366_s26 + $0x10] sm:$0xff] (%p29_p3), %v161_v2   ;;  %v173_v5 = vld [vmem:[%s4361_s25 + $0x28] sm:$0xff] (%p29_p3)   ;;  %166 = vst [vmem:[%s4366_s26 + $0x18] sm:$0xff] (%p29_p3), %v165_v3   ;;  %v177_v6 = vld [vmem:[%s4361_s25 + $0x30] sm:$0xff] (%p29_p3)  }
  0x15   : > { %170 = vst [vmem:[%s4366_s26 + $0x20] sm:$0xff] %v169_v4   ;;  %174 = vst [vmem:[%s4366_s26 + $0x28] sm:$0xff] %v173_v5   ;;  %v181_v7 = vld [vmem:[%s4361_s25 + $0x38] sm:$0xff]   ;;  %v185_v8 = vld [vmem:[%s4361_s25 + $0x40] sm:$0xff]  }
  0x16   : > { %178 = vst [vmem:[%s4366_s26 + $0x30] sm:$0xff] %v177_v6   ;;  %182 = vst [vmem:[%s4366_s26 + $0x38] sm:$0xff] %v181_v7   ;;  %v189_v9 = vld [vmem:[%s4361_s25 + $0x48] sm:$0xff]   ;;  %v193_v10 = vld [vmem:[%s4361_s25 + $0x50] sm:$0xff]  }
  0x17   : > { %186 = vst [vmem:[%s4366_s26 + $0x40] sm:$0xff] %v185_v8   ;;  %v197_v11 = vld [vmem:[%s4361_s25 + $0x58] sm:$0xff]   ;;  %190 = vst [vmem:[%s4366_s26 + $0x48] sm:$0xff] %v189_v9   ;;  %v201_v12 = vld [vmem:[%s4361_s25 + $0x60] sm:$0xff]  }
  0x18   : > { %194 = vst [vmem:[%s4366_s26 + $0x50] sm:$0xff] %v193_v10   ;;  %198 = vst [vmem:[%s4366_s26 + $0x58] sm:$0xff] %v197_v11   ;;  %v205_v13 = vld [vmem:[%s4361_s25 + $0x68] sm:$0xff]   ;;  %v209_v14 = vld [vmem:[%s4361_s25 + $0x70] sm:$0xff]  }
  0x19   : > { %202 = vst [vmem:[%s4366_s26 + $0x60] sm:$0xff] %v201_v12   ;;  %206 = vst [vmem:[%s4366_s26 + $0x68] sm:$0xff] %v205_v13   ;;  %v213_v15 = vld [vmem:[%s4361_s25 + $0x78] sm:$0xff]   ;;  %v217_v16 = vld [vmem:[%s4361_s25 + $0x80] sm:$0xff]  }
  0x1a   : > { %210 = vst [vmem:[%s4366_s26 + $0x70] sm:$0xff] %v209_v14   ;;  %v221_v17 = vld [vmem:[%s4361_s25 + $0x88] sm:$0xff]   ;;  %214 = vst [vmem:[%s4366_s26 + $0x78] sm:$0xff] %v213_v15   ;;  %v225_v18 = vld [vmem:[%s4361_s25 + $0x90] sm:$0xff]  }
  0x1b   : > { %218 = vst [vmem:[%s4366_s26 + $0x80] sm:$0xff] %v217_v16   ;;  %222 = vst [vmem:[%s4366_s26 + $0x88] sm:$0xff] %v221_v17   ;;  %v229_v19 = vld [vmem:[%s4361_s25 + $0x98] sm:$0xff]   ;;  %v233_v20 = vld [vmem:[%s4361_s25 + $0xa0] sm:$0xff]  }
  0x1c   : > { %226 = vst [vmem:[%s4366_s26 + $0x90] sm:$0xff] %v225_v18   ;;  %230 = vst [vmem:[%s4366_s26 + $0x98] sm:$0xff] %v229_v19   ;;  %v237_v21 = vld [vmem:[%s4361_s25 + $0xa8] sm:$0xff]   ;;  %v241_v22 = vld [vmem:[%s4361_s25 + $0xb0] sm:$0xf] }
  0x1d   : > { %234 = vst [vmem:[%s4366_s26 + $0xa0] sm:$0xff] %v233_v20   ;;  %v243_v23 = vld [vmem:[%s4361_s25 + $0x384] sm:$0xff]   ;;  %238 = vst [vmem:[%s4366_s26 + $0xa8] sm:$0xff] %v237_v21   ;;  %v247_v24 = vld [vmem:[%s4361_s25 + $0x38c] sm:$0xff]  }
  0x1e   : > { %242 = vst [vmem:[%s4366_s26 + $0xb0] sm:$0xf] %v241_v22  ;;  %244 = vst [vmem:[%s4366_s26 + $0xb4] sm:$0xff] %v243_v23   ;;  %v251_v25 = vld [vmem:[%s4361_s25 + $0x394] sm:$0xff]   ;;  %v255_v26 = vld [vmem:[%s4361_s25 + $0x39c] sm:$0xff]  }
  0x1f   : > { %248 = vst [vmem:[%s4366_s26 + $0xbc] sm:$0xff] %v247_v24   ;;  %252 = vst [vmem:[%s4366_s26 + $0xc4] sm:$0xff] %v251_v25   ;;  %v259_v27 = vld [vmem:[%s4361_s25 + $0x3a4] sm:$0xff]   ;;  %v263_v28 = vld [vmem:[%s4361_s25 + $0x3ac] sm:$0xff]  }
  0x20   : > { %256 = vst [vmem:[%s4366_s26 + $0xcc] sm:$0xff] %v255_v26   ;;  %v267_v29 = vld [vmem:[%s4361_s25 + $0x3b4] sm:$0xff]   ;;  %260 = vst [vmem:[%s4366_s26 + $0xd4] sm:$0xff] %v259_v27   ;;  %v271_v30 = vld [vmem:[%s4361_s25 + $0x3bc] sm:$0xff]  }
  0x21   : > { %264 = vst [vmem:[%s4366_s26 + $0xdc] sm:$0xff] %v263_v28   ;;  %268 = vst [vmem:[%s4366_s26 + $0xe4] sm:$0xff] %v267_v29   ;;  %v275_v31 = vld [vmem:[%s4361_s25 + $0x3c4] sm:$0xff]   ;;  %v279_v32 = vld [vmem:[%s4361_s25 + $0x3cc] sm:$0xff]  }
  0x22   : > { %272 = vst [vmem:[%s4366_s26 + $0xec] sm:$0xff] %v271_v30   ;;  %276 = vst [vmem:[%s4366_s26 + $0xf4] sm:$0xff] %v275_v31   ;;  %v283_v33 = vld [vmem:[%s4361_s25 + $0x3d4] sm:$0xff]   ;;  %v287_v34 = vld [vmem:[%s4361_s25 + $0x3dc] sm:$0xff]  }
  0x23   : > { %280 = vst [vmem:[%s4366_s26 + $0xfc] sm:$0xff] %v279_v32   ;;  %v291_v35 = vld [vmem:[%s4361_s25 + $0x3e4] sm:$0xff]   ;;  %284 = vst [vmem:[%s4366_s26 + $0x104] sm:$0xff] %v283_v33   ;;  %v295_v36 = vld [vmem:[%s4361_s25 + $0x3ec] sm:$0xff]  }
  0x24   : > { %288 = vst [vmem:[%s4366_s26 + $0x10c] sm:$0xff] %v287_v34   ;;  %292 = vst [vmem:[%s4366_s26 + $0x114] sm:$0xff] %v291_v35   ;;  %v299_v37 = vld [vmem:[%s4361_s25 + $0x3f4] sm:$0xff]   ;;  %v303_v38 = vld [vmem:[%s4361_s25 + $0x3fc] sm:$0xff]  }
  0x25   : > { %296 = vst [vmem:[%s4366_s26 + $0x11c] sm:$0xff] %v295_v36   ;;  %300 = vst [vmem:[%s4366_s26 + $0x124] sm:$0xff] %v299_v37   ;;  %v307_v39 = vld [vmem:[%s4361_s25 + $0x404] sm:$0xff]   ;;  %v311_v40 = vld [vmem:[%s4361_s25 + $0x40c] sm:$0xff]  }
  0x26   : > { %304 = vst [vmem:[%s4366_s26 + $0x12c] sm:$0xff] %v303_v38   ;;  %v315_v41 = vld [vmem:[%s4361_s25 + $0x414] sm:$0xff]   ;;  %308 = vst [vmem:[%s4366_s26 + $0x134] sm:$0xff] %v307_v39   ;;  %v319_v42 = vld [vmem:[%s4361_s25 + $0x41c] sm:$0xff]  }
  0x27   : > { %312 = vst [vmem:[%s4366_s26 + $0x13c] sm:$0xff] %v311_v40   ;;  %316 = vst [vmem:[%s4366_s26 + $0x144] sm:$0xff] %v315_v41   ;;  %v323_v43 = vld [vmem:[%s4361_s25 + $0x424] sm:$0xff]   ;;  %v327_v44 = vld [vmem:[%s4361_s25 + $0x42c] sm:$0xff]  }
  0x28   : > { %320 = vst [vmem:[%s4366_s26 + $0x14c] sm:$0xff] %v319_v42   ;;  %324 = vst [vmem:[%s4366_s26 + $0x154] sm:$0xff] %v323_v43   ;;  %v331_v45 = vld [vmem:[%s4361_s25 + $0x434] sm:$0xf]  ;;  %v333_v46 = vld [vmem:[%s4361_s25 + $0x708] sm:$0xff]  }
  0x29   : > { %328 = vst [vmem:[%s4366_s26 + $0x15c] sm:$0xff] %v327_v44   ;;  %v337_v47 = vld [vmem:[%s4361_s25 + $0x710] sm:$0xff]   ;;  %332 = vst [vmem:[%s4366_s26 + $0x164] sm:$0xf] %v331_v45  ;;  %v341_v48 = vld [vmem:[%s4361_s25 + $0x718] sm:$0xff]  }
  0x2a   : > { %334 = vst [vmem:[%s4366_s26 + $0x168] sm:$0xff] %v333_v46   ;;  %338 = vst [vmem:[%s4366_s26 + $0x170] sm:$0xff] %v337_v47   ;;  %v345_v49 = vld [vmem:[%s4361_s25 + $0x720] sm:$0xff]   ;;  %v349_v50 = vld [vmem:[%s4361_s25 + $0x728] sm:$0xff]  }
  0x2b   : > { %342 = vst [vmem:[%s4366_s26 + $0x178] sm:$0xff] %v341_v48   ;;  %346 = vst [vmem:[%s4366_s26 + $0x180] sm:$0xff] %v345_v49   ;;  %v353_v51 = vld [vmem:[%s4361_s25 + $0x730] sm:$0xff]   ;;  %v357_v52 = vld [vmem:[%s4361_s25 + $0x738] sm:$0xff]  }
  0x2c   : > { %350 = vst [vmem:[%s4366_s26 + $0x188] sm:$0xff] %v349_v50   ;;  %v361_v53 = vld [vmem:[%s4361_s25 + $0x740] sm:$0xff]   ;;  %354 = vst [vmem:[%s4366_s26 + $0x190] sm:$0xff] %v353_v51   ;;  %v365_v54 = vld [vmem:[%s4361_s25 + $0x748] sm:$0xff]  }
  0x2d   : > { %358 = vst [vmem:[%s4366_s26 + $0x198] sm:$0xff] %v357_v52   ;;  %362 = vst [vmem:[%s4366_s26 + $0x1a0] sm:$0xff] %v361_v53   ;;  %v369_v55 = vld [vmem:[%s4361_s25 + $0x750] sm:$0xff]   ;;  %v373_v56 = vld [vmem:[%s4361_s25 + $0x758] sm:$0xff]  }
  0x2e   : > { %366 = vst [vmem:[%s4366_s26 + $0x1a8] sm:$0xff] %v365_v54   ;;  %370 = vst [vmem:[%s4366_s26 + $0x1b0] sm:$0xff] %v369_v55   ;;  %v377_v57 = vld [vmem:[%s4361_s25 + $0x760] sm:$0xff]   ;;  %v381_v58 = vld [vmem:[%s4361_s25 + $0x768] sm:$0xff]  }
  0x2f   : > { %374 = vst [vmem:[%s4366_s26 + $0x1b8] sm:$0xff] %v373_v56   ;;  %v385_v59 = vld [vmem:[%s4361_s25 + $0x770] sm:$0xff]   ;;  %378 = vst [vmem:[%s4366_s26 + $0x1c0] sm:$0xff] %v377_v57   ;;  %v389_v60 = vld [vmem:[%s4361_s25 + $0x778] sm:$0xff]  }
  0x30   : > { %382 = vst [vmem:[%s4366_s26 + $0x1c8] sm:$0xff] %v381_v58   ;;  %386 = vst [vmem:[%s4366_s26 + $0x1d0] sm:$0xff] %v385_v59   ;;  %v393_v61 = vld [vmem:[%s4361_s25 + $0x780] sm:$0xff]   ;;  %v397_v62 = vld [vmem:[%s4361_s25 + $0x788] sm:$0xff]  }
  0x31   : > { %390 = vst [vmem:[%s4366_s26 + $0x1d8] sm:$0xff] %v389_v60   ;;  %394 = vst [vmem:[%s4366_s26 + $0x1e0] sm:$0xff] %v393_v61   ;;  %v401_v63 = vld [vmem:[%s4361_s25 + $0x790] sm:$0xff]   ;;  %v405_v0 = vld [vmem:[%s4361_s25 + $0x798] sm:$0xff]  }
  0x32   : > { %398 = vst [vmem:[%s4366_s26 + $0x1e8] sm:$0xff] %v397_v62   ;;  %v409_v1 = vld [vmem:[%s4361_s25 + $0x7a0] sm:$0xff]   ;;  %402 = vst [vmem:[%s4366_s26 + $0x1f0] sm:$0xff] %v401_v63   ;;  %v413_v2 = vld [vmem:[%s4361_s25 + $0x7a8] sm:$0xff]  }
  0x33   : > { %406 = vst [vmem:[%s4366_s26 + $0x1f8] sm:$0xff] %v405_v0   ;;  %410 = vst [vmem:[%s4366_s26 + $0x200] sm:$0xff] %v409_v1   ;;  %v417_v3 = vld [vmem:[%s4361_s25 + $0x7b0] sm:$0xff]   ;;  %v421_v4 = vld [vmem:[%s4361_s25 + $0x7b8] sm:$0xf] }
  0x34   : > { %414 = vst [vmem:[%s4366_s26 + $0x208] sm:$0xff] %v413_v2   ;;  %418 = vst [vmem:[%s4366_s26 + $0x210] sm:$0xff] %v417_v3   ;;  %v423_v5 = vld [vmem:[%s4361_s25 + $0xa8c] sm:$0xff]   ;;  %v427_v6 = vld [vmem:[%s4361_s25 + $0xa94] sm:$0xff]  }
  0x35   : > { %422 = vst [vmem:[%s4366_s26 + $0x218] sm:$0xf] %v421_v4  ;;  %v431_v7 = vld [vmem:[%s4361_s25 + $0xa9c] sm:$0xff]   ;;  %424 = vst [vmem:[%s4366_s26 + $0x21c] sm:$0xff] %v423_v5   ;;  %v435_v8 = vld [vmem:[%s4361_s25 + $0xaa4] sm:$0xff]  }
  0x36   : > { %428 = vst [vmem:[%s4366_s26 + $0x224] sm:$0xff] %v427_v6   ;;  %432 = vst [vmem:[%s4366_s26 + $0x22c] sm:$0xff] %v431_v7   ;;  %v439_v9 = vld [vmem:[%s4361_s25 + $0xaac] sm:$0xff]   ;;  %v443_v10 = vld [vmem:[%s4361_s25 + $0xab4] sm:$0xff]  }
  0x37   : > { %436 = vst [vmem:[%s4366_s26 + $0x234] sm:$0xff] %v435_v8   ;;  %440 = vst [vmem:[%s4366_s26 + $0x23c] sm:$0xff] %v439_v9   ;;  %v447_v11 = vld [vmem:[%s4361_s25 + $0xabc] sm:$0xff]   ;;  %v451_v12 = vld [vmem:[%s4361_s25 + $0xac4] sm:$0xff]  }
  0x38   : > { %444 = vst [vmem:[%s4366_s26 + $0x244] sm:$0xff] %v443_v10   ;;  %v455_v13 = vld [vmem:[%s4361_s25 + $0xacc] sm:$0xff]   ;;  %448 = vst [vmem:[%s4366_s26 + $0x24c] sm:$0xff] %v447_v11   ;;  %v459_v14 = vld [vmem:[%s4361_s25 + $0xad4] sm:$0xff]  }
  0x39   : > { %452 = vst [vmem:[%s4366_s26 + $0x254] sm:$0xff] %v451_v12   ;;  %456 = vst [vmem:[%s4366_s26 + $0x25c] sm:$0xff] %v455_v13   ;;  %v463_v15 = vld [vmem:[%s4361_s25 + $0xadc] sm:$0xff]   ;;  %v467_v16 = vld [vmem:[%s4361_s25 + $0xae4] sm:$0xff]  }
  0x3a   : > { %460 = vst [vmem:[%s4366_s26 + $0x264] sm:$0xff] %v459_v14   ;;  %464 = vst [vmem:[%s4366_s26 + $0x26c] sm:$0xff] %v463_v15   ;;  %v471_v17 = vld [vmem:[%s4361_s25 + $0xaec] sm:$0xff]   ;;  %v475_v18 = vld [vmem:[%s4361_s25 + $0xaf4] sm:$0xff]  }
  0x3b   : > { %468 = vst [vmem:[%s4366_s26 + $0x274] sm:$0xff] %v467_v16   ;;  %v479_v19 = vld [vmem:[%s4361_s25 + $0xafc] sm:$0xff]   ;;  %472 = vst [vmem:[%s4366_s26 + $0x27c] sm:$0xff] %v471_v17   ;;  %v483_v20 = vld [vmem:[%s4361_s25 + $0xb04] sm:$0xff]  }
  0x3c   : > { %476 = vst [vmem:[%s4366_s26 + $0x284] sm:$0xff] %v475_v18   ;;  %480 = vst [vmem:[%s4366_s26 + $0x28c] sm:$0xff] %v479_v19   ;;  %v487_v21 = vld [vmem:[%s4361_s25 + $0xb0c] sm:$0xff]   ;;  %v491_v22 = vld [vmem:[%s4361_s25 + $0xb14] sm:$0xff]  }
  0x3d   : > { %484 = vst [vmem:[%s4366_s26 + $0x294] sm:$0xff] %v483_v20   ;;  %488 = vst [vmem:[%s4366_s26 + $0x29c] sm:$0xff] %v487_v21   ;;  %v495_v23 = vld [vmem:[%s4361_s25 + $0xb1c] sm:$0xff]   ;;  %v499_v24 = vld [vmem:[%s4361_s25 + $0xb24] sm:$0xff]  }
  0x3e   : > { %492 = vst [vmem:[%s4366_s26 + $0x2a4] sm:$0xff] %v491_v22   ;;  %v503_v25 = vld [vmem:[%s4361_s25 + $0xb2c] sm:$0xff]   ;;  %496 = vst [vmem:[%s4366_s26 + $0x2ac] sm:$0xff] %v495_v23   ;;  %v507_v26 = vld [vmem:[%s4361_s25 + $0xb34] sm:$0xff]  }
  0x3f   : > { %500 = vst [vmem:[%s4366_s26 + $0x2b4] sm:$0xff] %v499_v24   ;;  %504 = vst [vmem:[%s4366_s26 + $0x2bc] sm:$0xff] %v503_v25   ;;  %v511_v27 = vld [vmem:[%s4361_s25 + $0xb3c] sm:$0xf] }
  0x40   : > { %508 = vst [vmem:[%s4366_s26 + $0x2c4] sm:$0xff] %v507_v26   ;;  %512 = vst [vmem:[%s4366_s26 + $0x2cc] sm:$0xf] %v511_v27 }
  0x41 PF: > { %p3256_p5 = scmp.ge.s32.totalorder %s4302_s14, 1  ;;  %p894_p6 = scmp.lt.s32.totalorder %s4302_s14, 6 }
  0x43   : > { %p895_p7 = pnand %p3256_p5, %p894_p6 }
  0x45   : > { %898 = sbr.rel (%p895_p7) target bundleno = 668 (0x29c), region = 69 }
  0x4c   : > { %v4186_v28 = vld [vmem:[%s5499_s1] sm:$0xff]   ;;  %v5502_v29 = vmov 0.0   ;;  %v4187_v30 = vld [vmem:[%s5499_s1 + $0x8] sm:$0x3f]   ;;  %vm1175_vm0 = vcmask 1044480   ;;  %vm1176_vm1 = vcmask 1045504  }
  0x4d   : > { %3773 = vmatprep.subr.bf16.mxu0 %v5502_v29  ;;  %3869 = vmatprep.subr.bf16.mxu1 %v5502_v29  ;;  %s901_s4 = sand.u32 1, %s4294_s12   ;;  %v4305_v31 = vmov 65535   ;;  %vm4306_vm2 = vmmov 0   ;;  %vm1105_vm3 = vcmask 220160   ;;  %s925_s7 = smul.u32 45, %s3251_s15  ;;  %vm3143_vm4 = vcmask 257024  }
  0x4e   : > { %3774 = vmatpush3.bf16.msra.mxu0 %v4186_v28  ;;  %3870 = vmatpush3.bf16.msra.mxu1 %v4186_v28  ;;  %v1177_v32 = vsel %vm1175_vm0, 4294967295, %v4305_v31  ;;  %s4158_s5 = smul.u32 720, %s901_s4 }
  0x4f   : > { %3775 = vmatprep.subr.bf16.mxu0 %v5502_v29  ;;  %3871 = vmatprep.subr.bf16.mxu1 %v5502_v29  ;;  %v1178_v33 = vsel %vm1176_vm1, %v1177_v32, 0  ;;  %p926_p8 = scmp.lt.s32.totalorder %s925_s7, 224 }
  0x50   : > { %3777 = vmatprep.mubr.msk.bf16.mxu0 %vm4306_vm2, %v5502_v29  ;;  %3873 = vmatprep.mubr.msk.bf16.mxu1 %vm4306_vm2, %v5502_v29  ;;  %v1180_v34 = vand.u32 %v4187_v30, %v1178_v33  ;;  %s4566_s6 = scalar_lea.vmem [#allocation2], %s4158_s5 }
  0x51   : > { %v4188_v35 = vld [vmem:[%s4566_s6] sm:$0xff]   ;;  %v4189_v36 = vld [vmem:[%s4566_s6 + $0xb4] sm:$0xff]   ;;  %v4190_v37 = vld [vmem:[%s4566_s6 + $0x8] sm:$0xff]   ;;  %s5674_s7 = smov (!%p926_p8, %s925_s7), 224 }
  0x52   : > { %3776 = vmatpush3.bf16.msra.mxu0 %v1180_v34  ;;  %3872 = vmatpush3.bf16.msra.mxu1 %v1180_v34  ;;  %v4191_v38 = vld [vmem:[%s4566_s6 + $0xbc] sm:$0xff]   ;;  %v4192_v39 = vld [vmem:[%s4566_s6 + $0x10] sm:$0xff]   ;;  %v4193_v40 = vld [vmem:[%s4566_s6 + $0xc4] sm:$0xff]   ;;  %s3257_s10 = sshll.u32 %s5674_s7, 2 }
  0x53   : > { %3965 = vmatprep.subr.bf16.mxu0 %v5502_v29  ;;  %4061 = vmatprep.subr.bf16.mxu1 %v5502_v29  ;;  %v4194_v41 = vld [vmem:[%s4566_s6 + $0x18] sm:$0xff]   ;;  %v4195_v42 = vld [vmem:[%s4566_s6 + $0xcc] sm:$0xff]   ;;  %v4196_v43 = vld [vmem:[%s4566_s6 + $0x20] sm:$0xff]   ;;  %s5224_s14 = scalar_lea.vmem %s5501_s3, %s3257_s10 }
  0x54   : > { %v4197_v44 = vld [vmem:[%s4566_s6 + $0xd4] sm:$0xff]   ;;  %v4198_v45 = vld [vmem:[%s4566_s6 + $0x28] sm:$0xff]   ;;  %v4199_v46 = vld [vmem:[%s4566_s6 + $0xdc] sm:$0xff]  }
  0x55   : > { %3778 = vmatmul.mubr.msk.bf16.vlgmr.msra.gmra.mrb[0].mxu0 %vm1105_vm3, %v4188_v35  ;;  %3874 = vmatmul.mubr.msk.bf16.vlgmr.msra.gmra.mrb[0].mxu1 %vm1105_vm3, %v4189_v36  ;;  %v4200_v47 = vld [vmem:[%s4566_s6 + $0x30] sm:$0xff]   ;;  %v4201_v48 = vld [vmem:[%s4566_s6 + $0xe4] sm:$0xff]   ;;  %v4202_v49 = vld [vmem:[%s4566_s6 + $0x38] sm:$0xff]  }
  0x56   : > { %3966 = vmatpush3.bf16.msra.mxu0 %v4186_v28  ;;  %4062 = vmatpush3.bf16.msra.mxu1 %v4186_v28  ;;  %v4203_v50 = vld [vmem:[%s4566_s6 + $0xec] sm:$0xff]   ;;  %v4204_v51 = vld [vmem:[%s4566_s6 + $0x40] sm:$0xff]   ;;  %v4205_v52 = vld [vmem:[%s4566_s6 + $0xf4] sm:$0xff]  }
  0x57   : > { %3781 = vmatprep.mubr.msk.bf16.mxu0 %vm4306_vm2, %v5502_v29  ;;  %3877 = vmatprep.mubr.msk.bf16.mxu1 %vm4306_vm2, %v5502_v29  ;;  %v4206_v53 = vld [vmem:[%s4566_s6 + $0x48] sm:$0xff]   ;;  %v4207_v54 = vld [vmem:[%s4566_s6 + $0xfc] sm:$0xff]   ;;  %v4208_v55 = vld [vmem:[%s4566_s6 + $0x50] sm:$0xff]  }
  0x58   : > { %3967 = vmatprep.subr.bf16.mxu0 %v5502_v29  ;;  %4063 = vmatprep.subr.bf16.mxu1 %v5502_v29  ;;  %v4209_v56 = vld [vmem:[%s4566_s6 + $0x104] sm:$0xff]   ;;  %v4210_v57 = vld [vmem:[%s4566_s6 + $0x58] sm:$0xff]   ;;  %v4211_v58 = vld [vmem:[%s4566_s6 + $0x10c] sm:$0xff]  }
  0x59   : > { %v4212_v59 = vld [vmem:[%s4566_s6 + $0x60] sm:$0xff]   ;;  %v4213_v60 = vld [vmem:[%s4566_s6 + $0x114] sm:$0xff]   ;;  %v4214_v61 = vld [vmem:[%s4566_s6 + $0x68] sm:$0xff]  }
  0x5a   : > { %3968 = vmatpush3.bf16.msra.mxu0 %v1180_v34  ;;  %4064 = vmatpush3.bf16.msra.mxu1 %v1180_v34  ;;  %v4215_v62 = vld [vmem:[%s4566_s6 + $0x11c] sm:$0xff]   ;;  %v4216_v63 = vld [vmem:[%s4566_s6 + $0x70] sm:$0xff]   ;;  %v4217_v0 = vld [vmem:[%s4566_s6 + $0x124] sm:$0xff]  }
  0x5b   : > { %v4218_v1 = vld [vmem:[%s4566_s6 + $0x78] sm:$0xff]   ;;  %v4219_v2 = vld [vmem:[%s4566_s6 + $0x12c] sm:$0xff]   ;;  %v4220_v3 = vld [vmem:[%s4566_s6 + $0x80] sm:$0xff]  }
  0x5c   : > { %v4221_v4 = vld [vmem:[%s4566_s6 + $0x134] sm:$0xff]   ;;  %v4222_v5 = vld [vmem:[%s4566_s6 + $0x88] sm:$0xff]   ;;  %v4223_v6 = vld [vmem:[%s4566_s6 + $0x13c] sm:$0xff]  }
  0x5d   : > { %3782 = vmatmul.mubr.msk.bf16.gmra.mrb[4].mxu0 %vm1105_vm3, %v4190_v37  ;;  %3878 = vmatmul.mubr.msk.bf16.gmra.mrb[4].mxu1 %vm1105_vm3, %v4191_v38  ;;  %v4224_v7 = vld [vmem:[%s4566_s6 + $0x90] sm:$0xff]   ;;  %v4225_v8 = vld [vmem:[%s4566_s6 + $0x144] sm:$0xff]   ;;  %v4226_v9 = vld [vmem:[%s4566_s6 + $0x98] sm:$0xff]  }
  0x5e   : > { %3785 = vmatprep.mubr.msk.bf16.mxu0 %vm4306_vm2, %v5502_v29  ;;  %3881 = vmatprep.mubr.msk.bf16.mxu1 %vm4306_vm2, %v5502_v29  ;;  %v4227_v10 = vld [vmem:[%s4566_s6 + $0x14c] sm:$0xff]   ;;  %v4228_v11 = vld [vmem:[%s4566_s6 + $0xa0] sm:$0xff]   ;;  %v4229_v12 = vld [vmem:[%s4566_s6 + $0x154] sm:$0xff]  }
  0x5f   : > { %v4230_v13 = vld [vmem:[%s4566_s6 + $0xa8] sm:$0xff]   ;;  %v4231_v14 = vld [vmem:[%s4566_s6 + $0x15c] sm:$0xff]   ;;  %v4232_v15 = vld [vmem:[%s4566_s6 + $0xb0] ss:$0 sps:$4 sm:$0xff]  }
  0x60   : > { %v4233_v16 = vld [vmem:[%s4566_s6 + $0x164] ss:$0 sps:$4 sm:$0xff]   ;;  %v4234_v17 = vld [vmem:[%s4566_s6 + $0x168] sm:$0xff]   ;;  %v4235_v18 = vld [vmem:[%s4566_s6 + $0x21c] sm:$0xff]  }
  0x61   : > { %v4236_v19 = vld [vmem:[%s4566_s6 + $0x170] sm:$0xff]   ;;  %v4237_v20 = vld [vmem:[%s4566_s6 + $0x224] sm:$0xff]   ;;  %v4238_v21 = vld [vmem:[%s4566_s6 + $0x178] sm:$0xff]  }
  0x62   : > { %v4239_v22 = vld [vmem:[%s4566_s6 + $0x22c] sm:$0xff]   ;;  %v4240_v23 = vld [vmem:[%s4566_s6 + $0x180] sm:$0xff]   ;;  %v4241_v24 = vld [vmem:[%s4566_s6 + $0x234] sm:$0xff]  }
  0x63   : > { %v4242_v31 = vld [vmem:[%s4566_s6 + $0x188] sm:$0xff]   ;;  %v4243_v32 = vld [vmem:[%s4566_s6 + $0x23c] sm:$0xff]  }
  0x65   : > { %3786 = vmatmul.mubr.msk.bf16.gmra.mrb[8].mxu0 %vm1105_vm3, %v4192_v39  ;;  %3882 = vmatmul.mubr.msk.bf16.gmra.mrb[8].mxu1 %vm1105_vm3, %v4193_v40 }
  0x66   : > { %3789 = vmatprep.mubr.msk.bf16.mxu0 %vm4306_vm2, %v5502_v29  ;;  %3885 = vmatprep.mubr.msk.bf16.mxu1 %vm4306_vm2, %v5502_v29 }
  0x6d   : > { %3790 = vmatmul.mubr.msk.bf16.gmra.mrb[12].mxu0 %vm1105_vm3, %v4194_v41  ;;  %3886 = vmatmul.mubr.msk.bf16.gmra.mrb[12].mxu1 %vm1105_vm3, %v4195_v42 }
  0x6e   : > { %3793 = vmatprep.mubr.msk.bf16.mxu0 %vm4306_vm2, %v5502_v29  ;;  %3889 = vmatprep.mubr.msk.bf16.mxu1 %vm4306_vm2, %v5502_v29 }
  0x75   : > { %3794 = vmatmul.mubr.msk.bf16.gmra.mrb[16].mxu0 %vm1105_vm3, %v4196_v43  ;;  %3890 = vmatmul.mubr.msk.bf16.gmra.mrb[16].mxu1 %vm1105_vm3, %v4197_v44  ;;  %v4244_v43 = vld [vmem:[%s4566_s6 + $0x190] sm:$0xff]   ;;  %v4245_v44 = vld [vmem:[%s4566_s6 + $0x244] sm:$0xff]  }
  0x76   : > { %3797 = vmatprep.mubr.msk.bf16.mxu0 %vm4306_vm2, %v5502_v29  ;;  %3893 = vmatprep.mubr.msk.bf16.mxu1 %vm4306_vm2, %v5502_v29 }
  0x7d   : > { %3798 = vmatmul.mubr.msk.bf16.gmra.mrb[20].mxu0 %vm1105_vm3, %v4198_v45  ;;  %3894 = vmatmul.mubr.msk.bf16.gmra.mrb[20].mxu1 %vm1105_vm3, %v4199_v46 }
  0x7e   : > { %3801 = vmatprep.mubr.msk.bf16.mxu0 %vm4306_vm2, %v5502_v29  ;;  %3897 = vmatprep.mubr.msk.bf16.mxu1 %vm4306_vm2, %v5502_v29 }
  0x85   : > { %3802 = vmatmul.mubr.msk.bf16.gmra.mrb[24].mxu0 %vm1105_vm3, %v4200_v47  ;;  %3898 = vmatmul.mubr.msk.bf16.gmra.mrb[24].mxu1 %vm1105_vm3, %v4201_v48 }
  0x86   : > { %3805 = vmatprep.mubr.msk.bf16.mxu0 %vm4306_vm2, %v5502_v29  ;;  %3901 = vmatprep.mubr.msk.bf16.mxu1 %vm4306_vm2, %v5502_v29 }
  0x8d   : > { %3806 = vmatmul.mubr.msk.bf16.gmra.mrb[28].mxu0 %vm1105_vm3, %v4202_v49  ;;  %3902 = vmatmul.mubr.msk.bf16.gmra.mrb[28].mxu1 %vm1105_vm3, %v4203_v50 }
  0x8e   : > { %3809 = vmatprep.mubr.msk.bf16.mxu0 %vm4306_vm2, %v5502_v29  ;;  %3905 = vmatprep.mubr.msk.bf16.mxu1 %vm4306_vm2, %v5502_v29 }
  0x95   : > { %3810 = vmatmul.mubr.msk.bf16.gmra.mrb[32].mxu0 %vm1105_vm3, %v4204_v51  ;;  %3906 = vmatmul.mubr.msk.bf16.gmra.mrb[32].mxu1 %vm1105_vm3, %v4205_v52 }
  0x96   : > { %3813 = vmatprep.mubr.msk.bf16.mxu0 %vm4306_vm2, %v5502_v29  ;;  %3909 = vmatprep.mubr.msk.bf16.mxu1 %vm4306_vm2, %v5502_v29 }
  0x9d   : > { %3814 = vmatmul.mubr.msk.bf16.gmra.mrb[36].mxu0 %vm1105_vm3, %v4206_v53  ;;  %3910 = vmatmul.mubr.msk.bf16.gmra.mrb[36].mxu1 %vm1105_vm3, %v4207_v54 }
  0x9e   : > { %3817 = vmatprep.mubr.msk.bf16.mxu0 %vm4306_vm2, %v5502_v29  ;;  %3913 = vmatprep.mubr.msk.bf16.mxu1 %vm4306_vm2, %v5502_v29 }
  0xa5   : > { %3818 = vmatmul.mubr.msk.bf16.gmra.mrb[40].mxu0 %vm1105_vm3, %v4208_v55  ;;  %3914 = vmatmul.mubr.msk.bf16.gmra.mrb[40].mxu1 %vm1105_vm3, %v4209_v56  ;;  %v4246_v55 = vld [vmem:[%s4566_s6 + $0x198] sm:$0xff]   ;;  %v4247_v56 = vld [vmem:[%s4566_s6 + $0x24c] sm:$0xff]  }
  0xa6   : > { %3821 = vmatprep.mubr.msk.bf16.mxu0 %vm4306_vm2, %v5502_v29  ;;  %3917 = vmatprep.mubr.msk.bf16.mxu1 %vm4306_vm2, %v5502_v29 }
  0xad   : > { %3822 = vmatmul.mubr.msk.bf16.gmra.mrb[44].mxu0 %vm1105_vm3, %v4210_v57  ;;  %3918 = vmatmul.mubr.msk.bf16.gmra.mrb[44].mxu1 %vm1105_vm3, %v4211_v58 }
  0xae   : > { %3825 = vmatprep.mubr.msk.bf16.mxu0 %vm4306_vm2, %v5502_v29  ;;  %3921 = vmatprep.mubr.msk.bf16.mxu1 %vm4306_vm2, %v5502_v29 }
  0xb5   : > { %3826 = vmatmul.mubr.msk.bf16.gmra.mrb[48].mxu0 %vm1105_vm3, %v4212_v59  ;;  %3922 = vmatmul.mubr.msk.bf16.gmra.mrb[48].mxu1 %vm1105_vm3, %v4213_v60 }
  0xb6   : > { %3829 = vmatprep.mubr.msk.bf16.mxu0 %vm4306_vm2, %v5502_v29  ;;  %3925 = vmatprep.mubr.msk.bf16.mxu1 %vm4306_vm2, %v5502_v29 }
  0xbd   : > { %3830 = vmatmul.mubr.msk.bf16.gmra.mrb[52].mxu0 %vm1105_vm3, %v4214_v61  ;;  %3926 = vmatmul.mubr.msk.bf16.gmra.mrb[52].mxu1 %vm1105_vm3, %v4215_v62 }
  0xbe   : > { %3833 = vmatprep.mubr.msk.bf16.mxu0 %vm4306_vm2, %v5502_v29  ;;  %3929 = vmatprep.mubr.msk.bf16.mxu1 %vm4306_vm2, %v5502_v29 }
  0xc5   : > { %3834 = vmatmul.mubr.msk.bf16.gmra.mrb[56].mxu0 %vm1105_vm3, %v4216_v63  ;;  %3930 = vmatmul.mubr.msk.bf16.gmra.mrb[56].mxu1 %vm1105_vm3, %v4217_v0 }
  0xc6   : > { %3837 = vmatprep.mubr.msk.bf16.mxu0 %vm4306_vm2, %v5502_v29  ;;  %3933 = vmatprep.mubr.msk.bf16.mxu1 %vm4306_vm2, %v5502_v29 }
  0xcd   : > { %3838 = vmatmul.mubr.msk.bf16.gmra.mrb[60].mxu0 %vm1105_vm3, %v4218_v1  ;;  %3934 = vmatmul.mubr.msk.bf16.gmra.mrb[60].mxu1 %vm1105_vm3, %v4219_v2 }
  0xce   : > { %3841 = vmatprep.mubr.msk.bf16.mxu0 %vm4306_vm2, %v5502_v29  ;;  %3937 = vmatprep.mubr.msk.bf16.mxu1 %vm4306_vm2, %v5502_v29 }
  0xd5   : > { %3842 = vmatmul.mubr.msk.bf16.gmra.mrb[64].mxu0 %vm1105_vm3, %v4220_v3  ;;  %3938 = vmatmul.mubr.msk.bf16.gmra.mrb[64].mxu1 %vm1105_vm3, %v4221_v4  ;;  %v4248_v3 = vld [vmem:[%s4566_s6 + $0x1a0] sm:$0xff]   ;;  %v4249_v4 = vld [vmem:[%s4566_s6 + $0x254] sm:$0xff]  }
  0xd6   : > { %3845 = vmatprep.mubr.msk.bf16.mxu0 %vm4306_vm2, %v5502_v29  ;;  %3941 = vmatprep.mubr.msk.bf16.mxu1 %vm4306_vm2, %v5502_v29 }
  0xdd   : > { %3846 = vmatmul.mubr.msk.bf16.gmra.mrb[68].mxu0 %vm1105_vm3, %v4222_v5  ;;  %3942 = vmatmul.mubr.msk.bf16.gmra.mrb[68].mxu1 %vm1105_vm3, %v4223_v6 }
  0xde   : > { %3849 = vmatprep.mubr.msk.bf16.mxu0 %vm4306_vm2, %v5502_v29  ;;  %3945 = vmatprep.mubr.msk.bf16.mxu1 %vm4306_vm2, %v5502_v29 }
  0xe5   : > { %3850 = vmatmul.mubr.msk.bf16.gmra.mrb[72].mxu0 %vm1105_vm3, %v4224_v7  ;;  %3946 = vmatmul.mubr.msk.bf16.gmra.mrb[72].mxu1 %vm1105_vm3, %v4225_v8 }
  0xe6   : > { %3853 = vmatprep.mubr.msk.bf16.mxu0 %vm4306_vm2, %v5502_v29  ;;  %3949 = vmatprep.mubr.msk.bf16.mxu1 %vm4306_vm2, %v5502_v29 }
  0xed   : > { %3854 = vmatmul.mubr.msk.bf16.gmra.mrb[76].mxu0 %vm1105_vm3, %v4226_v9  ;;  %3950 = vmatmul.mubr.msk.bf16.gmra.mrb[76].mxu1 %vm1105_vm3, %v4227_v10 }
  0xee   : > { %3857 = vmatprep.mubr.msk.bf16.mxu0 %vm4306_vm2, %v5502_v29  ;;  %3953 = vmatprep.mubr.msk.bf16.mxu1 %vm4306_vm2, %v5502_v29 }
  0xf5   : > { %3858 = vmatmul.mubr.msk.bf16.gmra.mrb[80].mxu0 %vm1105_vm3, %v4228_v11  ;;  %3954 = vmatmul.mubr.msk.bf16.gmra.mrb[80].mxu1 %vm1105_vm3, %v4229_v12 }
  0xf6   : > { %3861 = vmatprep.mubr.msk.bf16.mxu0 %vm4306_vm2, %v5502_v29  ;;  %3957 = vmatprep.mubr.msk.bf16.mxu1 %vm4306_vm2, %v5502_v29 }
  0xfd   : > { %3862 = vmatmul.mubr.msk.bf16.gmra.mrb[84].mxu0 %vm1105_vm3, %v4230_v13  ;;  %3958 = vmatmul.mubr.msk.bf16.gmra.mrb[84].mxu1 %vm1105_vm3, %v4231_v14 }
  0xfe   : > { %3865 = vmatprep.mubr.msk.bf16.mxu0 %vm4306_vm2, %v5502_v29  ;;  %3961 = vmatprep.mubr.msk.bf16.mxu1 %vm4306_vm2, %v5502_v29 }
 0x105   : > { %3866 = vmatmul.mubr.msk.bf16.gmra.mrb[88].mxu0 %vm1105_vm3, %v4232_v15  ;;  %3962 = vmatmul.mubr.msk.bf16.gmra.mrb[88].mxu1 %vm1105_vm3, %v4233_v16  ;;  %v4250_v15 = vld [vmem:[%s4566_s6 + $0x1a8] sm:$0xff]   ;;  %v4251_v16 = vld [vmem:[%s4566_s6 + $0x25c] sm:$0xff]  }
 0x106   : > { %3969 = vmatprep.mubr.msk.bf16.mxu0 %vm4306_vm2, %v5502_v29  ;;  %4065 = vmatprep.mubr.msk.bf16.mxu1 %vm4306_vm2, %v5502_v29 }
 0x10d   : > { %3970 = vmatmul.mubr.msk.bf16.vlgmr.msra.gmra.mrb[92].mxu0 %vm1105_vm3, %v4234_v17  ;;  %4066 = vmatmul.mubr.msk.bf16.vlgmr.msra.gmra.mrb[92].mxu1 %vm1105_vm3, %v4235_v18 }
 0x10e   : > { %3973 = vmatprep.mubr.msk.bf16.mxu0 %vm4306_vm2, %v5502_v29  ;;  %4069 = vmatprep.mubr.msk.bf16.mxu1 %vm4306_vm2, %v5502_v29 }
 0x115   : > { %3974 = vmatmul.mubr.msk.bf16.gmra.mrb[96].mxu0 %vm1105_vm3, %v4236_v19  ;;  %4070 = vmatmul.mubr.msk.bf16.gmra.mrb[96].mxu1 %vm1105_vm3, %v4237_v20 }
 0x116   : > { %3977 = vmatprep.mubr.msk.bf16.mxu0 %vm4306_vm2, %v5502_v29  ;;  %4073 = vmatprep.mubr.msk.bf16.mxu1 %vm4306_vm2, %v5502_v29 }
 0x11d   : > { %3978 = vmatmul.mubr.msk.bf16.gmra.mrb[100].mxu0 %vm1105_vm3, %v4238_v21  ;;  %4074 = vmatmul.mubr.msk.bf16.gmra.mrb[100].mxu1 %vm1105_vm3, %v4239_v22 }
 0x11e   : > { %3981 = vmatprep.mubr.msk.bf16.mxu0 %vm4306_vm2, %v5502_v29  ;;  %4077 = vmatprep.mubr.msk.bf16.mxu1 %vm4306_vm2, %v5502_v29 }
 0x125   : > { %3982 = vmatmul.mubr.msk.bf16.gmra.mrb[104].mxu0 %vm1105_vm3, %v4240_v23  ;;  %4078 = vmatmul.mubr.msk.bf16.gmra.mrb[104].mxu1 %vm1105_vm3, %v4241_v24 }
 0x126   : > { %3985 = vmatprep.mubr.msk.bf16.mxu0 %vm4306_vm2, %v5502_v29  ;;  %4081 = vmatprep.mubr.msk.bf16.mxu1 %vm4306_vm2, %v5502_v29 }
 0x128   : > { %v4788_v25 = vpop.f32.mrb[0].mxu0  ;;  %v4790_v26 = vpop.f32.mrb[0].mxu1 }
 0x129   : > { %v3779_v28 = vpop.f32.mrb[1].mxu0  ;;  %v3875_v30 = vpop.f32.mrb[1].mxu1 }
 0x12a   : > { %v4796_v33 = vpop.f32.mrb[2].mxu0  ;;  %v4798_v34 = vpop.f32.mrb[2].mxu1 }
 0x12b   : > { %v3780_v36 = vpop.f32.mrb[3].mxu0  ;;  %v3876_v37 = vpop.f32.mrb[3].mxu1 }
 0x12d   : > { %3986 = vmatmul.mubr.msk.bf16.gmra.mrb[108].mxu0 %vm1105_vm3, %v4242_v31  ;;  %4082 = vmatmul.mubr.msk.bf16.gmra.mrb[108].mxu1 %vm1105_vm3, %v4243_v32  ;;  %v4252_v31 = vld [vmem:[%s4566_s6 + $0x1b0] sm:$0xff]   ;;  %v4253_v32 = vld [vmem:[%s4566_s6 + $0x264] sm:$0xff]  }
 0x12e   : > { %3989 = vmatprep.mubr.msk.bf16.mxu0 %vm4306_vm2, %v5502_v29  ;;  %4085 = vmatprep.mubr.msk.bf16.mxu1 %vm4306_vm2, %v5502_v29 }
 0x130   : > { %v4808_v38 = vpop.f32.mrb[4].mxu0  ;;  %v4810_v39 = vpop.f32.mrb[4].mxu1 }
 0x131   : > { %v3783_v41 = vpop.f32.mrb[5].mxu0  ;;  %v3879_v42 = vpop.f32.mrb[5].mxu1 }
 0x132   : > { %v4816_v45 = vpop.f32.mrb[6].mxu0  ;;  %v4818_v46 = vpop.f32.mrb[6].mxu1 }
 0x133   : > { %v3784_v48 = vpop.f32.mrb[7].mxu0  ;;  %v3880_v49 = vpop.f32.mrb[7].mxu1 }
 0x135   : > { %3990 = vmatmul.mubr.msk.bf16.gmra.mrb[112].mxu0 %vm1105_vm3, %v4244_v43  ;;  %4086 = vmatmul.mubr.msk.bf16.gmra.mrb[112].mxu1 %vm1105_vm3, %v4245_v44 }
 0x136   : > { %3993 = vmatprep.mubr.msk.bf16.mxu0 %vm4306_vm2, %v5502_v29  ;;  %4089 = vmatprep.mubr.msk.bf16.mxu1 %vm4306_vm2, %v5502_v29 }
 0x138   : > { %v4828_v50 = vpop.f32.mrb[8].mxu0  ;;  %v4830_v51 = vpop.f32.mrb[8].mxu1 }
 0x139   : > { %v3787_v53 = vpop.f32.mrb[9].mxu0  ;;  %v3883_v54 = vpop.f32.mrb[9].mxu1 }
 0x13a   : > { %v4836_v57 = vpop.f32.mrb[10].mxu0  ;;  %v4838_v58 = vpop.f32.mrb[10].mxu1 }
 0x13b   : > { %v3788_v60 = vpop.f32.mrb[11].mxu0  ;;  %v3884_v61 = vpop.f32.mrb[11].mxu1 }
 0x13d   : > { %3994 = vmatmul.mubr.msk.bf16.gmra.mrb[116].mxu0 %vm1105_vm3, %v4246_v55  ;;  %4090 = vmatmul.mubr.msk.bf16.gmra.mrb[116].mxu1 %vm1105_vm3, %v4247_v56  ;;  %v4254_v55 = vld [vmem:[%s4566_s6 + $0x1b8] sm:$0xff]   ;;  %v4255_v56 = vld [vmem:[%s4566_s6 + $0x26c] sm:$0xff]  }
 0x13e   : > { %3997 = vmatprep.mubr.msk.bf16.mxu0 %vm4306_vm2, %v5502_v29  ;;  %4093 = vmatprep.mubr.msk.bf16.mxu1 %vm4306_vm2, %v5502_v29 }
 0x140   : > { %v4848_v62 = vpop.f32.mrb[12].mxu0  ;;  %v4850_v63 = vpop.f32.mrb[12].mxu1 }
 0x141   : > { %v3791_v1 = vpop.f32.mrb[13].mxu0  ;;  %v3887_v2 = vpop.f32.mrb[13].mxu1 }
 0x142   : > { %v4856_v5 = vpop.f32.mrb[14].mxu0  ;;  %v4858_v6 = vpop.f32.mrb[14].mxu1 }
 0x143   : > { %v3792_v8 = vpop.f32.mrb[15].mxu0  ;;  %v3888_v9 = vpop.f32.mrb[15].mxu1 }
 0x145   : > { %3998 = vmatmul.mubr.msk.bf16.gmra.mrb[120].mxu0 %vm1105_vm3, %v4248_v3  ;;  %4094 = vmatmul.mubr.msk.bf16.gmra.mrb[120].mxu1 %vm1105_vm3, %v4249_v4 }
 0x146   : > { %4001 = vmatprep.mubr.msk.bf16.mxu0 %vm4306_vm2, %v5502_v29  ;;  %4097 = vmatprep.mubr.msk.bf16.mxu1 %vm4306_vm2, %v5502_v29 }
 0x148   : > { %v4868_v10 = vpop.f32.mrb[16].mxu0  ;;  %v4870_v11 = vpop.f32.mrb[16].mxu1 }
 0x149   : > { %v3795_v13 = vpop.f32.mrb[17].mxu0  ;;  %v3891_v14 = vpop.f32.mrb[17].mxu1 }
 0x14a   : > { %v4876_v17 = vpop.f32.mrb[18].mxu0  ;;  %v4878_v18 = vpop.f32.mrb[18].mxu1 }
 0x14b   : > { %v3796_v20 = vpop.f32.mrb[19].mxu0  ;;  %v3892_v21 = vpop.f32.mrb[19].mxu1 }
 0x14d   : > { %4002 = vmatmul.mubr.msk.bf16.gmra.mrb[124].mxu0 %vm1105_vm3, %v4250_v15  ;;  %4098 = vmatmul.mubr.msk.bf16.gmra.mrb[124].mxu1 %vm1105_vm3, %v4251_v16  ;;  %v4256_v15 = vld [vmem:[%s4566_s6 + $0x1c0] sm:$0xff]   ;;  %v4257_v16 = vld [vmem:[%s4566_s6 + $0x274] sm:$0xff]  }
 0x14e   : > { %4005 = vmatprep.mubr.msk.bf16.mxu0 %vm4306_vm2, %v5502_v29  ;;  %4101 = vmatprep.mubr.msk.bf16.mxu1 %vm4306_vm2, %v5502_v29 }
 0x150   : > { %v4888_v22 = vpop.f32.mrb[20].mxu0  ;;  %v4890_v23 = vpop.f32.mrb[20].mxu1 }
 0x151   : > { %v3799_v28 = vpop.f32.mrb[21].mxu0  ;;  %v3895_v30 = vpop.f32.mrb[21].mxu1 }
 0x152   : > { %v4896_v36 = vpop.f32.mrb[22].mxu0  ;;  %v4898_v37 = vpop.f32.mrb[22].mxu1 }
 0x153   : > { %v3800_v42 = vpop.f32.mrb[23].mxu0  ;;  %v3896_v43 = vpop.f32.mrb[23].mxu1 }
 0x155   : > { %4006 = vmatmul.mubr.msk.bf16.gmra.mrb[128].mxu0 %vm1105_vm3, %v4252_v31  ;;  %4102 = vmatmul.mubr.msk.bf16.gmra.mrb[128].mxu1 %vm1105_vm3, %v4253_v32 }
 0x156   : > { %4009 = vmatprep.mubr.msk.bf16.mxu0 %vm4306_vm2, %v5502_v29  ;;  %4105 = vmatprep.mubr.msk.bf16.mxu1 %vm4306_vm2, %v5502_v29 }
 0x158   : > { %v4908_v44 = vpop.f32.mrb[24].mxu0  ;;  %v4910_v48 = vpop.f32.mrb[24].mxu1 }
 0x159   : > { %v3803_v53 = vpop.f32.mrb[25].mxu0  ;;  %v3899_v54 = vpop.f32.mrb[25].mxu1 }
 0x15a   : > { %v4916_v60 = vpop.f32.mrb[26].mxu0  ;;  %v4918_v61 = vpop.f32.mrb[26].mxu1 }
 0x15b   : > { %v3804_v2 = vpop.f32.mrb[27].mxu0  ;;  %v3900_v3 = vpop.f32.mrb[27].mxu1 }
 0x15d   : > { %4010 = vmatmul.mubr.msk.bf16.gmra.mrb[132].mxu0 %vm1105_vm3, %v4254_v55  ;;  %4106 = vmatmul.mubr.msk.bf16.gmra.mrb[132].mxu1 %vm1105_vm3, %v4255_v56  ;;  %v4258_v55 = vld [vmem:[%s4566_s6 + $0x1c8] sm:$0xff]   ;;  %v4259_v56 = vld [vmem:[%s4566_s6 + $0x27c] sm:$0xff]  }
 0x15e   : > { %4013 = vmatprep.mubr.msk.bf16.mxu0 %vm4306_vm2, %v5502_v29  ;;  %4109 = vmatprep.mubr.msk.bf16.mxu1 %vm4306_vm2, %v5502_v29 }
 0x160   : > { %v4928_v4 = vpop.f32.mrb[28].mxu0  ;;  %v4930_v8 = vpop.f32.mrb[28].mxu1 }
 0x161   : > { %v3807_v13 = vpop.f32.mrb[29].mxu0  ;;  %v3903_v14 = vpop.f32.mrb[29].mxu1 }
 0x162   : > { %v4936_v20 = vpop.f32.mrb[30].mxu0  ;;  %v4938_v21 = vpop.f32.mrb[30].mxu1 }
 0x163   : > { %v3808_v30 = vpop.f32.mrb[31].mxu0  ;;  %v3904_v31 = vpop.f32.mrb[31].mxu1 }
 0x164   : > { %v5551_v31 = vmov 0.0  }
 0x165   : > { %4014 = vmatmul.mubr.msk.bf16.gmra.mrb[136].mxu0 %vm1105_vm3, %v4256_v15  ;;  %4110 = vmatmul.mubr.msk.bf16.gmra.mrb[136].mxu1 %vm1105_vm3, %v4257_v16 }
 0x166   : > { %4017 = vmatprep.mubr.msk.bf16.mxu0 %vm4306_vm2, %v5502_v29  ;;  %4113 = vmatprep.mubr.msk.bf16.mxu1 %vm4306_vm2, %v5502_v29 }
 0x168   : > { %v4948_v32 = vpop.f32.mrb[32].mxu0  ;;  %v4950_v42 = vpop.f32.mrb[32].mxu1 }
 0x169   : > { %v3811_v53 = vpop.f32.mrb[33].mxu0  ;;  %v3907_v54 = vpop.f32.mrb[33].mxu1 }
 0x16a   : > { %v4956_v2 = vpop.f32.mrb[34].mxu0  ;;  %v4958_v3 = vpop.f32.mrb[34].mxu1 }
 0x16b   : > { %v3812_v14 = vpop.f32.mrb[35].mxu0  ;;  %v3908_v15 = vpop.f32.mrb[35].mxu1 }
 0x16c   : > { %v4260_v14 = vld [vmem:[%s4566_s6 + $0x1d0] sm:$0xff]  }
 0x16d   : > { %4018 = vmatmul.mubr.msk.bf16.gmra.mrb[140].mxu0 %vm1105_vm3, %v4258_v55  ;;  %4114 = vmatmul.mubr.msk.bf16.gmra.mrb[140].mxu1 %vm1105_vm3, %v4259_v56  ;;  %v4261_v55 = vld [vmem:[%s4566_s6 + $0x284] sm:$0xff]  }
 0x16e   : > { %4021 = vmatprep.mubr.msk.bf16.mxu0 %vm4306_vm2, %v5502_v29  ;;  %4117 = vmatprep.mubr.msk.bf16.mxu1 %vm4306_vm2, %v5502_v29 }
 0x170   : > { %v4968_v16 = vpop.f32.mrb[36].mxu0  ;;  %v4970_v30 = vpop.f32.mrb[36].mxu1 }
 0x171   : > { %v3815_v53 = vpop.f32.mrb[37].mxu0  ;;  %v3911_v54 = vpop.f32.mrb[37].mxu1 }
 0x172   : > { %v4976_v56 = vpop.f32.mrb[38].mxu0  ;;  %v4978_v15 = vpop.f32.mrb[38].mxu1 }
 0x173   : > { %v3816_v43 = vpop.f32.mrb[39].mxu0  ;;  %v3912_v28 = vpop.f32.mrb[39].mxu1 }
 0x174   : > { %v4262_v28 = vld [vmem:[%s4566_s6 + $0x1d8] sm:$0xff]  }
 0x175   : > { %4022 = vmatmul.mubr.msk.bf16.gmra.mrb[144].mxu0 %vm1105_vm3, %v4260_v14  ;;  %4118 = vmatmul.mubr.msk.bf16.gmra.mrb[144].mxu1 %vm1105_vm3, %v4261_v55  ;;  %v4263_v14 = vld [vmem:[%s4566_s6 + $0x28c] sm:$0xff]  }
 0x176   : > { %4025 = vmatprep.mubr.msk.bf16.mxu0 %vm4306_vm2, %v5502_v29  ;;  %4121 = vmatprep.mubr.msk.bf16.mxu1 %vm4306_vm2, %v5502_v29 }
 0x178   : > { %v4988_v53 = vpop.f32.mrb[40].mxu0  ;;  %v4990_v54 = vpop.f32.mrb[40].mxu1 }
 0x179   : > { %v3819_v13 = vpop.f32.mrb[41].mxu0  ;;  %v3915_v43 = vpop.f32.mrb[41].mxu1 }
 0x17a   : > { %v4996_v55 = vpop.f32.mrb[42].mxu0  ;;  %v4998_v9 = vpop.f32.mrb[42].mxu1 }
 0x17b   : > { %v3820_v49 = vpop.f32.mrb[43].mxu0  ;;  %v3916_v41 = vpop.f32.mrb[43].mxu1 }
 0x17c   : > { %v4264_v41 = vld [vmem:[%s4566_s6 + $0x1e0] sm:$0xff]  }
 0x17d   : > { %4026 = vmatmul.mubr.msk.bf16.gmra.mrb[148].mxu0 %vm1105_vm3, %v4262_v28  ;;  %4122 = vmatmul.mubr.msk.bf16.gmra.mrb[148].mxu1 %vm1105_vm3, %v4263_v14  ;;  %v4265_v28 = vld [vmem:[%s4566_s6 + $0x294] sm:$0xff]  }
 0x17e   : > { %4029 = vmatprep.mubr.msk.bf16.mxu0 %vm4306_vm2, %v5502_v29  ;;  %4125 = vmatprep.mubr.msk.bf16.mxu1 %vm4306_vm2, %v5502_v29 }
 0x180   : > { %v5008_v13 = vpop.f32.mrb[44].mxu0  ;;  %v5010_v43 = vpop.f32.mrb[44].mxu1 }
 0x181   : > { %v3823_v1 = vpop.f32.mrb[45].mxu0  ;;  %v3919_v49 = vpop.f32.mrb[45].mxu1 }
 0x182   : > { %v5016_v14 = vpop.f32.mrb[46].mxu0  ;;  %v5018_v24 = vpop.f32.mrb[46].mxu1 }
 0x183   : > { %v3824_v12 = vpop.f32.mrb[47].mxu0  ;;  %v3920_v7 = vpop.f32.mrb[47].mxu1 }
 0x184   : > { %v4266_v7 = vld [vmem:[%s4566_s6 + $0x1e8] sm:$0xff]  }
 0x185   : > { %4030 = vmatmul.mubr.msk.bf16.gmra.mrb[152].mxu0 %vm1105_vm3, %v4264_v41  ;;  %4126 = vmatmul.mubr.msk.bf16.gmra.mrb[152].mxu1 %vm1105_vm3, %v4265_v28  ;;  %v4267_v41 = vld [vmem:[%s4566_s6 + $0x29c] sm:$0xff]  }
 0x186   : > { %4033 = vmatprep.mubr.msk.bf16.mxu0 %vm4306_vm2, %v5502_v29  ;;  %4129 = vmatprep.mubr.msk.bf16.mxu1 %vm4306_vm2, %v5502_v29 }
 0x188   : > { %v5028_v1 = vpop.f32.mrb[48].mxu0  ;;  %v5030_v49 = vpop.f32.mrb[48].mxu1 }
 0x189   : > { %5544 = vst [vmem:[#allocation3_spill] sm:$0xff] %v5030_v49  ;;  %v3827_v19 = vpop.f32.mrb[49].mxu0  ;;  %v3923_v12 = vpop.f32.mrb[49].mxu1 }
 0x18a   : > { %v5036_v28 = vpop.f32.mrb[50].mxu0  ;;  %v5038_v0 = vpop.f32.mrb[50].mxu1 }
 0x18b   : > { %5545 = vst [vmem:[#allocation4_spill] sm:$0xff] %v5036_v28  ;;  %5546 = vst [vmem:[#allocation5_spill] sm:$0xff] %v5038_v0  ;;  %v3828_v52 = vpop.f32.mrb[51].mxu0  ;;  %v3924_v47 = vpop.f32.mrb[51].mxu1 }
 0x18c   : > { %v4268_v47 = vld [vmem:[%s4566_s6 + $0x1f0] sm:$0xff]  }
 0x18d   : > { %4034 = vmatmul.mubr.msk.bf16.gmra.mrb[156].mxu0 %vm1105_vm3, %v4266_v7  ;;  %4130 = vmatmul.mubr.msk.bf16.gmra.mrb[156].mxu1 %vm1105_vm3, %v4267_v41  ;;  %v4269_v7 = vld [vmem:[%s4566_s6 + $0x2a4] sm:$0xff]  }
 0x18e   : > { %4037 = vmatprep.mubr.msk.bf16.mxu0 %vm4306_vm2, %v5502_v29  ;;  %4133 = vmatprep.mubr.msk.bf16.mxu1 %vm4306_vm2, %v5502_v29 }
 0x190   : > { %v5048_v19 = vpop.f32.mrb[52].mxu0  ;;  %v5050_v12 = vpop.f32.mrb[52].mxu1 }
 0x191   : > { %5547 = vst [vmem:[#allocation6_spill] sm:$0xff] %v5048_v19  ;;  %5548 = vst [vmem:[#allocation7_spill] sm:$0xff] %v5050_v12  ;;  %v3831_v59 = vpop.f32.mrb[53].mxu0  ;;  %v3927_v52 = vpop.f32.mrb[53].mxu1 }
 0x192   : > { %v5056_v41 = vpop.f32.mrb[54].mxu0  ;;  %v5058_v40 = vpop.f32.mrb[54].mxu1 }
 0x193   : > { %5549 = vst [vmem:[#allocation8_spill] sm:$0xff] %v5056_v41  ;;  %5550 = vst [vmem:[#allocation9_spill] sm:$0xff] %v5058_v40  ;;  %v3832_v27 = vpop.f32.mrb[55].mxu0  ;;  %v3928_v29 = vpop.f32.mrb[55].mxu1 }
 0x194   : > { %v4270_v29 = vld [vmem:[%s4566_s6 + $0x1f8] sm:$0xff]  }
 0x195   : > { %4038 = vmatmul.mubr.msk.bf16.gmra.mrb[160].mxu0 %vm1105_vm3, %v4268_v47  ;;  %4134 = vmatmul.mubr.msk.bf16.gmra.mrb[160].mxu1 %vm1105_vm3, %v4269_v7  ;;  %v4271_v47 = vld [vmem:[%s4566_s6 + $0x2ac] sm:$0xff]  }
 0x196   : > { %4041 = vmatprep.mubr.msk.bf16.mxu0 %vm4306_vm2, %v5551_v31  ;;  %4137 = vmatprep.mubr.msk.bf16.mxu1 %vm4306_vm2, %v5551_v31 }
 0x198   : > { %v5068_v59 = vpop.f32.mrb[56].mxu0  ;;  %v5070_v52 = vpop.f32.mrb[56].mxu1 }
 0x199   : > { %5552 = vst [vmem:[#allocation10_spill] sm:$0xff] %v5068_v59  ;;  %5553 = vst [vmem:[#allocation11_spill] sm:$0xff] %v5070_v52  ;;  %v3835_v35 = vpop.f32.mrb[57].mxu0  ;;  %v3931_v27 = vpop.f32.mrb[57].mxu1 }
 0x19a   : > { %v5076_v7 = vpop.f32.mrb[58].mxu0  ;;  %v5078_v40 = vpop.f32.mrb[58].mxu1 }
 0x19b   : > { %5554 = vst [vmem:[#allocation12_spill] sm:$0xff] %v5076_v7  ;;  %5555 = vst [vmem:[#allocation13_spill] sm:$0xff] %v5078_v40  ;;  %v3836_v19 = vpop.f32.mrb[59].mxu0  ;;  %v3932_v0 = vpop.f32.mrb[59].mxu1 }
 0x19c   : > { %v4272_v0 = vld [vmem:[%s4566_s6 + $0x200] sm:$0xff]  }
 0x19d   : > { %4042 = vmatmul.mubr.msk.bf16.gmra.mrb[164].mxu0 %vm1105_vm3, %v4270_v29  ;;  %4138 = vmatmul.mubr.msk.bf16.gmra.mrb[164].mxu1 %vm1105_vm3, %v4271_v47  ;;  %v4273_v29 = vld [vmem:[%s4566_s6 + $0x2b4] sm:$0xff]  }
 0x19e   : > { %4045 = vmatprep.mubr.msk.bf16.mxu0 %vm4306_vm2, %v5551_v31  ;;  %4141 = vmatprep.mubr.msk.bf16.mxu1 %vm4306_vm2, %v5551_v31 }
 0x1a0   : > { %v5088_v35 = vpop.f32.mrb[60].mxu0  ;;  %v5090_v27 = vpop.f32.mrb[60].mxu1 }
 0x1a1   : > { %5556 = vst [vmem:[#allocation14_spill] sm:$0xff] %v5088_v35  ;;  %5557 = vst [vmem:[#allocation15_spill] sm:$0xff] %v5090_v27  ;;  %v3839_v41 = vpop.f32.mrb[61].mxu0  ;;  %v3935_v19 = vpop.f32.mrb[61].mxu1 }
 0x1a2   : > { %v5096_v47 = vpop.f32.mrb[62].mxu0  ;;  %v5098_v40 = vpop.f32.mrb[62].mxu1 }
 0x1a3   : > { %5558 = vst [vmem:[#allocation16_spill] sm:$0xff] %v5096_v47  ;;  %5559 = vst [vmem:[#allocation17_spill] sm:$0xff] %v5098_v40  ;;  %v3840_v52 = vpop.f32.mrb[63].mxu0  ;;  %v3936_v59 = vpop.f32.mrb[63].mxu1 }
 0x1a4   : > { %v4274_v59 = vld [vmem:[%s4566_s6 + $0x208] sm:$0xff]  }
 0x1a5   : > { %4046 = vmatmul.mubr.msk.bf16.gmra.mrb[168].mxu0 %vm1105_vm3, %v4272_v0  ;;  %4142 = vmatmul.mubr.msk.bf16.gmra.mrb[168].mxu1 %vm1105_vm3, %v4273_v29  ;;  %v4275_v0 = vld [vmem:[%s4566_s6 + $0x2bc] sm:$0xff]  }
 0x1a6   : > { %4049 = vmatprep.mubr.msk.bf16.mxu0 %vm4306_vm2, %v5551_v31  ;;  %4145 = vmatprep.mubr.msk.bf16.mxu1 %vm4306_vm2, %v5551_v31 }
 0x1a8   : > { %v5108_v41 = vpop.f32.mrb[64].mxu0  ;;  %v5110_v19 = vpop.f32.mrb[64].mxu1 }
 0x1a9   : > { %5560 = vst [vmem:[#allocation18_spill] sm:$0xff] %v5108_v41  ;;  %5561 = vst [vmem:[#allocation19_spill] sm:$0xff] %v5110_v19  ;;  %v3843_v7 = vpop.f32.mrb[65].mxu0  ;;  %v3939_v52 = vpop.f32.mrb[65].mxu1 }
 0x1aa   : > { %v5116_v29 = vpop.f32.mrb[66].mxu0  ;;  %v5118_v40 = vpop.f32.mrb[66].mxu1 }
 0x1ab   : > { %5562 = vst [vmem:[#allocation20_spill] sm:$0xff] %v5116_v29  ;;  %5563 = vst [vmem:[#allocation21_spill] sm:$0xff] %v5118_v40  ;;  %v3844_v27 = vpop.f32.mrb[67].mxu0  ;;  %v3940_v35 = vpop.f32.mrb[67].mxu1 }
 0x1ac   : > { %v4276_v35 = vld [vmem:[%s4566_s6 + $0x210] sm:$0xff]  }
 0x1ad   : > { %4050 = vmatmul.mubr.msk.bf16.gmra.mrb[172].mxu0 %vm1105_vm3, %v4274_v59  ;;  %4146 = vmatmul.mubr.msk.bf16.gmra.mrb[172].mxu1 %vm1105_vm3, %v4275_v0  ;;  %v4277_v59 = vld [vmem:[%s4566_s6 + $0x2c4] sm:$0xff]  }
 0x1ae   : > { %4053 = vmatprep.mubr.msk.bf16.mxu0 %vm4306_vm2, %v5551_v31  ;;  %4149 = vmatprep.mubr.msk.bf16.mxu1 %vm4306_vm2, %v5551_v31 }
 0x1b0   : > { %v5128_v7 = vpop.f32.mrb[68].mxu0  ;;  %v5130_v52 = vpop.f32.mrb[68].mxu1 }
 0x1b1   : > { %5564 = vst [vmem:[#allocation22_spill] sm:$0xff] %v5128_v7  ;;  %5565 = vst [vmem:[#allocation23_spill] sm:$0xff] %v5130_v52  ;;  %v3847_v47 = vpop.f32.mrb[69].mxu0  ;;  %v3943_v27 = vpop.f32.mrb[69].mxu1 }
 0x1b2   : > { %v5136_v0 = vpop.f32.mrb[70].mxu0  ;;  %v5138_v40 = vpop.f32.mrb[70].mxu1 }
 0x1b3   : > { %5566 = vst [vmem:[#allocation24_spill] sm:$0xff] %v5136_v0  ;;  %5567 = vst [vmem:[#allocation25_spill] sm:$0xff] %v5138_v40  ;;  %v3848_v19 = vpop.f32.mrb[71].mxu0  ;;  %v3944_v41 = vpop.f32.mrb[71].mxu1  ;;  %v4279_v40 = vld [vmem:[%s4566_s6 + $0x2cc] ss:$0 sps:$4 sm:$0xff]  }
 0x1b4   : > { %v4278_v41 = vld [vmem:[%s4566_s6 + $0x218] ss:$0 sps:$4 sm:$0xff]  }
 0x1b5   : > { %4054 = vmatmul.mubr.msk.bf16.gmra.mrb[176].mxu0 %vm1105_vm3, %v4276_v35  ;;  %4150 = vmatmul.mubr.msk.bf16.gmra.mrb[176].mxu1 %vm1105_vm3, %v4277_v59 }
 0x1b6   : > { %4057 = vmatprep.mubr.msk.bf16.mxu0 %vm4306_vm2, %v5551_v31  ;;  %4153 = vmatprep.mubr.msk.bf16.mxu1 %vm4306_vm2, %v5551_v31 }
 0x1b8   : > { %v5148_v47 = vpop.f32.mrb[72].mxu0  ;;  %v5150_v27 = vpop.f32.mrb[72].mxu1 }
 0x1b9   : > { %5568 = vst [vmem:[#allocation26_spill] sm:$0xff] %v5148_v47  ;;  %5569 = vst [vmem:[#allocation27_spill] sm:$0xff] %v5150_v27  ;;  %v3851_v29 = vpop.f32.mrb[73].mxu0  ;;  %v3947_v19 = vpop.f32.mrb[73].mxu1 }
 0x1ba   : > { %v5156_v35 = vpop.f32.mrb[74].mxu0  ;;  %v5158_v59 = vpop.f32.mrb[74].mxu1 }
 0x1bb   : > { %5570 = vst [vmem:[#allocation28_spill] sm:$0xff] %v5156_v35  ;;  %5571 = vst [vmem:[#allocation29_spill] sm:$0xff] %v5158_v59  ;;  %v3852_v52 = vpop.f32.mrb[75].mxu0  ;;  %v3948_v31 = vpop.f32.mrb[75].mxu1 }
 0x1bd   : > { %4058 = vmatmul.mubr.msk.bf16.gmra.mrb[180].mxu0 %vm1105_vm3, %v4278_v41  ;;  %4154 = vmatmul.mubr.msk.bf16.gmra.mrb[180].mxu1 %vm1105_vm3, %v4279_v40 }
 0x1c0   : > { %v5164_v7 = vpop.f32.mrb[76].mxu0  ;;  %v5166_v12 = vpop.f32.mrb[76].mxu1 }
 0x1c1   : > { %5572 = vst [vmem:[#allocation30_spill] sm:$0xff] %v5164_v7  ;;  %5573 = vst [vmem:[#allocation31_spill] sm:$0xff] %v5166_v12  ;;  %v3855_v19 = vpop.f32.mrb[77].mxu0  ;;  %v3951_v27 = vpop.f32.mrb[77].mxu1 }
 0x1c2   : > { %v5170_v47 = vpop.f32.mrb[78].mxu0  ;;  %v5172_v28 = vpop.f32.mrb[78].mxu1 }
 0x1c3   : > { %5574 = vst [vmem:[#allocation32_spill] sm:$0xff] %v5170_v47  ;;  %5575 = vst [vmem:[#allocation33_spill] sm:$0xff] %v5172_v28  ;;  %v3856_v31 = vpop.f32.mrb[79].mxu0  ;;  %v3952_v41 = vpop.f32.mrb[79].mxu1 }
 0x1c8   : > { %v5176_v0 = vpop.f32.mrb[80].mxu0  ;;  %v5178_v40 = vpop.f32.mrb[80].mxu1 }
 0x1c9   : > { %5576 = vst [vmem:[#allocation34_spill] sm:$0xff] %v5176_v0  ;;  %5577 = vst [vmem:[#allocation35_spill] sm:$0xff] %v5178_v40  ;;  %v3859_v35 = vpop.f32.mrb[81].mxu0  ;;  %v3955_v29 = vpop.f32.mrb[81].mxu1 }
 0x1ca   : > { %v5182_v19 = vpop.f32.mrb[82].mxu0  ;;  %v5184_v27 = vpop.f32.mrb[82].mxu1 }
 0x1cb   : > { %5578 = vst [vmem:[#allocation36_spill] sm:$0xff] %v5182_v19  ;;  %5579 = vst [vmem:[#allocation37_spill] sm:$0xff] %v5184_v27  ;;  %v3860_v7 = vpop.f32.mrb[83].mxu0  ;;  %v3956_v52 = vpop.f32.mrb[83].mxu1 }
 0x1d0   : > { %v5188_v31 = vpop.f32.mrb[84].mxu0  ;;  %v5190_v41 = vpop.f32.mrb[84].mxu1 }
 0x1d1   : > { %5580 = vst [vmem:[#allocation38_spill] sm:$0xff] %v5188_v31  ;;  %5581 = vst [vmem:[#allocation39_spill] sm:$0xff] %v5190_v41  ;;  %v3863_v59 = vpop.f32.mrb[85].mxu0  ;;  %v3959_v35 = vpop.f32.mrb[85].mxu1 }
 0x1d2   : > { %v5194_v29 = vpop.f32.mrb[86].mxu0  ;;  %v5196_v40 = vpop.f32.mrb[86].mxu1 }
 0x1d3   : > { %5582 = vst [vmem:[#allocation40_spill] sm:$0xff] %v5194_v29  ;;  %5583 = vst [vmem:[#allocation41_spill] sm:$0xff] %v5196_v40  ;;  %v3864_v12 = vpop.f32.mrb[87].mxu0  ;;  %v3960_v7 = vpop.f32.mrb[87].mxu1 }
 0x1d4   : > { %v5585_v12 = vmax.f32 %v4788_v25, %v4790_v26 }
 0x1d8   : > { %v5200_v52 = vpop.f32.mrb[88].mxu0  ;;  %v5202_v27 = vpop.f32.mrb[88].mxu1 }
 0x1d9   : > { %5584 = vst [vmem:[#allocation42_spill] sm:$0xff] %v5202_v27  ;;  %v3867_v47 = vpop.f32.mrb[89].mxu0  ;;  %v3963_v28 = vpop.f32.mrb[89].mxu1 }
 0x1da   : > { %v1395_v59 = vpop.f32.mrb[90].mxu0  ;;  %v1839_v35 = vpop.f32.mrb[90].mxu1  ;;  %v5214_v28 = vld [vmem:[%s5500_s2] ss:$0 sm:$0xff] }
 0x1db   : > { %v3868_v41 = vpop.f32.mrb[91].mxu0  ;;  %v3964_v31 = vpop.f32.mrb[91].mxu1 }
 0x1dc   : > { %v5586_v31 = vmax.f32 %v4796_v33, %v4798_v34 }
 0x1e0   : > { %v2149_v49 = vpop.f32.mrb[92].mxu0  ;;  %v2638_v0 = vpop.f32.mrb[92].mxu1 }
 0x1e1   : > { %v2331_v7 = vmax.f32 %v5585_v12, %v2149_v49  ;;  %v3971_v40 = vpop.f32.mrb[93].mxu0  ;;  %v4067_v29 = vpop.f32.mrb[93].mxu1 }
 0x1e2   : > { %v2152_v47 = vpop.f32.mrb[94].mxu0  ;;  %v2641_v59 = vpop.f32.mrb[94].mxu1 }
 0x1e3   : > { %v2820_v35 = vmax.f32 %v2331_v7, %v2638_v0  ;;  %v2332_v41 = vmax.f32 %v5586_v31, %v2152_v47  ;;  %v3972_v19 = vpop.f32.mrb[95].mxu0  ;;  %v4068_v27 = vpop.f32.mrb[95].mxu1 }
 0x1e4   : > { %v5587_v27 = vmax.f32 %v4808_v38, %v4810_v39 }
 0x1e5   : > { %v2872_v25 = vadd.f32 %v5214_v28, %v2820_v35  ;;  %v2821_v26 = vmax.f32 %v2332_v41, %v2641_v59  ;;  %v5588_v41 = vmax.f32 %v4816_v45, %v4818_v46  ;;  %v5589_v45 = vmax.f32 %v4828_v50, %v4830_v51 }
 0x1e7   : > { %v2917_v49 = vmax.f32 %v2872_v25, 0.0  ;;  %v2873_v40 = vadd.f32 %v5214_v28, %v2821_v26 }
 0x1e8   : > { %v2157_v0 = vpop.f32.mrb[96].mxu0  ;;  %v2646_v33 = vpop.f32.mrb[96].mxu1 }
 0x1e9   : > { %v3628_v34 = vpack.c.bf16 %v2917_v49, %v2917_v49  ;;  %v2918_v19 = vmax.f32 %v2873_v40, 0.0  ;;  %v2333_v29 = vmax.f32 %v5587_v27, %v2157_v0  ;;  %v3975_v12 = vpop.f32.mrb[97].mxu0  ;;  %v4071_v7 = vpop.f32.mrb[97].mxu1 }
 0x1ea   : > { %v2160_v47 = vpop.f32.mrb[98].mxu0  ;;  %v2649_v59 = vpop.f32.mrb[98].mxu1 }
 0x1eb   : > { %3144 = vst.msk [vmem:[%s5224_s14] sm:$0xf] %vm3143_vm4, %v3628_v34  ;;  %v3629_v35 = vpack.c.bf16 %v2918_v19, %v2918_v19  ;;  %v2822_v31 = vmax.f32 %v2333_v29, %v2646_v33  ;;  %v2334_v25 = vmax.f32 %v5588_v41, %v2160_v47  ;;  %v3976_v26 = vpop.f32.mrb[99].mxu0  ;;  %v4072_v49 = vpop.f32.mrb[99].mxu1 }
 0x1ed   : > { %3145 = vst.msk [vmem:[%s5224_s14 + $0x4] sm:$0xf] %vm3143_vm4, %v3629_v35  ;;  %v2874_v38 = vadd.f32 %v5214_v28, %v2822_v31  ;;  %v2823_v39 = vmax.f32 %v2334_v25, %v2649_v59  ;;  %v5590_v31 = vmax.f32 %v4836_v57, %v4838_v58  ;;  %v5591_v57 = vmax.f32 %v4848_v62, %v4850_v63 }
 0x1ef   : > { %v2919_v40 = vmax.f32 %v2874_v38, 0.0  ;;  %v2875_v0 = vadd.f32 %v5214_v28, %v2823_v39 }
 0x1f0   : > { %v2165_v27 = vpop.f32.mrb[100].mxu0  ;;  %v2654_v34 = vpop.f32.mrb[100].mxu1 }
 0x1f1   : > { %v3630_v19 = vpack.c.bf16 %v2919_v40, %v2919_v40  ;;  %v2920_v33 = vmax.f32 %v2875_v0, 0.0  ;;  %v2335_v46 = vmax.f32 %v5589_v45, %v2165_v27  ;;  %v3979_v29 = vpop.f32.mrb[101].mxu0  ;;  %v4075_v12 = vpop.f32.mrb[101].mxu1 }
 0x1f2   : > { %v2168_v7 = vpop.f32.mrb[102].mxu0  ;;  %v2657_v47 = vpop.f32.mrb[102].mxu1  ;;  %v5592_v12 = vmax.f32 %v4856_v5, %v4858_v6  ;;  %v5593_v5 = vmax.f32 %v4868_v10, %v4870_v11 }
 0x1f3   : > { %3146 = vst.msk [vmem:[%s5224_s14 + $0x8] sm:$0xf] %vm3143_vm4, %v3630_v19  ;;  %v3631_v35 = vpack.c.bf16 %v2920_v33, %v2920_v33  ;;  %v2824_v59 = vmax.f32 %v2335_v46, %v2654_v34  ;;  %v2336_v41 = vmax.f32 %v5590_v31, %v2168_v7  ;;  %v3980_v25 = vpop.f32.mrb[103].mxu0  ;;  %v4076_v26 = vpop.f32.mrb[103].mxu1 }
 0x1f5   : > { %3147 = vst.msk [vmem:[%s5224_s14 + $0xc] sm:$0xf] %vm3143_vm4, %v3631_v35  ;;  %v2876_v50 = vadd.f32 %v5214_v28, %v2824_v59  ;;  %v2825_v51 = vmax.f32 %v2336_v41, %v2657_v47 }
 0x1f7   : > { %v2921_v49 = vmax.f32 %v2876_v50, 0.0  ;;  %v2877_v38 = vadd.f32 %v5214_v28, %v2825_v51 }
 0x1f8   : > { %v2173_v39 = vpop.f32.mrb[104].mxu0  ;;  %v2662_v40 = vpop.f32.mrb[104].mxu1 }
 0x1f9   : > { %v3632_v0 = vpack.c.bf16 %v2921_v49, %v2921_v49  ;;  %v2922_v27 = vmax.f32 %v2877_v38, 0.0  ;;  %v2337_v58 = vmax.f32 %v5591_v57, %v2173_v39  ;;  %v3983_v34 = vpop.f32.mrb[105].mxu0  ;;  %v4079_v19 = vpop.f32.mrb[105].mxu1 }
 0x1fa   : > { %v2176_v33 = vpop.f32.mrb[106].mxu0  ;;  %v2665_v45 = vpop.f32.mrb[106].mxu1 }
 0x1fb   : > { %3148 = vst.msk [vmem:[%s5224_s14 + $0x10] sm:$0xf] %vm3143_vm4, %v3632_v0  ;;  %v3633_v46 = vpack.c.bf16 %v2922_v27, %v2922_v27  ;;  %v2826_v29 = vmax.f32 %v2337_v58, %v2662_v40  ;;  %v2338_v7 = vmax.f32 %v5592_v12, %v2176_v33  ;;  %v3984_v47 = vpop.f32.mrb[107].mxu0  ;;  %v4080_v35 = vpop.f32.mrb[107].mxu1  ;;  %v5594_v27 = vmax.f32 %v4876_v17, %v4878_v18 }
 0x1fc   : > { %v5595_v17 = vmax.f32 %v4888_v22, %v4890_v23 }
 0x1fd   : > { %3149 = vst.msk [vmem:[%s5224_s14 + $0x14] sm:$0xf] %vm3143_vm4, %v3633_v46  ;;  %v2878_v62 = vadd.f32 %v5214_v28, %v2826_v29  ;;  %v2827_v63 = vmax.f32 %v2338_v7, %v2665_v45 }
 0x1ff   : > { %v2923_v59 = vmax.f32 %v2878_v62, 0.0  ;;  %v2879_v31 = vadd.f32 %v5214_v28, %v2827_v63 }
 0x200   : > { %v2181_v41 = vpop.f32.mrb[108].mxu0  ;;  %v2670_v25 = vpop.f32.mrb[108].mxu1 }
 0x201   : > { %v3634_v26 = vpack.c.bf16 %v2923_v59, %v2923_v59  ;;  %v2924_v50 = vmax.f32 %v2879_v31, 0.0  ;;  %v2339_v6 = vmax.f32 %v5593_v5, %v2181_v41  ;;  %v3987_v51 = vpop.f32.mrb[109].mxu0  ;;  %v4083_v49 = vpop.f32.mrb[109].mxu1  ;;  %v5596_v31 = vmax.f32 %v4896_v36, %v4898_v37 }
 0x202   : > { %v2184_v38 = vpop.f32.mrb[110].mxu0  ;;  %v2673_v39 = vpop.f32.mrb[110].mxu1  ;;  %v5597_v36 = vmax.f32 %v4908_v44, %v4910_v48 }
 0x203   : > { %3150 = vst.msk [vmem:[%s5224_s14 + $0x18] sm:$0xf] %vm3143_vm4, %v3634_v26  ;;  %v3635_v40 = vpack.c.bf16 %v2924_v50, %v2924_v50  ;;  %v2828_v0 = vmax.f32 %v2339_v6, %v2670_v25  ;;  %v2340_v57 = vmax.f32 %v5594_v27, %v2184_v38  ;;  %v3988_v58 = vpop.f32.mrb[111].mxu0  ;;  %v4084_v34 = vpop.f32.mrb[111].mxu1 }
 0x204   : > { %v5598_v34 = vmax.f32 %v4916_v60, %v4918_v61  ;;  %v5599_v60 = vmax.f32 %v4928_v4, %v4930_v8 }
 0x205   : > { %3151 = vst.msk [vmem:[%s5224_s14 + $0x1c] sm:$0xf] %vm3143_vm4, %v3635_v40  ;;  %v2880_v10 = vadd.f32 %v5214_v28, %v2828_v0  ;;  %v2829_v11 = vmax.f32 %v2340_v57, %v2673_v39 }
 0x207   : > { %v2925_v19 = vmax.f32 %v2880_v10, 0.0  ;;  %v2881_v33 = vadd.f32 %v5214_v28, %v2829_v11 }
 0x208   : > { %v2189_v45 = vpop.f32.mrb[112].mxu0  ;;  %v2678_v46 = vpop.f32.mrb[112].mxu1 }
 0x209   : > { %v3636_v29 = vpack.c.bf16 %v2925_v19, %v2925_v19  ;;  %v2926_v12 = vmax.f32 %v2881_v33, 0.0  ;;  %v2341_v18 = vmax.f32 %v5595_v17, %v2189_v45  ;;  %v3991_v7 = vpop.f32.mrb[113].mxu0  ;;  %v4087_v47 = vpop.f32.mrb[113].mxu1 }
 0x20a   : > { %v2192_v35 = vpop.f32.mrb[114].mxu0  ;;  %v2681_v62 = vpop.f32.mrb[114].mxu1 }
 0x20b   : > { %3152 = vst.msk [vmem:[%s5224_s14 + $0x20] sm:$0xf] %vm3143_vm4, %v3636_v29  ;;  %v3637_v63 = vpack.c.bf16 %v2926_v12, %v2926_v12  ;;  %v2830_v59 = vmax.f32 %v2341_v18, %v2678_v46  ;;  %v2342_v41 = vmax.f32 %v5596_v31, %v2192_v35  ;;  %v3992_v25 = vpop.f32.mrb[115].mxu0  ;;  %v4088_v26 = vpop.f32.mrb[115].mxu1 }
 0x20d   : > { %3153 = vst.msk [vmem:[%s5224_s14 + $0x24] sm:$0xf] %vm3143_vm4, %v3637_v63  ;;  %v2882_v22 = vadd.f32 %v5214_v28, %v2830_v59  ;;  %v2831_v23 = vmax.f32 %v2342_v41, %v2681_v62  ;;  %v5600_v59 = vmax.f32 %v4936_v20, %v4938_v21  ;;  %v5601_v20 = vmax.f32 %v4948_v32, %v4950_v42 }
 0x20f   : > { %v2927_v50 = vmax.f32 %v2882_v22, 0.0  ;;  %v2883_v5 = vadd.f32 %v5214_v28, %v2831_v23 }
 0x210   : > { %v2197_v6 = vpop.f32.mrb[116].mxu0  ;;  %v2686_v51 = vpop.f32.mrb[116].mxu1 }
 0x211   : > { %v3638_v49 = vpack.c.bf16 %v2927_v50, %v2927_v50  ;;  %v2928_v38 = vmax.f32 %v2883_v5, 0.0  ;;  %v2343_v37 = vmax.f32 %v5597_v36, %v2197_v6  ;;  %v3995_v39 = vpop.f32.mrb[117].mxu0  ;;  %v4091_v40 = vpop.f32.mrb[117].mxu1 }
 0x212   : > { %v2200_v0 = vpop.f32.mrb[118].mxu0  ;;  %v2689_v27 = vpop.f32.mrb[118].mxu1  ;;  %v5602_v40 = vmax.f32 %v4956_v2, %v4958_v3  ;;  %v5603_v2 = vmax.f32 %v4968_v16, %v4970_v30 }
 0x213   : > { %3154 = vst.msk [vmem:[%s5224_s14 + $0x28] sm:$0xf] %vm3143_vm4, %v3638_v49  ;;  %v3639_v57 = vpack.c.bf16 %v2928_v38, %v2928_v38  ;;  %v2832_v58 = vmax.f32 %v2343_v37, %v2686_v51  ;;  %v2344_v10 = vmax.f32 %v5598_v34, %v2200_v0  ;;  %v3996_v11 = vpop.f32.mrb[119].mxu0  ;;  %v4092_v19 = vpop.f32.mrb[119].mxu1 }
 0x215   : > { %3155 = vst.msk [vmem:[%s5224_s14 + $0x2c] sm:$0xf] %vm3143_vm4, %v3639_v57  ;;  %v2884_v44 = vadd.f32 %v5214_v28, %v2832_v58  ;;  %v2833_v48 = vmax.f32 %v2344_v10, %v2689_v27 }
 0x217   : > { %v2929_v33 = vmax.f32 %v2884_v44, 0.0  ;;  %v2885_v45 = vadd.f32 %v5214_v28, %v2833_v48 }
 0x218   : > { %v2205_v46 = vpop.f32.mrb[120].mxu0  ;;  %v2694_v29 = vpop.f32.mrb[120].mxu1 }
 0x219   : > { %v3640_v12 = vpack.c.bf16 %v2929_v33, %v2929_v33  ;;  %v2930_v17 = vmax.f32 %v2885_v45, 0.0  ;;  %v2345_v61 = vmax.f32 %v5599_v60, %v2205_v46  ;;  %v3999_v18 = vpop.f32.mrb[121].mxu0  ;;  %v4095_v7 = vpop.f32.mrb[121].mxu1 }
 0x21a   : > { %v2208_v47 = vpop.f32.mrb[122].mxu0  ;;  %v2697_v35 = vpop.f32.mrb[122].mxu1 }
 0x21b   : > { %3156 = vst.msk [vmem:[%s5224_s14 + $0x30] sm:$0xf] %vm3143_vm4, %v3640_v12  ;;  %v3641_v62 = vpack.c.bf16 %v2930_v17, %v2930_v17  ;;  %v2834_v63 = vmax.f32 %v2345_v61, %v2694_v29  ;;  %v2346_v31 = vmax.f32 %v5600_v59, %v2208_v47  ;;  %v4000_v41 = vpop.f32.mrb[123].mxu0  ;;  %v4096_v25 = vpop.f32.mrb[123].mxu1  ;;  %v5604_v17 = vmax.f32 %v4976_v56, %v4978_v15 }
 0x21c   : > { %v5605_v56 = vmax.f32 %v4988_v53, %v4990_v54 }
 0x21d   : > { %3157 = vst.msk [vmem:[%s5224_s14 + $0x34] sm:$0xf] %vm3143_vm4, %v3641_v62  ;;  %v2886_v4 = vadd.f32 %v5214_v28, %v2834_v63  ;;  %v2835_v8 = vmax.f32 %v2346_v31, %v2697_v35 }
 0x21f   : > { %v2931_v26 = vmax.f32 %v2886_v4, 0.0  ;;  %v2887_v22 = vadd.f32 %v5214_v28, %v2835_v8 }
 0x220   : > { %v2213_v23 = vpop.f32.mrb[124].mxu0  ;;  %v2702_v50 = vpop.f32.mrb[124].mxu1 }
 0x221   : > { %v3642_v5 = vpack.c.bf16 %v2931_v26, %v2931_v26  ;;  %v2932_v6 = vmax.f32 %v2887_v22, 0.0  ;;  %v2347_v21 = vmax.f32 %v5601_v20, %v2213_v23  ;;  %v4003_v51 = vpop.f32.mrb[125].mxu0  ;;  %v4099_v49 = vpop.f32.mrb[125].mxu1  ;;  %v5606_v22 = vmax.f32 %v4996_v55, %v4998_v9 }
 0x222   : > { %v2216_v38 = vpop.f32.mrb[126].mxu0  ;;  %v2705_v36 = vpop.f32.mrb[126].mxu1  ;;  %v5607_v9 = vmax.f32 %v5008_v13, %v5010_v43 }
 0x223   : > { %3158 = vst.msk [vmem:[%s5224_s14 + $0x38] sm:$0xf] %vm3143_vm4, %v3642_v5  ;;  %v3643_v37 = vpack.c.bf16 %v2932_v6, %v2932_v6  ;;  %v2836_v39 = vmax.f32 %v2347_v21, %v2702_v50  ;;  %v2348_v0 = vmax.f32 %v5602_v40, %v2216_v38  ;;  %v4004_v27 = vpop.f32.mrb[127].mxu0  ;;  %v4100_v57 = vpop.f32.mrb[127].mxu1 }
 0x224   : > { %v5608_v57 = vmax.f32 %v5016_v14, %v5018_v24 }
 0x225   : > { %3159 = vst.msk [vmem:[%s5224_s14 + $0x3c] sm:$0xf] %vm3143_vm4, %v3643_v37  ;;  %v2888_v32 = vadd.f32 %v5214_v28, %v2836_v39  ;;  %v2837_v42 = vmax.f32 %v2348_v0, %v2705_v36 }
 0x227   : > { %v2933_v58 = vmax.f32 %v2888_v32, 0.0  ;;  %v2889_v34 = vadd.f32 %v5214_v28, %v2837_v42 }
 0x228   : > { %v2221_v10 = vpop.f32.mrb[128].mxu0  ;;  %v2710_v11 = vpop.f32.mrb[128].mxu1 }
 0x229   : > { %v3644_v19 = vpack.c.bf16 %v2933_v58, %v2933_v58  ;;  %v2934_v44 = vmax.f32 %v2889_v34, 0.0  ;;  %v2349_v3 = vmax.f32 %v5603_v2, %v2221_v10  ;;  %v4007_v48 = vpop.f32.mrb[129].mxu0  ;;  %v4103_v33 = vpop.f32.mrb[129].mxu1 }
 0x22a   : > { %v2224_v45 = vpop.f32.mrb[130].mxu0  ;;  %v2713_v46 = vpop.f32.mrb[130].mxu1 }
 0x22b   : > { %3160 = vst.msk [vmem:[%s5224_s14 + $0x40] sm:$0xf] %vm3143_vm4, %v3644_v19  ;;  %v3645_v29 = vpack.c.bf16 %v2934_v44, %v2934_v44  ;;  %v2838_v12 = vmax.f32 %v2349_v3, %v2710_v11  ;;  %v2350_v60 = vmax.f32 %v5604_v17, %v2224_v45  ;;  %v4008_v61 = vpop.f32.mrb[131].mxu0  ;;  %v4104_v18 = vpop.f32.mrb[131].mxu1  ;;  %v5609_v3 = vld [vmem:[#allocation3_spill] sm:$0xff]  ;;  %v5611_v17 = vld [vmem:[#allocation4_spill] sm:$0xff] }
 0x22c   : > { %v5610_v24 = vmax.f32 %v5028_v1, %v5609_v3 }
 0x22d   : > { %3161 = vst.msk [vmem:[%s5224_s14 + $0x44] sm:$0xf] %vm3143_vm4, %v3645_v29  ;;  %v2890_v16 = vadd.f32 %v5214_v28, %v2838_v12  ;;  %v2839_v30 = vmax.f32 %v2350_v60, %v2713_v46  ;;  %v5612_v60 = vld [vmem:[#allocation5_spill] sm:$0xff] }
 0x22e   : > { %v5613_v61 = vmax.f32 %v5611_v17, %v5612_v60  ;;  %v5626_v17 = vld [vmem:[#allocation14_spill] sm:$0xff]  ;;  %v5627_v60 = vld [vmem:[#allocation15_spill] sm:$0xff] }
 0x22f   : > { %v2935_v7 = vmax.f32 %v2890_v16, 0.0  ;;  %v2891_v47 = vadd.f32 %v5214_v28, %v2839_v30 }
 0x230   : > { %v2229_v35 = vpop.f32.mrb[132].mxu0  ;;  %v2718_v62 = vpop.f32.mrb[132].mxu1 }
 0x231   : > { %v3646_v63 = vpack.c.bf16 %v2935_v7, %v2935_v7  ;;  %v2936_v59 = vmax.f32 %v2891_v47, 0.0  ;;  %v2351_v15 = vmax.f32 %v5605_v56, %v2229_v35  ;;  %v4011_v31 = vpop.f32.mrb[133].mxu0  ;;  %v4107_v41 = vpop.f32.mrb[133].mxu1 }
 0x232   : > { %v2232_v25 = vpop.f32.mrb[134].mxu0  ;;  %v2721_v4 = vpop.f32.mrb[134].mxu1  ;;  %v5615_v31 = vld [vmem:[#allocation7_spill] sm:$0xff] }
 0x233   : > { %3162 = vst.msk [vmem:[%s5224_s14 + $0x48] sm:$0xf] %vm3143_vm4, %v3646_v63  ;;  %v3647_v8 = vpack.c.bf16 %v2936_v59, %v2936_v59  ;;  %v2840_v26 = vmax.f32 %v2351_v15, %v2718_v62  ;;  %v2352_v23 = vmax.f32 %v5606_v22, %v2232_v25  ;;  %v4012_v50 = vpop.f32.mrb[135].mxu0  ;;  %v4108_v5 = vpop.f32.mrb[135].mxu1  ;;  %v5614_v15 = vld [vmem:[#allocation6_spill] sm:$0xff] }
 0x234   : > { %v5616_v41 = vmax.f32 %v5614_v15, %v5615_v31  ;;  %v5617_v5 = vld [vmem:[#allocation8_spill] sm:$0xff] }
 0x235   : > { %3163 = vst.msk [vmem:[%s5224_s14 + $0x4c] sm:$0xf] %vm3143_vm4, %v3647_v8  ;;  %v2892_v53 = vadd.f32 %v5214_v28, %v2840_v26  ;;  %v2841_v54 = vmax.f32 %v2352_v23, %v2721_v4 }
 0x237   : > { %v2937_v6 = vmax.f32 %v2892_v53, 0.0  ;;  %v2893_v20 = vadd.f32 %v5214_v28, %v2841_v54  ;;  %v5618_v53 = vld [vmem:[#allocation9_spill] sm:$0xff] }
 0x238   : > { %v2237_v21 = vpop.f32.mrb[136].mxu0  ;;  %v2726_v51 = vpop.f32.mrb[136].mxu1  ;;  %v5619_v54 = vmax.f32 %v5617_v5, %v5618_v53  ;;  %v5632_v5 = vld [vmem:[#allocation18_spill] sm:$0xff]  ;;  %v5633_v53 = vld [vmem:[#allocation19_spill] sm:$0xff] }
 0x239   : > { %v3648_v49 = vpack.c.bf16 %v2937_v6, %v2937_v6  ;;  %v2938_v38 = vmax.f32 %v2893_v20, 0.0  ;;  %v2353_v55 = vmax.f32 %v5607_v9, %v2237_v21  ;;  %v4015_v36 = vpop.f32.mrb[137].mxu0  ;;  %v4111_v37 = vpop.f32.mrb[137].mxu1 }
 0x23a   : > { %v2240_v39 = vpop.f32.mrb[138].mxu0  ;;  %v2729_v40 = vpop.f32.mrb[138].mxu1 }
 0x23b   : > { %3164 = vst.msk [vmem:[%s5224_s14 + $0x50] sm:$0xf] %vm3143_vm4, %v3648_v49  ;;  %v3649_v0 = vpack.c.bf16 %v2938_v38, %v2938_v38  ;;  %v2842_v27 = vmax.f32 %v2353_v55, %v2726_v51  ;;  %v2354_v32 = vmax.f32 %v5608_v57, %v2240_v39  ;;  %v4016_v42 = vpop.f32.mrb[139].mxu0  ;;  %v4112_v58 = vpop.f32.mrb[139].mxu1 }
 0x23d   : > { %3165 = vst.msk [vmem:[%s5224_s14 + $0x54] sm:$0xf] %vm3143_vm4, %v3649_v0  ;;  %v2894_v13 = vadd.f32 %v5214_v28, %v2842_v27  ;;  %v2843_v43 = vmax.f32 %v2354_v32, %v2729_v40  ;;  %v5620_v40 = vld [vmem:[#allocation10_spill] sm:$0xff]  ;;  %v5621_v0 = vld [vmem:[#allocation11_spill] sm:$0xff] }
 0x23e   : > { %v5622_v27 = vmax.f32 %v5620_v40, %v5621_v0 }
 0x23f   : > { %v2939_v34 = vmax.f32 %v2894_v13, 0.0  ;;  %v2895_v10 = vadd.f32 %v5214_v28, %v2843_v43 }
 0x240   : > { %v2245_v11 = vpop.f32.mrb[140].mxu0  ;;  %v2734_v19 = vpop.f32.mrb[140].mxu1 }
 0x241   : > { %v3650_v44 = vpack.c.bf16 %v2939_v34, %v2939_v34  ;;  %v2940_v2 = vmax.f32 %v2895_v10, 0.0  ;;  %v2355_v14 = vmax.f32 %v5610_v24, %v2245_v11  ;;  %v4019_v48 = vpop.f32.mrb[141].mxu0  ;;  %v4115_v33 = vpop.f32.mrb[141].mxu1  ;;  %v5623_v10 = vld [vmem:[#allocation12_spill] sm:$0xff]  ;;  %v5624_v11 = vld [vmem:[#allocation13_spill] sm:$0xff] }
 0x242   : > { %v2248_v45 = vpop.f32.mrb[142].mxu0  ;;  %v2737_v46 = vpop.f32.mrb[142].mxu1 }
 0x243   : > { %3166 = vst.msk [vmem:[%s5224_s14 + $0x58] sm:$0xf] %vm3143_vm4, %v3650_v44  ;;  %v3651_v29 = vpack.c.bf16 %v2940_v2, %v2940_v2  ;;  %v2844_v12 = vmax.f32 %v2355_v14, %v2734_v19  ;;  %v2356_v18 = vmax.f32 %v5613_v61, %v2248_v45  ;;  %v4020_v16 = vpop.f32.mrb[143].mxu0  ;;  %v4116_v30 = vpop.f32.mrb[143].mxu1  ;;  %v5625_v19 = vmax.f32 %v5623_v10, %v5624_v11  ;;  %v5638_v10 = vld [vmem:[#allocation22_spill] sm:$0xff]  ;;  %v5639_v11 = vld [vmem:[#allocation23_spill] sm:$0xff] }
 0x244   : > { %v5628_v61 = vmax.f32 %v5626_v17, %v5627_v60 }
 0x245   : > { %3167 = vst.msk [vmem:[%s5224_s14 + $0x5c] sm:$0xf] %vm3143_vm4, %v3651_v29  ;;  %v2896_v1 = vadd.f32 %v5214_v28, %v2844_v12  ;;  %v2845_v7 = vmax.f32 %v2356_v18, %v2737_v46 }
 0x247   : > { %v2941_v47 = vmax.f32 %v2896_v1, 0.0  ;;  %v2897_v35 = vadd.f32 %v5214_v28, %v2845_v7 }
 0x248   : > { %v2253_v62 = vpop.f32.mrb[144].mxu0  ;;  %v2742_v63 = vpop.f32.mrb[144].mxu1 }
 0x249   : > { %v3652_v59 = vpack.c.bf16 %v2941_v47, %v2941_v47  ;;  %v2942_v56 = vmax.f32 %v2897_v35, 0.0  ;;  %v2357_v25 = vmax.f32 %v5616_v41, %v2253_v62  ;;  %v4023_v4 = vpop.f32.mrb[145].mxu0  ;;  %v4119_v8 = vpop.f32.mrb[145].mxu1  ;;  %v5629_v62 = vld [vmem:[#allocation16_spill] sm:$0xff] }
 0x24a   : > { %v2256_v26 = vpop.f32.mrb[146].mxu0  ;;  %v2745_v22 = vpop.f32.mrb[146].mxu1 }
 0x24b   : > { %3168 = vst.msk [vmem:[%s5224_s14 + $0x60] sm:$0xf] %vm3143_vm4, %v3652_v59  ;;  %v3653_v23 = vpack.c.bf16 %v2942_v56, %v2942_v56  ;;  %v2846_v50 = vmax.f32 %v2357_v25, %v2742_v63  ;;  %v2358_v6 = vmax.f32 %v5619_v54, %v2256_v26  ;;  %v4024_v20 = vpop.f32.mrb[147].mxu0  ;;  %v4120_v21 = vpop.f32.mrb[147].mxu1  ;;  %v5630_v63 = vld [vmem:[#allocation17_spill] sm:$0xff]  ;;  %v5634_v54 = vmax.f32 %v5632_v5, %v5633_v53 }
 0x24c   : > { %v5631_v59 = vmax.f32 %v5629_v62, %v5630_v63  ;;  %v5644_v62 = vld [vmem:[#allocation26_spill] sm:$0xff]  ;;  %v5645_v63 = vld [vmem:[#allocation27_spill] sm:$0xff] }
 0x24d   : > { %3169 = vst.msk [vmem:[%s5224_s14 + $0x64] sm:$0xf] %vm3143_vm4, %v3653_v23  ;;  %v2898_v51 = vadd.f32 %v5214_v28, %v2846_v50  ;;  %v2847_v49 = vmax.f32 %v2358_v6, %v2745_v22 }
 0x24f   : > { %v2943_v38 = vmax.f32 %v2898_v51, 0.0  ;;  %v2899_v9 = vadd.f32 %v5214_v28, %v2847_v49 }
 0x250   : > { %v2261_v55 = vpop.f32.mrb[148].mxu0  ;;  %v2750_v36 = vpop.f32.mrb[148].mxu1 }
 0x251   : > { %v3654_v37 = vpack.c.bf16 %v2943_v38, %v2943_v38  ;;  %v2944_v39 = vmax.f32 %v2899_v9, 0.0  ;;  %v2359_v57 = vmax.f32 %v5622_v27, %v2261_v55  ;;  %v4027_v32 = vpop.f32.mrb[149].mxu0  ;;  %v4123_v42 = vpop.f32.mrb[149].mxu1  ;;  %v5635_v55 = vld [vmem:[#allocation20_spill] sm:$0xff] }
 0x252   : > { %v2264_v58 = vpop.f32.mrb[150].mxu0  ;;  %v2753_v13 = vpop.f32.mrb[150].mxu1 }
 0x253   : > { %3170 = vst.msk [vmem:[%s5224_s14 + $0x68] sm:$0xf] %vm3143_vm4, %v3654_v37  ;;  %v3655_v43 = vpack.c.bf16 %v2944_v39, %v2944_v39  ;;  %v2848_v34 = vmax.f32 %v2359_v57, %v2750_v36  ;;  %v2360_v44 = vmax.f32 %v5625_v19, %v2264_v58  ;;  %v4028_v2 = vpop.f32.mrb[151].mxu0  ;;  %v4124_v3 = vpop.f32.mrb[151].mxu1  ;;  %v5636_v36 = vld [vmem:[#allocation21_spill] sm:$0xff]  ;;  %v5640_v19 = vmax.f32 %v5638_v10, %v5639_v11 }
 0x254   : > { %v5637_v37 = vmax.f32 %v5635_v55, %v5636_v36  ;;  %v5650_v55 = vld [vmem:[#allocation30_spill] sm:$0xff]  ;;  %v5651_v36 = vld [vmem:[#allocation31_spill] sm:$0xff] }
 0x255   : > { %3171 = vst.msk [vmem:[%s5224_s14 + $0x6c] sm:$0xf] %vm3143_vm4, %v3655_v43  ;;  %v2900_v24 = vadd.f32 %v5214_v28, %v2848_v34  ;;  %v2849_v14 = vmax.f32 %v2360_v44, %v2753_v13 }
 0x257   : > { %v2945_v48 = vmax.f32 %v2900_v24, 0.0  ;;  %v2901_v33 = vadd.f32 %v5214_v28, %v2849_v14 }
 0x258   : > { %v2269_v45 = vpop.f32.mrb[152].mxu0  ;;  %v2758_v46 = vpop.f32.mrb[152].mxu1 }
 0x259   : > { %v3656_v29 = vpack.c.bf16 %v2945_v48, %v2945_v48  ;;  %v2946_v12 = vmax.f32 %v2901_v33, 0.0  ;;  %v2361_v18 = vmax.f32 %v5628_v61, %v2269_v45  ;;  %v4031_v16 = vpop.f32.mrb[153].mxu0  ;;  %v4127_v30 = vpop.f32.mrb[153].mxu1  ;;  %v5641_v45 = vld [vmem:[#allocation24_spill] sm:$0xff] }
 0x25a   : > { %v2272_v1 = vpop.f32.mrb[154].mxu0  ;;  %v2761_v7 = vpop.f32.mrb[154].mxu1 }
 0x25b   : > { %3172 = vst.msk [vmem:[%s5224_s14 + $0x70] sm:$0xf] %vm3143_vm4, %v3656_v29  ;;  %v3657_v47 = vpack.c.bf16 %v2946_v12, %v2946_v12  ;;  %v2850_v35 = vmax.f32 %v2361_v18, %v2758_v46  ;;  %v2362_v56 = vmax.f32 %v5631_v59, %v2272_v1  ;;  %v4032_v15 = vpop.f32.mrb[155].mxu0  ;;  %v4128_v31 = vpop.f32.mrb[155].mxu1  ;;  %v5642_v46 = vld [vmem:[#allocation25_spill] sm:$0xff]  ;;  %v5646_v59 = vmax.f32 %v5644_v62, %v5645_v63 }
 0x25c   : > { %v5643_v29 = vmax.f32 %v5641_v45, %v5642_v46  ;;  %v5656_v45 = vld [vmem:[#allocation34_spill] sm:$0xff]  ;;  %v5657_v46 = vld [vmem:[#allocation35_spill] sm:$0xff] }
 0x25d   : > { %3173 = vst.msk [vmem:[%s5224_s14 + $0x74] sm:$0xf] %vm3143_vm4, %v3657_v47  ;;  %v2902_v41 = vadd.f32 %v5214_v28, %v2850_v35  ;;  %v2851_v25 = vmax.f32 %v2362_v56, %v2761_v7 }
 0x25f   : > { %v2947_v4 = vmax.f32 %v2902_v41, 0.0  ;;  %v2903_v8 = vadd.f32 %v5214_v28, %v2851_v25 }
 0x260   : > { %v2277_v26 = vpop.f32.mrb[156].mxu0  ;;  %v2766_v22 = vpop.f32.mrb[156].mxu1 }
 0x261   : > { %v3658_v23 = vpack.c.bf16 %v2947_v4, %v2947_v4  ;;  %v2948_v50 = vmax.f32 %v2903_v8, 0.0  ;;  %v2363_v6 = vmax.f32 %v5634_v54, %v2277_v26  ;;  %v4035_v20 = vpop.f32.mrb[157].mxu0  ;;  %v4131_v21 = vpop.f32.mrb[157].mxu1  ;;  %v5647_v26 = vld [vmem:[#allocation28_spill] sm:$0xff] }
 0x262   : > { %v2280_v51 = vpop.f32.mrb[158].mxu0  ;;  %v2769_v49 = vpop.f32.mrb[158].mxu1 }
 0x263   : > { %3174 = vst.msk [vmem:[%s5224_s14 + $0x78] sm:$0xf] %vm3143_vm4, %v3658_v23  ;;  %v3659_v38 = vpack.c.bf16 %v2948_v50, %v2948_v50  ;;  %v2852_v9 = vmax.f32 %v2363_v6, %v2766_v22  ;;  %v2364_v39 = vmax.f32 %v5637_v37, %v2280_v51  ;;  %v4036_v40 = vpop.f32.mrb[159].mxu0  ;;  %v4132_v0 = vpop.f32.mrb[159].mxu1  ;;  %v5648_v22 = vld [vmem:[#allocation29_spill] sm:$0xff]  ;;  %v5652_v37 = vmax.f32 %v5650_v55, %v5651_v36 }
 0x264   : > { %v5649_v23 = vmax.f32 %v5647_v26, %v5648_v22  ;;  %v5662_v26 = vld [vmem:[#allocation38_spill] sm:$0xff]  ;;  %v5663_v22 = vld [vmem:[#allocation39_spill] sm:$0xff] }
 0x265   : > { %3175 = vst.msk [vmem:[%s5224_s14 + $0x7c] sm:$0xf] %vm3143_vm4, %v3659_v38  ;;  %v2904_v27 = vadd.f32 %v5214_v28, %v2852_v9  ;;  %v2853_v57 = vmax.f32 %v2364_v39, %v2769_v49 }
 0x267   : > { %v2949_v32 = vmax.f32 %v2904_v27, 0.0  ;;  %v2905_v42 = vadd.f32 %v5214_v28, %v2853_v57 }
 0x268   : > { %v2285_v58 = vpop.f32.mrb[160].mxu0  ;;  %v2774_v13 = vpop.f32.mrb[160].mxu1 }
 0x269   : > { %v3660_v43 = vpack.c.bf16 %v2949_v32, %v2949_v32  ;;  %v2950_v34 = vmax.f32 %v2905_v42, 0.0  ;;  %v2365_v44 = vmax.f32 %v5640_v19, %v2285_v58  ;;  %v4039_v2 = vpop.f32.mrb[161].mxu0  ;;  %v4135_v3 = vpop.f32.mrb[161].mxu1  ;;  %v5653_v58 = vld [vmem:[#allocation32_spill] sm:$0xff] }
 0x26a   : > { %v2288_v24 = vpop.f32.mrb[162].mxu0  ;;  %v2777_v14 = vpop.f32.mrb[162].mxu1 }
 0x26b   : > { %3176 = vst.msk [vmem:[%s5224_s14 + $0x80] sm:$0xf] %vm3143_vm4, %v3660_v43  ;;  %v3661_v48 = vpack.c.bf16 %v2950_v34, %v2950_v34  ;;  %v2854_v33 = vmax.f32 %v2365_v44, %v2774_v13  ;;  %v2366_v12 = vmax.f32 %v5643_v29, %v2288_v24  ;;  %v4040_v17 = vpop.f32.mrb[163].mxu0  ;;  %v4136_v60 = vpop.f32.mrb[163].mxu1  ;;  %v5654_v13 = vld [vmem:[#allocation33_spill] sm:$0xff]  ;;  %v5658_v29 = vmax.f32 %v5656_v45, %v5657_v46 }
 0x26c   : > { %v5655_v43 = vmax.f32 %v5653_v58, %v5654_v13  ;;  %v5668_v58 = vld [vmem:[#allocation42_spill] sm:$0xff] }
 0x26d   : > { %3177 = vst.msk [vmem:[%s5224_s14 + $0x84] sm:$0xf] %vm3143_vm4, %v3661_v48  ;;  %v2906_v61 = vadd.f32 %v5214_v28, %v2854_v33  ;;  %v2855_v18 = vmax.f32 %v2366_v12, %v2777_v14  ;;  %v5669_v13 = vmax.f32 %v5200_v52, %v5668_v58 }
 0x26f   : > { %v2951_v16 = vmax.f32 %v2906_v61, 0.0  ;;  %v2907_v30 = vadd.f32 %v5214_v28, %v2855_v18 }
 0x270   : > { %v2293_v1 = vpop.f32.mrb[164].mxu0  ;;  %v2782_v7 = vpop.f32.mrb[164].mxu1 }
 0x271   : > { %v3662_v47 = vpack.c.bf16 %v2951_v16, %v2951_v16  ;;  %v2952_v35 = vmax.f32 %v2907_v30, 0.0  ;;  %v2367_v56 = vmax.f32 %v5646_v59, %v2293_v1  ;;  %v4043_v15 = vpop.f32.mrb[165].mxu0  ;;  %v4139_v31 = vpop.f32.mrb[165].mxu1  ;;  %v5659_v1 = vld [vmem:[#allocation36_spill] sm:$0xff] }
 0x272   : > { %v2296_v41 = vpop.f32.mrb[166].mxu0  ;;  %v2785_v25 = vpop.f32.mrb[166].mxu1 }
 0x273   : > { %3178 = vst.msk [vmem:[%s5224_s14 + $0x88] sm:$0xf] %vm3143_vm4, %v3662_v47  ;;  %v3663_v4 = vpack.c.bf16 %v2952_v35, %v2952_v35  ;;  %v2856_v8 = vmax.f32 %v2367_v56, %v2782_v7  ;;  %v2368_v50 = vmax.f32 %v5649_v23, %v2296_v41  ;;  %v4044_v5 = vpop.f32.mrb[167].mxu0  ;;  %v4140_v53 = vpop.f32.mrb[167].mxu1  ;;  %v5660_v7 = vld [vmem:[#allocation37_spill] sm:$0xff]  ;;  %v5664_v23 = vmax.f32 %v5662_v26, %v5663_v22 }
 0x274   : > { %v5661_v47 = vmax.f32 %v5659_v1, %v5660_v7 }
 0x275   : > { %3179 = vst.msk [vmem:[%s5224_s14 + $0x8c] sm:$0xf] %vm3143_vm4, %v3663_v4  ;;  %v2908_v54 = vadd.f32 %v5214_v28, %v2856_v8  ;;  %v2857_v6 = vmax.f32 %v2368_v50, %v2785_v25 }
 0x277   : > { %v2953_v20 = vmax.f32 %v2908_v54, 0.0  ;;  %v2909_v21 = vadd.f32 %v5214_v28, %v2857_v6 }
 0x278   : > { %v2301_v51 = vpop.f32.mrb[168].mxu0  ;;  %v2790_v49 = vpop.f32.mrb[168].mxu1 }
 0x279   : > { %v3664_v38 = vpack.c.bf16 %v2953_v20, %v2953_v20  ;;  %v2954_v9 = vmax.f32 %v2909_v21, 0.0  ;;  %v2369_v39 = vmax.f32 %v5652_v37, %v2301_v51  ;;  %v4047_v40 = vpop.f32.mrb[169].mxu0  ;;  %v4143_v0 = vpop.f32.mrb[169].mxu1  ;;  %v5665_v51 = vld [vmem:[#allocation40_spill] sm:$0xff] }
 0x27a   : > { %v2304_v27 = vpop.f32.mrb[170].mxu0  ;;  %v2793_v57 = vpop.f32.mrb[170].mxu1 }
 0x27b   : > { %3180 = vst.msk [vmem:[%s5224_s14 + $0x90] sm:$0xf] %vm3143_vm4, %v3664_v38  ;;  %v3665_v32 = vpack.c.bf16 %v2954_v9, %v2954_v9  ;;  %v2858_v42 = vmax.f32 %v2369_v39, %v2790_v49  ;;  %v2370_v34 = vmax.f32 %v5655_v43, %v2304_v27  ;;  %v4048_v10 = vpop.f32.mrb[171].mxu0  ;;  %v4144_v11 = vpop.f32.mrb[171].mxu1  ;;  %v5666_v49 = vld [vmem:[#allocation41_spill] sm:$0xff] }
 0x27c   : > { %v5667_v38 = vmax.f32 %v5665_v51, %v5666_v49 }
 0x27d   : > { %3181 = vst.msk [vmem:[%s5224_s14 + $0x94] sm:$0xf] %vm3143_vm4, %v3665_v32  ;;  %v2910_v19 = vadd.f32 %v5214_v28, %v2858_v42  ;;  %v2859_v44 = vmax.f32 %v2370_v34, %v2793_v57 }
 0x27f   : > { %v2955_v2 = vmax.f32 %v2910_v19, 0.0  ;;  %v2911_v3 = vadd.f32 %v5214_v28, %v2859_v44 }
 0x280   : > { %v2309_v24 = vpop.f32.mrb[172].mxu0  ;;  %v2798_v14 = vpop.f32.mrb[172].mxu1 }
 0x281   : > { %v3666_v48 = vpack.c.bf16 %v2955_v2, %v2955_v2  ;;  %v2956_v33 = vmax.f32 %v2911_v3, 0.0  ;;  %v2371_v12 = vmax.f32 %v5658_v29, %v2309_v24  ;;  %v4051_v17 = vpop.f32.mrb[173].mxu0  ;;  %v4147_v60 = vpop.f32.mrb[173].mxu1 }
 0x282   : > { %v2312_v61 = vpop.f32.mrb[174].mxu0  ;;  %v2801_v18 = vpop.f32.mrb[174].mxu1 }
 0x283   : > { %3182 = vst.msk [vmem:[%s5224_s14 + $0x98] sm:$0xf] %vm3143_vm4, %v3666_v48  ;;  %v3667_v16 = vpack.c.bf16 %v2956_v33, %v2956_v33  ;;  %v2860_v30 = vmax.f32 %v2371_v12, %v2798_v14  ;;  %v2372_v35 = vmax.f32 %v5661_v47, %v2312_v61  ;;  %v4052_v62 = vpop.f32.mrb[175].mxu0  ;;  %v4148_v63 = vpop.f32.mrb[175].mxu1 }
 0x285   : > { %3183 = vst.msk [vmem:[%s5224_s14 + $0x9c] sm:$0xf] %vm3143_vm4, %v3667_v16  ;;  %v2912_v59 = vadd.f32 %v5214_v28, %v2860_v30  ;;  %v2861_v56 = vmax.f32 %v2372_v35, %v2801_v18 }
 0x287   : > { %v2957_v15 = vmax.f32 %v2912_v59, 0.0  ;;  %v2913_v31 = vadd.f32 %v5214_v28, %v2861_v56 }
 0x288   : > { %v2317_v41 = vpop.f32.mrb[176].mxu0  ;;  %v2806_v25 = vpop.f32.mrb[176].mxu1 }
 0x289   : > { %v3668_v4 = vpack.c.bf16 %v2957_v15, %v2957_v15  ;;  %v2958_v8 = vmax.f32 %v2913_v31, 0.0  ;;  %v2373_v50 = vmax.f32 %v5664_v23, %v2317_v41  ;;  %v4055_v5 = vpop.f32.mrb[177].mxu0  ;;  %v4151_v53 = vpop.f32.mrb[177].mxu1 }
 0x28a   : > { %v2320_v54 = vpop.f32.mrb[178].mxu0  ;;  %v2809_v6 = vpop.f32.mrb[178].mxu1 }
 0x28b   : > { %3184 = vst.msk [vmem:[%s5224_s14 + $0xa0] sm:$0xf] %vm3143_vm4, %v3668_v4  ;;  %v3669_v20 = vpack.c.bf16 %v2958_v8, %v2958_v8  ;;  %v2862_v21 = vmax.f32 %v2373_v50, %v2806_v25  ;;  %v2374_v9 = vmax.f32 %v5667_v38, %v2320_v54  ;;  %v4056_v55 = vpop.f32.mrb[179].mxu0  ;;  %v4152_v36 = vpop.f32.mrb[179].mxu1 }
 0x28d   : > { %3185 = vst.msk [vmem:[%s5224_s14 + $0xa4] sm:$0xf] %vm3143_vm4, %v3669_v20  ;;  %v2914_v37 = vadd.f32 %v5214_v28, %v2862_v21  ;;  %v2863_v39 = vmax.f32 %v2374_v9, %v2809_v6 }
 0x28f   : > { %v2959_v40 = vmax.f32 %v2914_v37, 0.0  ;;  %v2915_v0 = vadd.f32 %v5214_v28, %v2863_v39 }
 0x290   : > { %v2325_v27 = vpop.f32.mrb[180].mxu0  ;;  %v2814_v57 = vpop.f32.mrb[180].mxu1 }
 0x291   : > { %v3670_v32 = vpack.c.bf16 %v2959_v40, %v2959_v40  ;;  %v2960_v42 = vmax.f32 %v2915_v0, 0.0  ;;  %v2375_v43 = vmax.f32 %v5669_v13, %v2325_v27  ;;  %v4059_v34 = vpop.f32.mrb[181].mxu0  ;;  %v4155_v10 = vpop.f32.mrb[181].mxu1 }
 0x292   : > { %v2328_v11 = vpop.f32.mrb[182].mxu0  ;;  %v2817_v19 = vpop.f32.mrb[182].mxu1 }
 0x293   : > { %3186 = vst.msk [vmem:[%s5224_s14 + $0xa8] sm:$0xf] %vm3143_vm4, %v3670_v32  ;;  %v3671_v44 = vpack.c.bf16 %v2960_v42, %v2960_v42  ;;  %v2864_v2 = vmax.f32 %v2375_v43, %v2814_v57  ;;  %v4060_v3 = vpop.f32.mrb[183].mxu0  ;;  %v4156_v24 = vpop.f32.mrb[183].mxu1 }
 0x295   : > { %3187 = vst.msk [vmem:[%s5224_s14 + $0xac] sm:$0xf] %vm3143_vm4, %v3671_v44  ;;  %v2916_v14 = vadd.f32 %v5214_v28, %v2864_v2 }
 0x297   : > { %v2961_v48 = vmax.f32 %v2916_v14, 0.0 }
 0x299   : > { %v3672_v33 = vpack.c.bf16 %v2961_v48, %v2961_v48 }
 0x29b   : > { %3188 = vst.msk [vmem:[%s5224_s14 + $0xb0] sm:$0xf] %vm3143_vm4, %v3672_v33 }
 0x29c PF: > { %p10_p9 = scmp.ge.s32.totalorder %s4344_s16, 7   ;;  %s5670_s12 = smov %s4298_s13 }
 0x29d   : > { %s5671_s13 = smov %s4353_s19  ;;  %s5672_s14 = smov %s4344_s16 }
 0x29e   :  { %12 = sbr.rel (!%p10_p9) target bundleno = 2 (0x2), region = 111 }

// kernel: cnn_forward.4
= control target key start
LH: loop header
LB: loop body
LE: loop exit
PB: predicated region body
PF: predicated region fallthrough
CT: control target
= control target key end

     0   :  { %s2029_s12 = smov 0   ;;  %s2031_s13 = smov 0   ;;  %s2484_s0 = inlined_call_operand.vmem [shape: bf16[4,392,288], index: 0, kind: input, shape index: {}]   ;;  %s2485_s1 = inlined_call_operand.vmem [shape: bf16[288,32], index: 1, kind: input, shape index: {}]   ;;  %s2486_s2 = inlined_call_operand.vmem [shape: f32[1,32], index: 2, kind: input, shape index: {}]   ;;  %s2487_s3 = inlined_call_operand.vmem [shape: bf16[392,32], index: 3, kind: output, shape index: {}]  }
   0x1   :  { %s2033_s14 = smov 0  }
   0x2 LB: > { %s1443_s15 = sadd.s32 4294967295, %s2007_s14   ;;  %s2046_s16 = sadd.s32 1, %s2007_s14   ;;  %s2007_s14 = sphi %s2033_s14, %s2490_s14   ;;  %s2003_s13 = sphi %s2031_s13, %s2489_s13   ;;  %s1999_s12 = sphi %s2029_s12, %s2488_s12  }
   0x3   : > { %s17_s17 = ssub.s32 %s2007_s14, %s2046_s16  ;;  %s20_s18 = sadd.s32 1, %s2003_s13 }
   0x4   : > { %p18_p0 = scmp.eq.s32.totalorder %s17_s17, 0  ;;  %p27_p1 = scmp.ne.s32.totalorder %s2003_s13, %s1999_s12 }
   0x5   : > { %p28_p2 = scmp.eq.s32.totalorder %s2007_s14, 0  ;;  %p1446_p4 = scmp.ge.s32.totalorder %s2007_s14, 7 }
   0x6   : > { %s2055_s19 = scalar_select %p18_p0, %s2003_s13, %s20_s18  }
   0x7   : > { %p29_p3 = por %p28_p2, %p27_p1  ;;  %127 = sbr.rel (%p1446_p4) target bundleno = 52 (0x34), region = 24 }
   0xe   : > { %130 = sbr.rel (!%p29_p3) target bundleno = 52 (0x34), region = 28  ;;  %s132_s20 = sand.u32 (%p29_p3), 1, %s2003_s13  }
   0xf   : > { %s1879_s21 = smul.u32 (%p29_p3), 336, %s132_s20 }
  0x10   : > { %s1882_s22 = smul.u32 (%p29_p3), 84, %s2007_s14 }
  0x11   : > { %s2068_s26 = scalar_lea.vmem (%p29_p3), [#allocation2], %s1879_s21 }
  0x12   : > { %s2063_s25 = scalar_lea.vmem (%p29_p3), %s2484_s0, %s1882_s22 }
  0x13   : > { %v153_v0 = vld [vmem:[%s2063_s25] sm:$0xff] (%p29_p3)  ;;  %v155_v1 = vld [vmem:[%s2063_s25 + $0xc] sm:$0xff] (%p29_p3)  ;;  %v157_v2 = vld [vmem:[%s2063_s25 + $0x18] sm:$0xff] (%p29_p3) }
  0x14   : > { %154 = vst [vmem:[%s2068_s26] sm:$0xff] (%p29_p3), %v153_v0  ;;  %156 = vst [vmem:[%s2068_s26 + $0xc] sm:$0xff] (%p29_p3), %v155_v1  ;;  %v159_v3 = vld [vmem:[%s2063_s25 + $0x24] sm:$0xff] (%p29_p3)  ;;  %v161_v4 = vld [vmem:[%s2063_s25 + $0x30] sm:$0xff] (%p29_p3) }
  0x15   : > { %158 = vst [vmem:[%s2068_s26 + $0x18] sm:$0xff] %v157_v2  ;;  %v163_v5 = vld [vmem:[%s2063_s25 + $0x3c] sm:$0xff]  ;;  %160 = vst [vmem:[%s2068_s26 + $0x24] sm:$0xff] %v159_v3  ;;  %v165_v6 = vld [vmem:[%s2063_s25 + $0x48] sm:$0xff] }
  0x16   : > { %162 = vst [vmem:[%s2068_s26 + $0x30] sm:$0xff] %v161_v4  ;;  %164 = vst [vmem:[%s2068_s26 + $0x3c] sm:$0xff] %v163_v5  ;;  %v167_v7 = vld [vmem:[%s2063_s25 + $0x24c] sm:$0xff]  ;;  %v169_v8 = vld [vmem:[%s2063_s25 + $0x258] sm:$0xff] }
  0x17   : > { %166 = vst [vmem:[%s2068_s26 + $0x48] sm:$0xff] %v165_v6  ;;  %168 = vst [vmem:[%s2068_s26 + $0x54] sm:$0xff] %v167_v7  ;;  %v171_v9 = vld [vmem:[%s2063_s25 + $0x264] sm:$0xff]  ;;  %v173_v10 = vld [vmem:[%s2063_s25 + $0x270] sm:$0xff] }
  0x18   : > { %170 = vst [vmem:[%s2068_s26 + $0x60] sm:$0xff] %v169_v8  ;;  %v175_v11 = vld [vmem:[%s2063_s25 + $0x27c] sm:$0xff]  ;;  %172 = vst [vmem:[%s2068_s26 + $0x6c] sm:$0xff] %v171_v9  ;;  %v177_v12 = vld [vmem:[%s2063_s25 + $0x288] sm:$0xff] }
  0x19   : > { %174 = vst [vmem:[%s2068_s26 + $0x78] sm:$0xff] %v173_v10  ;;  %176 = vst [vmem:[%s2068_s26 + $0x84] sm:$0xff] %v175_v11  ;;  %v179_v13 = vld [vmem:[%s2063_s25 + $0x294] sm:$0xff]  ;;  %v183_v15 = vld [vmem:[%s2063_s25 + $0x4a4] sm:$0xff] }
  0x1a   : > { %v181_v14 = vld [vmem:[%s2063_s25 + $0x498] sm:$0xff]  ;;  %178 = vst [vmem:[%s2068_s26 + $0x90] sm:$0xff] %v177_v12  ;;  %180 = vst [vmem:[%s2068_s26 + $0x9c] sm:$0xff] %v179_v13  ;;  %v185_v16 = vld [vmem:[%s2063_s25 + $0x4b0] sm:$0xff] }
  0x1b   : > { %182 = vst [vmem:[%s2068_s26 + $0xa8] sm:$0xff] %v181_v14  ;;  %v187_v17 = vld [vmem:[%s2063_s25 + $0x4bc] sm:$0xff]  ;;  %184 = vst [vmem:[%s2068_s26 + $0xb4] sm:$0xff] %v183_v15  ;;  %v189_v18 = vld [vmem:[%s2063_s25 + $0x4c8] sm:$0xff] }
  0x1c   : > { %186 = vst [vmem:[%s2068_s26 + $0xc0] sm:$0xff] %v185_v16  ;;  %188 = vst [vmem:[%s2068_s26 + $0xcc] sm:$0xff] %v187_v17  ;;  %v191_v19 = vld [vmem:[%s2063_s25 + $0x4d4] sm:$0xff]  ;;  %v193_v20 = vld [vmem:[%s2063_s25 + $0x4e0] sm:$0xff] }
  0x1d   : > { %190 = vst [vmem:[%s2068_s26 + $0xd8] sm:$0xff] %v189_v18  ;;  %192 = vst [vmem:[%s2068_s26 + $0xe4] sm:$0xff] %v191_v19  ;;  %v195_v21 = vld [vmem:[%s2063_s25 + $0x6e4] sm:$0xff]  ;;  %v197_v22 = vld [vmem:[%s2063_s25 + $0x6f0] sm:$0xff] }
  0x1e   : > { %194 = vst [vmem:[%s2068_s26 + $0xf0] sm:$0xff] %v193_v20  ;;  %v199_v23 = vld [vmem:[%s2063_s25 + $0x6fc] sm:$0xff]  ;;  %196 = vst [vmem:[%s2068_s26 + $0xfc] sm:$0xff] %v195_v21  ;;  %v201_v24 = vld [vmem:[%s2063_s25 + $0x708] sm:$0xff] }
  0x1f   : > { %198 = vst [vmem:[%s2068_s26 + $0x108] sm:$0xff] %v197_v22  ;;  %200 = vst [vmem:[%s2068_s26 + $0x114] sm:$0xff] %v199_v23  ;;  %v203_v25 = vld [vmem:[%s2063_s25 + $0x714] sm:$0xff]  ;;  %v205_v26 = vld [vmem:[%s2063_s25 + $0x720] sm:$0xff] }
  0x20   : > { %202 = vst [vmem:[%s2068_s26 + $0x120] sm:$0xff] %v201_v24  ;;  %204 = vst [vmem:[%s2068_s26 + $0x12c] sm:$0xff] %v203_v25  ;;  %v207_v27 = vld [vmem:[%s2063_s25 + $0x72c] sm:$0xff]  ;;  %v1448_v28 = vld [vmem:[%s2063_s25 + $0x8] sm:$0xf] }
  0x21   : > { %206 = vst [vmem:[%s2068_s26 + $0x138] sm:$0xff] %v205_v26  ;;  %v1450_v29 = vld [vmem:[%s2063_s25 + $0x14] sm:$0xf]  ;;  %208 = vst [vmem:[%s2068_s26 + $0x144] sm:$0xff] %v207_v27  ;;  %v1452_v30 = vld [vmem:[%s2063_s25 + $0x20] sm:$0xf] }
  0x22   : > { %1449 = vst [vmem:[%s2068_s26 + $0x8] sm:$0xf] %v1448_v28  ;;  %1451 = vst [vmem:[%s2068_s26 + $0x14] sm:$0xf] %v1450_v29  ;;  %v1454_v31 = vld [vmem:[%s2063_s25 + $0x2c] sm:$0xf] }
  0x23   : > { %v1456_v32 = vld [vmem:[%s2063_s25 + $0x38] sm:$0xf]  ;;  %1453 = vst [vmem:[%s2068_s26 + $0x20] sm:$0xf] %v1452_v30  ;;  %1455 = vst [vmem:[%s2068_s26 + $0x2c] sm:$0xf] %v1454_v31 }
  0x24   : > { %1457 = vst [vmem:[%s2068_s26 + $0x38] sm:$0xf] %v1456_v32  ;;  %v1458_v33 = vld [vmem:[%s2063_s25 + $0x44] sm:$0xf]  ;;  %v1460_v34 = vld [vmem:[%s2063_s25 + $0x50] sm:$0xf] }
  0x25   : > { %v1462_v35 = vld [vmem:[%s2063_s25 + $0x254] sm:$0xf]  ;;  %1459 = vst [vmem:[%s2068_s26 + $0x44] sm:$0xf] %v1458_v33  ;;  %1461 = vst [vmem:[%s2068_s26 + $0x50] sm:$0xf] %v1460_v34 }
  0x26   : > { %1463 = vst [vmem:[%s2068_s26 + $0x5c] sm:$0xf] %v1462_v35  ;;  %v1464_v36 = vld [vmem:[%s2063_s25 + $0x260] sm:$0xf]  ;;  %v1466_v37 = vld [vmem:[%s2063_s25 + $0x26c] sm:$0xf] }
  0x27   : > { %v1468_v38 = vld [vmem:[%s2063_s25 + $0x278] sm:$0xf]  ;;  %1465 = vst [vmem:[%s2068_s26 + $0x68] sm:$0xf] %v1464_v36  ;;  %1467 = vst [vmem:[%s2068_s26 + $0x74] sm:$0xf] %v1466_v37 }
  0x28   : > { %1469 = vst [vmem:[%s2068_s26 + $0x80] sm:$0xf] %v1468_v38  ;;  %v1470_v39 = vld [vmem:[%s2063_s25 + $0x284] sm:$0xf]  ;;  %v1472_v40 = vld [vmem:[%s2063_s25 + $0x290] sm:$0xf] }
  0x29   : > { %v1474_v41 = vld [vmem:[%s2063_s25 + $0x29c] sm:$0xf]  ;;  %1471 = vst [vmem:[%s2068_s26 + $0x8c] sm:$0xf] %v1470_v39  ;;  %1473 = vst [vmem:[%s2068_s26 + $0x98] sm:$0xf] %v1472_v40 }
  0x2a   : > { %1475 = vst [vmem:[%s2068_s26 + $0xa4] sm:$0xf] %v1474_v41  ;;  %v1476_v42 = vld [vmem:[%s2063_s25 + $0x4a0] sm:$0xf]  ;;  %v1478_v43 = vld [vmem:[%s2063_s25 + $0x4ac] sm:$0xf] }
  0x2b   : > { %v1480_v44 = vld [vmem:[%s2063_s25 + $0x4b8] sm:$0xf]  ;;  %1477 = vst [vmem:[%s2068_s26 + $0xb0] sm:$0xf] %v1476_v42  ;;  %1479 = vst [vmem:[%s2068_s26 + $0xbc] sm:$0xf] %v1478_v43 }
  0x2c   : > { %1481 = vst [vmem:[%s2068_s26 + $0xc8] sm:$0xf] %v1480_v44  ;;  %v1482_v45 = vld [vmem:[%s2063_s25 + $0x4c4] sm:$0xf]  ;;  %v1484_v46 = vld [vmem:[%s2063_s25 + $0x4d0] sm:$0xf] }
  0x2d   : > { %v1486_v47 = vld [vmem:[%s2063_s25 + $0x4dc] sm:$0xf]  ;;  %1483 = vst [vmem:[%s2068_s26 + $0xd4] sm:$0xf] %v1482_v45  ;;  %1485 = vst [vmem:[%s2068_s26 + $0xe0] sm:$0xf] %v1484_v46 }
  0x2e   : > { %1487 = vst [vmem:[%s2068_s26 + $0xec] sm:$0xf] %v1486_v47  ;;  %v1488_v48 = vld [vmem:[%s2063_s25 + $0x4e8] sm:$0xf]  ;;  %v1490_v49 = vld [vmem:[%s2063_s25 + $0x6ec] sm:$0xf] }
  0x2f   : > { %v1492_v50 = vld [vmem:[%s2063_s25 + $0x6f8] sm:$0xf]  ;;  %1489 = vst [vmem:[%s2068_s26 + $0xf8] sm:$0xf] %v1488_v48  ;;  %1491 = vst [vmem:[%s2068_s26 + $0x104] sm:$0xf] %v1490_v49 }
  0x30   : > { %1493 = vst [vmem:[%s2068_s26 + $0x110] sm:$0xf] %v1492_v50  ;;  %v1494_v51 = vld [vmem:[%s2063_s25 + $0x704] sm:$0xf]  ;;  %v1496_v52 = vld [vmem:[%s2063_s25 + $0x710] sm:$0xf] }
  0x31   : > { %v1498_v53 = vld [vmem:[%s2063_s25 + $0x71c] sm:$0xf]  ;;  %1495 = vst [vmem:[%s2068_s26 + $0x11c] sm:$0xf] %v1494_v51  ;;  %1497 = vst [vmem:[%s2068_s26 + $0x128] sm:$0xf] %v1496_v52 }
  0x32   : > { %1499 = vst [vmem:[%s2068_s26 + $0x134] sm:$0xf] %v1498_v53  ;;  %v1500_v54 = vld [vmem:[%s2063_s25 + $0x728] sm:$0xf]  ;;  %v1502_v55 = vld [vmem:[%s2063_s25 + $0x734] sm:$0xf] }
  0x33   : > { %1501 = vst [vmem:[%s2068_s26 + $0x140] sm:$0xf] %v1500_v54  ;;  %1503 = vst [vmem:[%s2068_s26 + $0x14c] sm:$0xf] %v1502_v55 }
  0x34 PF: > { %p1504_p5 = scmp.ge.s32.totalorder %s2007_s14, 1  ;;  %p276_p6 = scmp.lt.s32.totalorder %s2007_s14, 8 }
  0x36   : > { %p277_p7 = pnand %p1504_p5, %p276_p6 }
  0x37   : > { %v2184_v56 = vld [vmem:[%s2485_s1 + $0x40] sm:$0xff] (!%p277_p7)   ;;  %v2196_v58 = vld [vmem:[%s2485_s1 + $0x48] sm:$0xff] (!%p277_p7)   ;;  %v2210_v60 = vld [vmem:[%s2485_s1 + $0x50] sm:$0xff] (!%p277_p7)   ;;  %s283_s17 = sand.u32 (!%p277_p7), 1, %s1999_s12   ;;  %vm527_vm0 = vcmask (!%p277_p7), 261120   ;;  %s307_s23 = smul.u32 (!%p277_p7), 7, %s1443_s15 }
  0x38   : > { %280 = sbr.rel (%p277_p7) target bundleno = 402 (0x192), region = 54  ;;  %v2189_v57 = vld [vmem:[%s2485_s1] sm:$0xff] (!%p277_p7)   ;;  %1647 = vmatprep.subr.bf16.mxu0 (!%p277_p7), %v2184_v56  ;;  %1693 = vmatprep.subr.bf16.mxu1 (!%p277_p7), %v2184_v56  ;;  %v2203_v59 = vld [vmem:[%s2485_s1 + $0x8] sm:$0xff] (!%p277_p7)   ;;  %v2217_v61 = vld [vmem:[%s2485_s1 + $0x10] sm:$0xff] (!%p277_p7)   ;;  %vm1369_vm1 = vcmask (!%p277_p7), 257024  }
  0x39   : > { %1648 = vmatpush3.bf16.msra.mxu0 (!%p277_p7), %v2189_v57  ;;  %1694 = vmatpush3.bf16.msra.mxu1 (!%p277_p7), %v2189_v57  ;;  %v2225_v62 = vld [vmem:[%s2485_s1 + $0x58] sm:$0xff] (!%p277_p7)   ;;  %s1881_s21 = smul.u32 (!%p277_p7), 336, %s283_s17  ;;  %v2239_v0 = vld [vmem:[%s2485_s1 + $0x60] sm:$0xff] (!%p277_p7)   ;;  %v2253_v2 = vld [vmem:[%s2485_s1 + $0x68] sm:$0xff] (!%p277_p7)   ;;  %p308_p8 = scmp.lt.s32.totalorder (!%p277_p7), %s307_s23, 48 }
  0x3a   : > { %1649 = vmatprep.subr.bf16.mxu0 (!%p277_p7), %v2196_v58  ;;  %1695 = vmatprep.subr.bf16.mxu1 (!%p277_p7), %v2196_v58  ;;  %v2232_v63 = vld [vmem:[%s2485_s1 + $0x18] sm:$0xff] (!%p277_p7)   ;;  %v2246_v1 = vld [vmem:[%s2485_s1 + $0x20] sm:$0xff] (!%p277_p7)   ;;  %v2264_v5 = vld [vmem:[%s2485_s1 + $0x28] sm:$0xff] (!%p277_p7)  }
  0x3b   : > { %s2255_s29 = scalar_lea.vmem (!%p277_p7), [#allocation2], %s1881_s21  ;;  %v2271_v6 = vld [vmem:[%s2485_s1 + $0x70] sm:$0xff] (!%p277_p7)   ;;  %v2285_v8 = vld [vmem:[%s2485_s1 + $0x78] sm:$0xff] (!%p277_p7)   ;;  %v2299_v10 = vld [vmem:[%s2485_s1 + $0x80] sm:$0xff] (!%p277_p7)  }
  0x3c   : > { %v1925_v3 = vld [vmem:[%s2255_s29 + $0x4] ss:$12 sps:$4 sm:$0xff] (!%p277_p7)   ;;  %v2292_v9 = vld [vmem:[%s2485_s1 + $0x38] sm:$0xff] (!%p277_p7)   ;;  %v1926_v12 = vld [vmem:[%s2255_s29 + $0x54] ss:$12 sps:$4 sm:$0xff] (!%p277_p7)  }
  0x3d   : > { %1650 = vmatpush3.bf16.msra.mxu0 (!%p277_p7), %v2203_v59  ;;  %1696 = vmatpush3.bf16.msra.mxu1 (!%p277_p7), %v2203_v59  ;;  %v1928_v4 = vld [vmem:[%s2255_s29 + $0x58] ss:$12 sps:$4 sm:$0xff] (!%p277_p7)   ;;  %v1923_v11 = vld [vmem:[%s2255_s29] ss:$12 sps:$4 sm:$0xff] (!%p277_p7)   ;;  %v1930_v13 = vld [vmem:[%s2255_s29 + $0x1c] ss:$12 sps:$4 sm:$0xff] (!%p277_p7)  }
  0x3e   : > { %1651 = vmatprep.subr.bf16.mxu0 (!%p277_p7), %v2210_v60  ;;  %1697 = vmatprep.subr.bf16.mxu1 (!%p277_p7), %v2210_v60  ;;  %v2278_v7 = vld [vmem:[%s2485_s1 + $0x30] sm:$0xff] (!%p277_p7)   ;;  %v2312_v15 = vld [vmem:[%s2485_s1 + $0x88] sm:$0xff] (!%p277_p7)  }
  0x3f   : > { %572 = vmatprep.mubr.bf16.mxu0 %v1925_v3  ;;  %782 = vmatprep.mubr.bf16.mxu1 %v1928_v4  ;;  %v1932_v14 = vld [vmem:[%s2255_s29 + $0x70] ss:$12 sps:$4 sm:$0xff]   ;;  %v1934_v16 = vld [vmem:[%s2255_s29 + $0x18] ss:$12 sps:$4 sm:$0xff]   ;;  %v1936_v18 = vld [vmem:[%s2255_s29 + $0x34] ss:$12 sps:$4 sm:$0xff]  }
  0x40   : > { %v1935_v17 = vld [vmem:[%s2255_s29 + $0x6c] ss:$12 sps:$4 sm:$0xff]   ;;  %v1938_v19 = vld [vmem:[%s2255_s29 + $0x88] ss:$12 sps:$4 sm:$0xff]   ;;  %v1552_v21 = vld [vmem:[%s2255_s29 + $0x9c] sm:$0xff]  ;;  %s2492_s23 = smov (!%p308_p8, %s307_s23), 48 }
  0x41   : > { %1652 = vmatpush3.bf16.msra.mxu0 %v2217_v61  ;;  %1698 = vmatpush3.bf16.msra.mxu1 %v2217_v61  ;;  %v362_v20 = vld [vmem:[%s2255_s29 + $0x48] sm:$0xff]  ;;  %v1940_v22 = vld [vmem:[%s2255_s29 + $0x30] ss:$12 sps:$4 sm:$0xff]   ;;  %v1564_v25 = vcombine.high %v1552_v21, %v1552_v21  ;;  %v1563_v27 = vcombine.low %v1552_v21, %v1552_v21  ;;  %v1952_v32 = vld [vmem:[%s2255_s29 + $0x38] ss:$12 sps:$4 sm:$0xff]   ;;  %s1505_s12 = sshll.u32 %s2492_s23, 2 }
  0x42   : > { %1653 = vmatprep.subr.bf16.mxu0 %v2225_v62  ;;  %1699 = vmatprep.subr.bf16.mxu1 %v2225_v62  ;;  %v1942_v23 = vld [vmem:[%s2255_s29 + $0x84] ss:$12 sps:$4 sm:$0xff]   ;;  %v1516_v24 = vcombine.high %v362_v20, %v362_v20  ;;  %v1515_v26 = vcombine.low %v362_v20, %v362_v20  ;;  %v1947_v28 = vld [vmem:[%s2255_s29 + $0x8] ss:$12 sps:$4 sm:$0xff]   ;;  %v1950_v29 = vld [vmem:[%s2255_s29 + $0xac] ss:$12 sps:$4 sm:$0xff]   ;;  %s2457_s26 = scalar_lea.vmem %s2487_s3, %s1505_s12 }
  0x43   : > { %v1948_v30 = vld [vmem:[%s2255_s29 + $0xa8] ss:$12 sps:$4 sm:$0xff]   ;;  %v1951_v31 = vld [vmem:[%s2255_s29 + $0x20] ss:$12 sps:$4 sm:$0xff]   ;;  %v1953_v33 = vld [vmem:[%s2255_s29 + $0xc4] ss:$12 sps:$4 sm:$0xff]  }
  0x44   : > { %v1955_v34 = vld [vmem:[%s2255_s29 + $0x50] ss:$0 sps:$4 sm:$0xff]   ;;  %v1956_v35 = vld [vmem:[%s2255_s29 + $0xc0] ss:$12 sps:$4 sm:$0xff]   ;;  %v1957_v36 = vld [vmem:[%s2255_s29 + $0x5c] ss:$12 sps:$4 sm:$0xff]  }
  0x45   : > { %1654 = vmatpush3.bf16.msra.mxu0 %v2232_v63  ;;  %1700 = vmatpush3.bf16.msra.mxu1 %v2232_v63  ;;  %v1958_v37 = vld [vmem:[%s2255_s29 + $0xdc] ss:$12 sps:$4 sm:$0xff]   ;;  %v1960_v38 = vld [vmem:[%s2255_s29 + $0x74] ss:$12 sps:$4 sm:$0xff]   ;;  %v1961_v39 = vld [vmem:[%s2255_s29 + $0xd8] ss:$12 sps:$4 sm:$0xff]  }
  0x46   : > { %1655 = vmatprep.subr.bf16.mxu0 %v2239_v0  ;;  %1701 = vmatprep.subr.bf16.mxu1 %v2239_v0  ;;  %v1582_v40 = vld [vmem:[%s2255_s29 + $0xf0] sm:$0xff]  ;;  %v1962_v41 = vld [vmem:[%s2255_s29 + $0x8c] ss:$12 sps:$4 sm:$0xff]   ;;  %v1964_v43 = vld [vmem:[%s2255_s29 + $0xa4] ss:$0 sps:$4 sm:$0xff]  }
  0x47   : > { %v1594_v42 = vcombine.high %v1582_v40, %v1582_v40  ;;  %v1593_v44 = vcombine.low %v1582_v40, %v1582_v40  ;;  %v1966_v45 = vld [vmem:[%s2255_s29 + $0xb0] ss:$12 sps:$4 sm:$0xff]   ;;  %v1969_v46 = vld [vmem:[%s2255_s29 + $0x100] ss:$12 sps:$4 sm:$0xff]   ;;  %v1970_v48 = vld [vmem:[%s2255_s29 + $0xc8] ss:$12 sps:$4 sm:$0xff]  }
  0x48   : > { %v1967_v47 = vld [vmem:[%s2255_s29 + $0xfc] ss:$12 sps:$4 sm:$0xff]   ;;  %v1971_v49 = vld [vmem:[%s2255_s29 + $0xe0] ss:$12 sps:$4 sm:$0xff]   ;;  %v1972_v50 = vld [vmem:[%s2255_s29 + $0x118] ss:$12 sps:$4 sm:$0xff]  }
  0x49   : > { %1656 = vmatpush3.bf16.msra.mxu0 %v2246_v1  ;;  %1702 = vmatpush3.bf16.msra.mxu1 %v2246_v1  ;;  %v1974_v51 = vld [vmem:[%s2255_s29 + $0xf8] ss:$0 sps:$4 sm:$0xff]   ;;  %v1975_v52 = vld [vmem:[%s2255_s29 + $0x114] ss:$12 sps:$4 sm:$0xff]   ;;  %v1976_v53 = vld [vmem:[%s2255_s29 + $0x130] ss:$12 sps:$4 sm:$0xff]  }
  0x4a   : > { %1657 = vmatprep.subr.bf16.mxu0 %v2253_v2  ;;  %1703 = vmatprep.subr.bf16.mxu1 %v2253_v2  ;;  %v1978_v54 = vld [vmem:[%s2255_s29 + $0x104] ss:$12 sps:$4 sm:$0xff]  }
  0x4b   : > { %v1612_v55 = vld [vmem:[%s2255_s29 + $0x144] sm:$0xff] }
  0x4d   : > { %1658 = vmatpush3.bf16.msra.mxu0 %v2264_v5  ;;  %1704 = vmatpush3.bf16.msra.mxu1 %v2264_v5 }
  0x4e   : > { %1659 = vmatprep.subr.bf16.mxu0 %v2271_v6  ;;  %1705 = vmatprep.subr.bf16.mxu1 %v2271_v6 }
  0x51   : > { %1660 = vmatpush3.bf16.msra.mxu0 %v2278_v7  ;;  %1706 = vmatpush3.bf16.msra.mxu1 %v2278_v7 }
  0x52   : > { %1661 = vmatprep.subr.bf16.mxu0 %v2285_v8  ;;  %1707 = vmatprep.subr.bf16.mxu1 %v2285_v8 }
  0x55   : > { %1662 = vmatpush3.bf16.msra.mxu0 %v2292_v9  ;;  %1708 = vmatpush3.bf16.msra.mxu1 %v2292_v9 }
  0x56   : > { %1831 = vmatprep.subr.bf16.mxu0 %v2299_v10  ;;  %1739 = vmatprep.subr.bf16.mxu1 %v2184_v56 }
  0x58   : > { %573 = vmatmul.mubr.bf16.vlgmr.msra.gmra.mrb[0].mxu0 %v1923_v11  ;;  %783 = vmatmul.mubr.bf16.vlgmr.msra.gmra.mrb[0].mxu1 %v1926_v12 }
  0x59   : > { %1832 = vmatpush3.bf16.msra.mxu0 %v2299_v10  ;;  %1740 = vmatpush3.bf16.msra.mxu1 %v2189_v57 }
  0x5a   : > { %1741 = vmatprep.subr.bf16.mxu1 %v2196_v58  ;;  %580 = vmatprep.mubr.bf16.mxu0 %v1930_v13 }
  0x5b   : > { %790 = vmatprep.mubr.bf16.mxu1 %v1932_v14  ;;  %1833 = vmatprep.subr.bf16.mxu0 %v2312_v15 }
  0x5d   : > { %1742 = vmatpush3.bf16.msra.mxu1 %v2203_v59  ;;  %1834 = vmatpush3.bf16.msra.mxu0 %v2312_v15 }
  0x5e   : > { %1743 = vmatprep.subr.bf16.mxu1 %v2210_v60  ;;  %1843 = vmatprep.subr.bf16.mxu0 %v2299_v10 }
  0x60   : > { %581 = vmatmul.mubr.bf16.gmra.mrb[4].mxu0 %v1934_v16  ;;  %791 = vmatmul.mubr.bf16.gmra.mrb[4].mxu1 %v1935_v17 }
  0x61   : > { %1744 = vmatpush3.bf16.msra.mxu1 %v2217_v61  ;;  %588 = vmatprep.mubr.bf16.mxu0 %v1936_v18 }
  0x62   : > { %1745 = vmatprep.subr.bf16.mxu1 %v2225_v62  ;;  %798 = vmatprep.mubr.bf16.mxu1 %v1938_v19 }
  0x65   : > { %1746 = vmatpush3.bf16.msra.mxu1 %v2232_v63 }
  0x66   : > { %1747 = vmatprep.subr.bf16.mxu1 %v2239_v0 }
  0x68   : > { %589 = vmatmul.mubr.bf16.gmra.mrb[8].mxu0 %v1940_v22  ;;  %799 = vmatmul.mubr.bf16.gmra.mrb[8].mxu1 %v1942_v23 }
  0x69   : > { %1748 = vmatpush3.bf16.msra.mxu1 %v2246_v1  ;;  %596 = vmatprep.mubr.bf16.mxu0 %v1516_v24 }
  0x6a   : > { %1749 = vmatprep.subr.bf16.mxu1 %v2253_v2  ;;  %806 = vmatprep.mubr.bf16.mxu1 %v1564_v25 }
  0x6d   : > { %1750 = vmatpush3.bf16.msra.mxu1 %v2264_v5 }
  0x6e   : > { %1751 = vmatprep.subr.bf16.mxu1 %v2271_v6 }
  0x70   : > { %597 = vmatmul.mubr.bf16.gmra.mrb[12].mxu0 %v1515_v26  ;;  %807 = vmatmul.mubr.bf16.gmra.mrb[12].mxu1 %v1563_v27 }
  0x71   : > { %1752 = vmatpush3.bf16.msra.mxu1 %v2278_v7  ;;  %1835 = vmatprep.mubr.msk.bf16.mxu0 %vm527_vm0, %v1947_v28 }
  0x72   : > { %1753 = vmatprep.subr.bf16.mxu1 %v2285_v8  ;;  %999 = vmatprep.mubr.bf16.mxu1 %v1950_v29 }
  0x75   : > { %1754 = vmatpush3.bf16.msra.mxu1 %v2292_v9 }
  0x76   : > { %1785 = vmatprep.subr.bf16.mxu1 %v2184_v56  ;;  %v1979_v56 = vld [vmem:[%s2255_s29 + $0x12c] ss:$12 sps:$4 sm:$0xff]  }
  0x78   : > { %1836 = vmatmul.mubr.msk.bf16.vlgmr.msra.gmra.mrb[16].mxu0 %vm527_vm0, %v1951_v31  ;;  %1000 = vmatmul.mubr.bf16.vlgmr.msra.gmra.mrb[16].mxu1 %v1948_v30 }
  0x79   : > { %1844 = vmatpush3.bf16.msra.mxu0 %v2299_v10  ;;  %1786 = vmatpush3.bf16.msra.mxu1 %v2189_v57  ;;  %v1980_v57 = vld [vmem:[%s2255_s29 + $0x11c] ss:$12 sps:$4 sm:$0xff]  }
  0x7a   : > { %1787 = vmatprep.subr.bf16.mxu1 %v2196_v58  ;;  %1839 = vmatprep.mubr.msk.bf16.mxu0 %vm527_vm0, %v1952_v32  ;;  %v1624_v58 = vcombine.high %v1612_v55, %v1612_v55 }
  0x7b   : > { %1007 = vmatprep.mubr.bf16.mxu1 %v1953_v33  ;;  %1845 = vmatprep.subr.bf16.mxu0 %v2312_v15 }
  0x7d   : > { %1788 = vmatpush3.bf16.msra.mxu1 %v2203_v59  ;;  %1846 = vmatpush3.bf16.msra.mxu0 %v2312_v15  ;;  %v1982_v59 = vld [vmem:[%s2255_s29 + $0x134] ss:$12 sps:$4 sm:$0xff]  }
  0x7e   : > { %1789 = vmatprep.subr.bf16.mxu1 %v2210_v60  ;;  %1855 = vmatprep.subr.bf16.mxu0 %v2299_v10  ;;  %v1623_v60 = vcombine.low %v1612_v55, %v1612_v55 }
  0x80   : > { %1840 = vmatmul.mubr.msk.bf16.gmra.mrb[20].mxu0 %vm527_vm0, %v1955_v34  ;;  %1008 = vmatmul.mubr.bf16.gmra.mrb[20].mxu1 %v1956_v35 }
  0x81   : > { %1790 = vmatpush3.bf16.msra.mxu1 %v2217_v61  ;;  %1847 = vmatprep.mubr.msk.bf16.mxu0 %vm527_vm0, %v1957_v36  ;;  %v1984_v61 = vld [vmem:[%s2255_s29 + $0x14c] ss:$0 sps:$4 sm:$0xff]  }
  0x82   : > { %1791 = vmatprep.subr.bf16.mxu1 %v2225_v62  ;;  %1015 = vmatprep.mubr.bf16.mxu1 %v1958_v37 }
  0x85   : > { %1792 = vmatpush3.bf16.msra.mxu1 %v2232_v63 }
  0x86   : > { %1793 = vmatprep.subr.bf16.mxu1 %v2239_v0 }
  0x88   : > { %1848 = vmatmul.mubr.msk.bf16.vlgmr.msra.gmra.mrb[24].mxu0 %vm527_vm0, %v1960_v38  ;;  %1016 = vmatmul.mubr.bf16.gmra.mrb[24].mxu1 %v1961_v39 }
  0x89   : > { %1856 = vmatpush3.bf16.msra.mxu0 %v2299_v10  ;;  %1794 = vmatpush3.bf16.msra.mxu1 %v2246_v1 }
  0x8a   : > { %1795 = vmatprep.subr.bf16.mxu1 %v2253_v2  ;;  %1851 = vmatprep.mubr.msk.bf16.mxu0 %vm527_vm0, %v1962_v41 }
  0x8b   : > { %1023 = vmatprep.mubr.bf16.mxu1 %v1594_v42  ;;  %1857 = vmatprep.subr.bf16.mxu0 %v2312_v15 }
  0x8d   : > { %1796 = vmatpush3.bf16.msra.mxu1 %v2264_v5  ;;  %1858 = vmatpush3.bf16.msra.mxu0 %v2312_v15 }
  0x8e   : > { %1797 = vmatprep.subr.bf16.mxu1 %v2271_v6  ;;  %1867 = vmatprep.subr.bf16.mxu0 %v2299_v10 }
  0x90   : > { %1852 = vmatmul.mubr.msk.bf16.gmra.mrb[28].mxu0 %vm527_vm0, %v1964_v43  ;;  %1024 = vmatmul.mubr.bf16.gmra.mrb[28].mxu1 %v1593_v44 }
  0x91   : > { %1798 = vmatpush3.bf16.msra.mxu1 %v2278_v7  ;;  %1859 = vmatprep.mubr.msk.bf16.mxu0 %vm527_vm0, %v1966_v45 }
  0x92   : > { %1799 = vmatprep.subr.bf16.mxu1 %v2285_v8  ;;  %1216 = vmatprep.mubr.bf16.mxu1 %v1969_v46 }
  0x95   : > { %1800 = vmatpush3.bf16.msra.mxu1 %v2292_v9 }
  0x98   : > { %1860 = vmatmul.mubr.msk.bf16.vlgmr.msra.gmra.mrb[32].mxu0 %vm527_vm0, %v1970_v48  ;;  %1217 = vmatmul.mubr.bf16.vlgmr.msra.gmra.mrb[32].mxu1 %v1967_v47 }
  0x99   : > { %1868 = vmatpush3.bf16.msra.mxu0 %v2299_v10  ;;  %1863 = vmatprep.mubr.msk.bf16.mxu0 %vm527_vm0, %v1971_v49 }
  0x9a   : > { %1224 = vmatprep.mubr.bf16.mxu1 %v1972_v50  ;;  %1869 = vmatprep.subr.bf16.mxu0 %v2312_v15 }
  0x9d   : > { %1870 = vmatpush3.bf16.msra.mxu0 %v2312_v15 }
  0xa0   : > { %1864 = vmatmul.mubr.msk.bf16.gmra.mrb[36].mxu0 %vm527_vm0, %v1974_v51  ;;  %1225 = vmatmul.mubr.bf16.gmra.mrb[36].mxu1 %v1975_v52 }
  0xa1   : > { %1232 = vmatprep.mubr.bf16.mxu1 %v1976_v53  ;;  %1871 = vmatprep.mubr.msk.bf16.mxu0 %vm527_vm0, %v1978_v54 }
  0xa8   : > { %1233 = vmatmul.mubr.bf16.gmra.mrb[40].mxu1 %v1979_v56  ;;  %1872 = vmatmul.mubr.msk.bf16.vlgmr.msra.gmra.mrb[40].mxu0 %vm527_vm0, %v1980_v57 }
  0xa9   : > { %1240 = vmatprep.mubr.bf16.mxu1 %v1624_v58  ;;  %1875 = vmatprep.mubr.msk.bf16.mxu0 %vm527_vm0, %v1982_v59 }
  0xb0   : > { %1241 = vmatmul.mubr.bf16.gmra.mrb[44].mxu1 %v1623_v60  ;;  %1876 = vmatmul.mubr.msk.bf16.gmra.mrb[44].mxu0 %vm527_vm0, %v1984_v61 }
 0x12b   : > { %v1663_v62 = vpop.f32.mrb[0].mxu0  ;;  %v1709_v63 = vpop.f32.mrb[0].mxu1 }
 0x12c   : > { %v1664_v0 = vpop.f32.mrb[1].mxu0  ;;  %v1710_v1 = vpop.f32.mrb[1].mxu1 }
 0x12d   : > { %v1665_v2 = vadd.f32 %v1664_v0, %v1663_v62  ;;  %v2414_v3 = vadd.f32 %v1710_v1, %v1709_v63  ;;  %v1666_v4 = vpop.f32.mrb[2].mxu0  ;;  %v1712_v5 = vpop.f32.mrb[2].mxu1 }
 0x12e   : > { %v1667_v6 = vpop.f32.mrb[3].mxu0  ;;  %v1713_v7 = vpop.f32.mrb[3].mxu1 }
 0x12f   : > { %v1668_v8 = vadd.f32 %v1667_v6, %v1666_v4  ;;  %v2416_v9 = vadd.f32 %v1713_v7, %v1712_v5 }
 0x133   : > { %v1669_v10 = vpop.f32.mrb[4].mxu0  ;;  %v1715_v11 = vpop.f32.mrb[4].mxu1 }
 0x134   : > { %v1670_v12 = vpop.f32.mrb[5].mxu0  ;;  %v1716_v13 = vpop.f32.mrb[5].mxu1 }
 0x135   : > { %v1671_v14 = vadd.f32 %v1670_v12, %v1669_v10  ;;  %v1717_v15 = vadd.f32 %v1716_v13, %v1715_v11  ;;  %v1672_v16 = vpop.f32.mrb[6].mxu0  ;;  %v1718_v17 = vpop.f32.mrb[6].mxu1 }
 0x136   : > { %v1673_v18 = vpop.f32.mrb[7].mxu0  ;;  %v1719_v19 = vpop.f32.mrb[7].mxu1 }
 0x137   : > { %v1674_v20 = vadd.f32 %v1673_v18, %v1672_v16  ;;  %v1720_v21 = vadd.f32 %v1719_v19, %v1718_v17 }
 0x13b   : > { %v1675_v22 = vpop.f32.mrb[8].mxu0  ;;  %v1721_v23 = vpop.f32.mrb[8].mxu1 }
 0x13c   : > { %v1676_v24 = vpop.f32.mrb[9].mxu0  ;;  %v1722_v25 = vpop.f32.mrb[9].mxu1 }
 0x13d   : > { %v1677_v26 = vadd.f32 %v1676_v24, %v1675_v22  ;;  %v2418_v27 = vadd.f32 %v1722_v25, %v1721_v23  ;;  %v1678_v28 = vpop.f32.mrb[10].mxu0  ;;  %v1724_v29 = vpop.f32.mrb[10].mxu1 }
 0x13e   : > { %v1679_v30 = vpop.f32.mrb[11].mxu0  ;;  %v1725_v31 = vpop.f32.mrb[11].mxu1 }
 0x13f   : > { %v1680_v32 = vadd.f32 %v1679_v30, %v1678_v28  ;;  %v2420_v33 = vadd.f32 %v1725_v31, %v1724_v29 }
 0x143   : > { %v1681_v34 = vpop.f32.mrb[12].mxu0  ;;  %v1727_v35 = vpop.f32.mrb[12].mxu1 }
 0x144   : > { %v1682_v36 = vpop.f32.mrb[13].mxu0  ;;  %v1728_v37 = vpop.f32.mrb[13].mxu1 }
 0x145   : > { %v1683_v38 = vadd.f32 %v1682_v36, %v1681_v34  ;;  %v1729_v39 = vadd.f32 %v1728_v37, %v1727_v35  ;;  %v1684_v40 = vpop.f32.mrb[14].mxu0  ;;  %v1730_v41 = vpop.f32.mrb[14].mxu1 }
 0x146   : > { %v1685_v42 = vpop.f32.mrb[15].mxu0  ;;  %v1731_v43 = vpop.f32.mrb[15].mxu1 }
 0x14b   : > { %v1837_v44 = vpop.f32.mrb[16].mxu0  ;;  %v1755_v45 = vpop.f32.mrb[16].mxu1 }
 0x14c   : > { %v2422_v46 = vadd.f32 %v1837_v44, %v1671_v14  ;;  %v638_v47 = vpop.f32.mrb[17].mxu0  ;;  %v1756_v48 = vpop.f32.mrb[17].mxu1 }
 0x14d   : > { %v2424_v49 = vadd.f32 %v1665_v2, %v638_v47  ;;  %v1757_v50 = vadd.f32 %v1756_v48, %v1755_v45  ;;  %v1838_v51 = vpop.f32.mrb[18].mxu0  ;;  %v1758_v52 = vpop.f32.mrb[18].mxu1 }
 0x14e   : > { %v2426_v53 = vadd.f32 %v1838_v51, %v1674_v20  ;;  %v641_v54 = vpop.f32.mrb[19].mxu0  ;;  %v1759_v55 = vpop.f32.mrb[19].mxu1 }
 0x14f   : > { %v2428_v56 = vadd.f32 %v1668_v8, %v641_v54  ;;  %v1760_v57 = vadd.f32 %v1759_v55, %v1758_v52 }
 0x153   : > { %v1841_v58 = vpop.f32.mrb[20].mxu0  ;;  %v1761_v59 = vpop.f32.mrb[20].mxu1 }
 0x154   : > { %v2430_v60 = vadd.f32 %v1841_v58, %v1683_v38  ;;  %v654_v61 = vpop.f32.mrb[21].mxu0  ;;  %v1762_v62 = vpop.f32.mrb[21].mxu1 }
 0x155   : > { %v2432_v63 = vadd.f32 %v1677_v26, %v654_v61  ;;  %v1763_v0 = vadd.f32 %v1762_v62, %v1761_v59  ;;  %v1842_v1 = vpop.f32.mrb[22].mxu0  ;;  %v1764_v2 = vpop.f32.mrb[22].mxu1 }
 0x156   : > { %v657_v4 = vpop.f32.mrb[23].mxu0  ;;  %v1765_v5 = vpop.f32.mrb[23].mxu1 }
 0x157   : > { %v2434_v6 = vadd.f32 %v1680_v32, %v657_v4  ;;  %v1766_v7 = vadd.f32 %v1765_v5, %v1764_v2 }
 0x15b   : > { %v1849_v10 = vpop.f32.mrb[24].mxu0  ;;  %v1767_v8 = vpop.f32.mrb[24].mxu1 }
 0x15c   : > { %v857_v11 = vadd.f32 %v1849_v10, %v1717_v15  ;;  %v848_v12 = vpop.f32.mrb[25].mxu0  ;;  %v1768_v13 = vpop.f32.mrb[25].mxu1 }
 0x15d   : > { %v849_v14 = vadd.f32 %v2414_v3, %v848_v12  ;;  %v1769_v16 = vadd.f32 %v1768_v13, %v1767_v8  ;;  %v1850_v17 = vpop.f32.mrb[26].mxu0  ;;  %v1770_v18 = vpop.f32.mrb[26].mxu1 }
 0x15e   : > { %v880_v19 = vmax.f32 %v2422_v46, %v857_v11  ;;  %v860_v20 = vadd.f32 %v1850_v17, %v1720_v21  ;;  %v851_v22 = vpop.f32.mrb[27].mxu0  ;;  %v1771_v23 = vpop.f32.mrb[27].mxu1 }
 0x15f   : > { %v878_v24 = vmax.f32 %v2424_v49, %v849_v14  ;;  %v852_v25 = vadd.f32 %v2416_v9, %v851_v22  ;;  %v1772_v26 = vadd.f32 %v1771_v23, %v1770_v18 }
 0x160   : > { %v881_v28 = vmax.f32 %v2426_v53, %v860_v20 }
 0x161   : > { %v879_v15 = vmax.f32 %v2428_v56, %v852_v25 }
 0x163   : > { %v1853_v29 = vpop.f32.mrb[28].mxu0  ;;  %v1773_v30 = vpop.f32.mrb[28].mxu1 }
 0x164   : > { %v873_v3 = vadd.f32 %v1853_v29, %v1729_v39  ;;  %v864_v31 = vpop.f32.mrb[29].mxu0  ;;  %v1774_v32 = vpop.f32.mrb[29].mxu1 }
 0x165   : > { %v865_v34 = vadd.f32 %v2418_v27, %v864_v31  ;;  %v1775_v35 = vadd.f32 %v1774_v32, %v1773_v30  ;;  %v1854_v21 = vpop.f32.mrb[30].mxu0  ;;  %v1776_v36 = vpop.f32.mrb[30].mxu1 }
 0x166   : > { %v884_v37 = vmax.f32 %v2430_v60, %v873_v3  ;;  %v867_v38 = vpop.f32.mrb[31].mxu0  ;;  %v1777_v40 = vpop.f32.mrb[31].mxu1 }
 0x167   : > { %v882_v9 = vmax.f32 %v2432_v63, %v865_v34  ;;  %v868_v41 = vadd.f32 %v2420_v33, %v867_v38 }
 0x169   : > { %v883_v42 = vmax.f32 %v2434_v6, %v868_v41 }
 0x16b   : > { %v1861_v43 = vpop.f32.mrb[32].mxu0  ;;  %v1801_v44 = vpop.f32.mrb[32].mxu1 }
 0x16c   : > { %v1074_v39 = vadd.f32 %v1861_v43, %v1763_v0  ;;  %v1065_v45 = vpop.f32.mrb[33].mxu0  ;;  %v1802_v46 = vpop.f32.mrb[33].mxu1 }
 0x16d   : > { %v1066_v47 = vadd.f32 %v1757_v50, %v1065_v45  ;;  %v1803_v27 = vadd.f32 %v1802_v46, %v1801_v44  ;;  %v1862_v48 = vpop.f32.mrb[34].mxu0  ;;  %v1804_v49 = vpop.f32.mrb[34].mxu1 }
 0x16e   : > { %v1097_v51 = vmax.f32 %v880_v19, %v1074_v39  ;;  %v1077_v52 = vadd.f32 %v1862_v48, %v1766_v7  ;;  %v1068_v53 = vpop.f32.mrb[35].mxu0  ;;  %v1805_v54 = vpop.f32.mrb[35].mxu1 }
 0x16f   : > { %v1095_v55 = vmax.f32 %v878_v24, %v1066_v47  ;;  %v1069_v56 = vadd.f32 %v1760_v57, %v1068_v53  ;;  %v1806_v58 = vadd.f32 %v1805_v54, %v1804_v49 }
 0x170   : > { %v1098_v33 = vmax.f32 %v881_v28, %v1077_v52 }
 0x171   : > { %v1096_v59 = vmax.f32 %v879_v15, %v1069_v56 }
 0x173   : > { %v1865_v60 = vpop.f32.mrb[36].mxu0  ;;  %v1807_v61 = vpop.f32.mrb[36].mxu1 }
 0x174   : > { %v1090_v62 = vadd.f32 %v1865_v60, %v1775_v35  ;;  %v1081_v63 = vpop.f32.mrb[37].mxu0  ;;  %v1808_v0 = vpop.f32.mrb[37].mxu1 }
 0x175   : > { %v1082_v50 = vadd.f32 %v1769_v16, %v1081_v63  ;;  %v1809_v1 = vadd.f32 %v1808_v0, %v1807_v61  ;;  %v1866_v2 = vpop.f32.mrb[38].mxu0  ;;  %v1810_v4 = vpop.f32.mrb[38].mxu1  ;;  %v1630_v16 = vld [vmem:[%s2486_s2] ss:$0 sm:$0xff] }
 0x176   : > { %v2449_v5 = vmax.f32 %v884_v37, %v1090_v62  ;;  %v1084_v6 = vpop.f32.mrb[39].mxu0  ;;  %v1811_v7 = vpop.f32.mrb[39].mxu1 }
 0x177   : > { %v1099_v10 = vmax.f32 %v882_v9, %v1082_v50  ;;  %v1085_v57 = vadd.f32 %v1772_v26, %v1084_v6  ;;  %v1812_v8 = vadd.f32 %v1811_v7, %v1810_v4 }
 0x179   : > { %v1100_v11 = vmax.f32 %v883_v42, %v1085_v57 }
 0x17b   : > { %v1813_v12 = vpop.f32.mrb[40].mxu1  ;;  %v1873_v13 = vpop.f32.mrb[40].mxu0 }
 0x17c   : > { %v1291_v14 = vadd.f32 %v1873_v13, %v1809_v1  ;;  %v1814_v17 = vpop.f32.mrb[41].mxu1  ;;  %v1282_v18 = vpop.f32.mrb[41].mxu0 }
 0x17d   : > { %v1815_v19 = vadd.f32 %v1814_v17, %v1813_v12  ;;  %v1283_v20 = vadd.f32 %v1803_v27, %v1282_v18  ;;  %v1816_v22 = vpop.f32.mrb[42].mxu1  ;;  %v1874_v23 = vpop.f32.mrb[42].mxu0 }
 0x17e   : > { %v1314_v24 = vmax.f32 %v1097_v51, %v1291_v14  ;;  %v1294_v25 = vadd.f32 %v1874_v23, %v1812_v8  ;;  %v1817_v26 = vpop.f32.mrb[43].mxu1  ;;  %v1285_v28 = vpop.f32.mrb[43].mxu0 }
 0x17f   : > { %v1312_v15 = vmax.f32 %v1095_v55, %v1283_v20  ;;  %v1818_v29 = vadd.f32 %v1817_v26, %v1816_v22  ;;  %v1286_v30 = vadd.f32 %v1806_v58, %v1285_v28 }
 0x180   : > { %v1328_v3 = vadd.f32 %v1630_v16, %v1314_v24  ;;  %v1315_v31 = vmax.f32 %v1098_v33, %v1294_v25 }
 0x181   : > { %v1326_v32 = vadd.f32 %v1630_v16, %v1312_v15  ;;  %v1313_v34 = vmax.f32 %v1096_v59, %v1286_v30 }
 0x182   : > { %v1335_v35 = vmax.f32 %v1328_v3, 0.0  ;;  %v1329_v21 = vadd.f32 %v1630_v16, %v1315_v31 }
 0x183   : > { %v1333_v36 = vmax.f32 %v1326_v32, 0.0  ;;  %v1327_v37 = vadd.f32 %v1630_v16, %v1313_v34  ;;  %v1819_v38 = vpop.f32.mrb[44].mxu1  ;;  %v1877_v40 = vpop.f32.mrb[44].mxu0 }
 0x184   : > { %v1642_v9 = vpack.c.bf16 %v1335_v35, %v1335_v35  ;;  %v1336_v41 = vmax.f32 %v1329_v21, 0.0  ;;  %v1820_v42 = vpop.f32.mrb[45].mxu1  ;;  %v1298_v43 = vpop.f32.mrb[45].mxu0 }
 0x185   : > { %v1640_v44 = vpack.c.bf16 %v1333_v36, %v1333_v36  ;;  %v1334_v39 = vmax.f32 %v1327_v37, 0.0  ;;  %v1821_v45 = vadd.f32 %v1820_v42, %v1819_v38  ;;  %v1299_v46 = vadd.f32 %v1815_v19, %v1298_v43  ;;  %v1822_v47 = vpop.f32.mrb[46].mxu1  ;;  %v1878_v27 = vpop.f32.mrb[46].mxu0 }
 0x186   : > { %1372 = vst.msk [vmem:[%s2457_s26 + $0x8] sm:$0xf] %vm1369_vm1, %v1642_v9  ;;  %v1643_v48 = vpack.c.bf16 %v1336_v41, %v1336_v41  ;;  %v1823_v49 = vpop.f32.mrb[47].mxu1  ;;  %v1301_v51 = vpop.f32.mrb[47].mxu0 }
 0x187   : > { %1370 = vst.msk [vmem:[%s2457_s26] sm:$0xf] %vm1369_vm1, %v1640_v44  ;;  %v1641_v52 = vpack.c.bf16 %v1334_v39, %v1334_v39  ;;  %v1307_v53 = vadd.f32 %v1877_v40, %v1821_v45  ;;  %v1316_v54 = vmax.f32 %v1099_v10, %v1299_v46  ;;  %v1302_v55 = vadd.f32 %v1818_v29, %v1301_v51 }
 0x188   : > { %1373 = vst.msk [vmem:[%s2457_s26 + $0xc] sm:$0xf] %vm1369_vm1, %v1643_v48 }
 0x189   : > { %1371 = vst.msk [vmem:[%s2457_s26 + $0x4] sm:$0xf] %vm1369_vm1, %v1641_v52  ;;  %v1318_v56 = vmax.f32 %v2449_v5, %v1307_v53  ;;  %v1330_v58 = vadd.f32 %v1630_v16, %v1316_v54  ;;  %v1317_v33 = vmax.f32 %v1100_v11, %v1302_v55 }
 0x18b   : > { %v1332_v59 = vadd.f32 %v1630_v16, %v1318_v56  ;;  %v1337_v60 = vmax.f32 %v1330_v58, 0.0  ;;  %v1331_v61 = vadd.f32 %v1630_v16, %v1317_v33 }
 0x18d   : > { %v1339_v62 = vmax.f32 %v1332_v59, 0.0  ;;  %v1644_v63 = vpack.c.bf16 %v1337_v60, %v1337_v60  ;;  %v1338_v0 = vmax.f32 %v1331_v61, 0.0 }
 0x18f   : > { %v1646_v50 = vpack.c.bf16 %v1339_v62, %v1339_v62  ;;  %1374 = vst.msk [vmem:[%s2457_s26 + $0x10] sm:$0xf] %vm1369_vm1, %v1644_v63  ;;  %v1645_v1 = vpack.c.bf16 %v1338_v0, %v1338_v0 }
 0x191   : > { %1376 = vst.msk [vmem:[%s2457_s26 + $0x18] sm:$0xf] %vm1369_vm1, %v1646_v50  ;;  %1375 = vst.msk [vmem:[%s2457_s26 + $0x14] sm:$0xf] %vm1369_vm1, %v1645_v1 }
 0x192 PF: > { %p10_p9 = scmp.ge.s32.totalorder %s2046_s16, 9   ;;  %s2488_s12 = smov %s2003_s13 }
 0x193   : > { %s2489_s13 = smov %s2055_s19  ;;  %s2490_s14 = smov %s2046_s16 }
 0x194   :  { %12 = sbr.rel (!%p10_p9) target bundleno = 2 (0x2), region = 102 }

// kernel: cnn_forward.5
= control target key start
LH: loop header
LB: loop body
LE: loop exit
PB: predicated region body
PF: predicated region fallthrough
CT: control target
= control target key end

     0   :  { %s2488_s15 = smov 0   ;;  %s2490_s16 = smov 0   ;;  %s2986_s0 = inlined_call_operand.vmem [shape: bf16[2,6272], index: 0, kind: input, shape index: {}]   ;;  %s2987_s1 = inlined_call_operand.vmem [shape: bf16[6272,1024], index: 1, kind: input, shape index: {}]   ;;  %s2988_s2 = inlined_call_operand.vmem [shape: f32[1,1024], index: 2, kind: input, shape index: {}]   ;;  %s2989_s3 = inlined_call_operand.vmem [shape: bf16[1024,4], index: 3, kind: input, shape index: {}]   ;;  %s2990_s4 = inlined_call_operand.vmem [shape: f32[4,2,4], index: 4, kind: output, shape index: {}]  }
   0x1   :  { %s2492_s17 = smov 0   ;;  %s2494_s18 = smov 0  }
   0x2   :  { %s2496_s19 = smov 0   ;;  %s2498_s20 = smov 0  }
   0x3   :  { %s2500_s21 = smov 0  }
   0x4 LB: > { %s23_s22 = sadd.s32 1, %s2449_s19  ;;  %s26_s23 = sadd.s32 1, %s2453_s20  ;;  %s2457_s21 = sphi %s2500_s21, %s14_s21   ;;  %s2453_s20 = sphi %s2498_s20, %s2996_s20   ;;  %s2449_s19 = sphi %s2496_s19, %s2995_s19   ;;  %s2445_s18 = sphi %s2494_s18, %s2994_s18   ;;  %s2441_s17 = sphi %s2492_s17, %s2993_s17   ;;  %s2437_s16 = sphi %s2490_s16, %s2992_s16   ;;  %s2433_s15 = sphi %s2488_s15, %s2991_s15  }
   0x5   : > { %p24_p0 = scmp.ge.s32.totalorder %s23_s22, 7  ;;  %p68_p1 = scmp.ne.s32.totalorder %s2437_s16, %s2433_s15 }
   0x6   : > { %p69_p2 = scmp.eq.s32.totalorder %s2457_s21, 0  ;;  %s61_s27 = sadd.s32 1, %s2437_s16 }
   0x7   : > { %s2998_s22 = smov (%p24_p0, %s23_s22), 0  ;;  %s3000_s23 = smov (!%p24_p0, %s26_s23), %s2453_s20 }
   0x8   : > { %p70_p3 = por %p69_p2, %p68_p1  ;;  %p28_p4 = scmp.ge.s32.totalorder %s3000_s23, 4 }
   0x9   : > { %s56_s24 = ssub.s32 %s2449_s19, %s2998_s22  ;;  %p1982_p6 = scmp.ge.s32.totalorder %s2457_s21, 28 }
   0xa   : > { %s3002_s23 = smov (%p28_p4, %s3000_s23), 0 }
   0xb   : > { %s57_s25 = ssub.s32 %s2453_s20, %s3002_s23  ;;  %172 = sbr.rel (%p1982_p6) target bundleno = 138 (0x8a), region = 16 }
   0xc   : > { %s58_s26 = sor.u32 %s57_s25, %s56_s24 }
   0xd   : > { %p59_p5 = scmp.eq.s32.totalorder %s58_s26, 0 }
   0xf   : > { %s2539_s28 = scalar_select %p59_p5, %s2437_s16, %s61_s27  }
  0x12   : > { %183 = sbr.rel (!%p70_p3) target bundleno = 138 (0x8a), region = 24  ;;  %s185_s29 = sand.u32 (%p70_p3), 1, %s2437_s16  }
  0x13   : > { %s2156_s30 = smul.u32 (%p70_p3), 896, %s185_s29  ;;  %s1983_s5 = sshll.u32 (%p70_p3), %s2453_s20, 1 }
  0x14   : > { %s2123_s6 = smul.u32 (%p70_p3), 896, %s2449_s19 }
  0x15   : > { %s2553_s12 = scalar_lea.vmem (%p70_p3), [#allocation3], %s2156_s30 }
  0x16   : > { %s191_s7 = sadd.s32 (%p70_p3), %s2123_s6, %s1983_s5 }
  0x17   : > { %s1985_s8 = sshll.u32 (%p70_p3), %s191_s7, 2 }
  0x18   : > { %s2548_s11 = scalar_lea.vmem (%p70_p3), %s2987_s1, %s1985_s8 }
  0x19   : > { %v443_v0 = vld [vmem:[%s2548_s11] sm:$0xff] }
  0x1a   : > { %v445_v1 = vld [vmem:[%s2548_s11 + $0x20] sm:$0xff]  ;;  %444 = vst [vmem:[%s2553_s12] sm:$0xff] %v443_v0 }
  0x1b   : > { %v447_v2 = vld [vmem:[%s2548_s11 + $0x40] sm:$0xff]  ;;  %446 = vst [vmem:[%s2553_s12 + $0x8] sm:$0xff] %v445_v1 }
  0x1c   : > { %448 = vst [vmem:[%s2553_s12 + $0x10] sm:$0xff] %v447_v2  ;;  %v449_v3 = vld [vmem:[%s2548_s11 + $0x60] sm:$0xff] }
  0x1d   : > { %v451_v4 = vld [vmem:[%s2548_s11 + $0x80] sm:$0xff]  ;;  %450 = vst [vmem:[%s2553_s12 + $0x18] sm:$0xff] %v449_v3 }
  0x1e   : > { %v453_v5 = vld [vmem:[%s2548_s11 + $0xa0] sm:$0xff]  ;;  %452 = vst [vmem:[%s2553_s12 + $0x20] sm:$0xff] %v451_v4 }
  0x1f   : > { %454 = vst [vmem:[%s2553_s12 + $0x28] sm:$0xff] %v453_v5  ;;  %v455_v6 = vld [vmem:[%s2548_s11 + $0xc0] sm:$0xff] }
  0x20   : > { %v457_v7 = vld [vmem:[%s2548_s11 + $0xe0] sm:$0xff]  ;;  %456 = vst [vmem:[%s2553_s12 + $0x30] sm:$0xff] %v455_v6 }
  0x21   : > { %v459_v8 = vld [vmem:[%s2548_s11 + $0x100] sm:$0xff]  ;;  %458 = vst [vmem:[%s2553_s12 + $0x38] sm:$0xff] %v457_v7 }
  0x22   : > { %460 = vst [vmem:[%s2553_s12 + $0x40] sm:$0xff] %v459_v8  ;;  %v461_v9 = vld [vmem:[%s2548_s11 + $0x120] sm:$0xff] }
  0x23   : > { %v463_v10 = vld [vmem:[%s2548_s11 + $0x140] sm:$0xff]  ;;  %462 = vst [vmem:[%s2553_s12 + $0x48] sm:$0xff] %v461_v9 }
  0x24   : > { %v465_v11 = vld [vmem:[%s2548_s11 + $0x160] sm:$0xff]  ;;  %464 = vst [vmem:[%s2553_s12 + $0x50] sm:$0xff] %v463_v10 }
  0x25   : > { %466 = vst [vmem:[%s2553_s12 + $0x58] sm:$0xff] %v465_v11  ;;  %v467_v12 = vld [vmem:[%s2548_s11 + $0x180] sm:$0xff] }
  0x26   : > { %v469_v13 = vld [vmem:[%s2548_s11 + $0x1a0] sm:$0xff]  ;;  %468 = vst [vmem:[%s2553_s12 + $0x60] sm:$0xff] %v467_v12 }
  0x27   : > { %v471_v14 = vld [vmem:[%s2548_s11 + $0x1c0] sm:$0xff]  ;;  %470 = vst [vmem:[%s2553_s12 + $0x68] sm:$0xff] %v469_v13 }
  0x28   : > { %472 = vst [vmem:[%s2553_s12 + $0x70] sm:$0xff] %v471_v14  ;;  %v473_v15 = vld [vmem:[%s2548_s11 + $0x1e0] sm:$0xff] }
  0x29   : > { %v475_v16 = vld [vmem:[%s2548_s11 + $0x200] sm:$0xff]  ;;  %474 = vst [vmem:[%s2553_s12 + $0x78] sm:$0xff] %v473_v15 }
  0x2a   : > { %v477_v17 = vld [vmem:[%s2548_s11 + $0x220] sm:$0xff]  ;;  %476 = vst [vmem:[%s2553_s12 + $0x80] sm:$0xff] %v475_v16 }
  0x2b   : > { %478 = vst [vmem:[%s2553_s12 + $0x88] sm:$0xff] %v477_v17  ;;  %v479_v18 = vld [vmem:[%s2548_s11 + $0x240] sm:$0xff] }
  0x2c   : > { %v481_v19 = vld [vmem:[%s2548_s11 + $0x260] sm:$0xff]  ;;  %480 = vst [vmem:[%s2553_s12 + $0x90] sm:$0xff] %v479_v18 }
  0x2d   : > { %v483_v20 = vld [vmem:[%s2548_s11 + $0x280] sm:$0xff]  ;;  %482 = vst [vmem:[%s2553_s12 + $0x98] sm:$0xff] %v481_v19 }
  0x2e   : > { %484 = vst [vmem:[%s2553_s12 + $0xa0] sm:$0xff] %v483_v20  ;;  %v485_v21 = vld [vmem:[%s2548_s11 + $0x2a0] sm:$0xff] }
  0x2f   : > { %v487_v22 = vld [vmem:[%s2548_s11 + $0x2c0] sm:$0xff]  ;;  %486 = vst [vmem:[%s2553_s12 + $0xa8] sm:$0xff] %v485_v21 }
  0x30   : > { %v489_v23 = vld [vmem:[%s2548_s11 + $0x2e0] sm:$0xff]  ;;  %488 = vst [vmem:[%s2553_s12 + $0xb0] sm:$0xff] %v487_v22 }
  0x31   : > { %490 = vst [vmem:[%s2553_s12 + $0xb8] sm:$0xff] %v489_v23  ;;  %v491_v24 = vld [vmem:[%s2548_s11 + $0x300] sm:$0xff] }
  0x32   : > { %v493_v25 = vld [vmem:[%s2548_s11 + $0x320] sm:$0xff]  ;;  %492 = vst [vmem:[%s2553_s12 + $0xc0] sm:$0xff] %v491_v24 }
  0x33   : > { %v495_v26 = vld [vmem:[%s2548_s11 + $0x340] sm:$0xff]  ;;  %494 = vst [vmem:[%s2553_s12 + $0xc8] sm:$0xff] %v493_v25 }
  0x34   : > { %496 = vst [vmem:[%s2553_s12 + $0xd0] sm:$0xff] %v495_v26  ;;  %v497_v27 = vld [vmem:[%s2548_s11 + $0x360] sm:$0xff] }
  0x35   : > { %v499_v28 = vld [vmem:[%s2548_s11 + $0x380] sm:$0xff]  ;;  %498 = vst [vmem:[%s2553_s12 + $0xd8] sm:$0xff] %v497_v27 }
  0x36   : > { %v501_v29 = vld [vmem:[%s2548_s11 + $0x3a0] sm:$0xff]  ;;  %500 = vst [vmem:[%s2553_s12 + $0xe0] sm:$0xff] %v499_v28 }
  0x37   : > { %502 = vst [vmem:[%s2553_s12 + $0xe8] sm:$0xff] %v501_v29  ;;  %v503_v30 = vld [vmem:[%s2548_s11 + $0x3c0] sm:$0xff] }
  0x38   : > { %v505_v31 = vld [vmem:[%s2548_s11 + $0x3e0] sm:$0xff]  ;;  %504 = vst [vmem:[%s2553_s12 + $0xf0] sm:$0xff] %v503_v30 }
  0x39   : > { %v507_v32 = vld [vmem:[%s2548_s11 + $0x400] sm:$0xff]  ;;  %506 = vst [vmem:[%s2553_s12 + $0xf8] sm:$0xff] %v505_v31 }
  0x3a   : > { %508 = vst [vmem:[%s2553_s12 + $0x100] sm:$0xff] %v507_v32  ;;  %v509_v33 = vld [vmem:[%s2548_s11 + $0x420] sm:$0xff] }
  0x3b   : > { %v511_v34 = vld [vmem:[%s2548_s11 + $0x440] sm:$0xff]  ;;  %510 = vst [vmem:[%s2553_s12 + $0x108] sm:$0xff] %v509_v33 }
  0x3c   : > { %v513_v35 = vld [vmem:[%s2548_s11 + $0x460] sm:$0xff]  ;;  %512 = vst [vmem:[%s2553_s12 + $0x110] sm:$0xff] %v511_v34 }
  0x3d   : > { %514 = vst [vmem:[%s2553_s12 + $0x118] sm:$0xff] %v513_v35  ;;  %v515_v36 = vld [vmem:[%s2548_s11 + $0x480] sm:$0xff] }
  0x3e   : > { %v517_v37 = vld [vmem:[%s2548_s11 + $0x4a0] sm:$0xff]  ;;  %516 = vst [vmem:[%s2553_s12 + $0x120] sm:$0xff] %v515_v36 }
  0x3f   : > { %v519_v38 = vld [vmem:[%s2548_s11 + $0x4c0] sm:$0xff]  ;;  %518 = vst [vmem:[%s2553_s12 + $0x128] sm:$0xff] %v517_v37 }
  0x40   : > { %520 = vst [vmem:[%s2553_s12 + $0x130] sm:$0xff] %v519_v38  ;;  %v521_v39 = vld [vmem:[%s2548_s11 + $0x4e0] sm:$0xff] }
  0x41   : > { %v523_v40 = vld [vmem:[%s2548_s11 + $0x500] sm:$0xff]  ;;  %522 = vst [vmem:[%s2553_s12 + $0x138] sm:$0xff] %v521_v39 }
  0x42   : > { %v525_v41 = vld [vmem:[%s2548_s11 + $0x520] sm:$0xff]  ;;  %524 = vst [vmem:[%s2553_s12 + $0x140] sm:$0xff] %v523_v40 }
  0x43   : > { %526 = vst [vmem:[%s2553_s12 + $0x148] sm:$0xff] %v525_v41  ;;  %v527_v42 = vld [vmem:[%s2548_s11 + $0x540] sm:$0xff] }
  0x44   : > { %v529_v43 = vld [vmem:[%s2548_s11 + $0x560] sm:$0xff]  ;;  %528 = vst [vmem:[%s2553_s12 + $0x150] sm:$0xff] %v527_v42 }
  0x45   : > { %v531_v44 = vld [vmem:[%s2548_s11 + $0x580] sm:$0xff]  ;;  %530 = vst [vmem:[%s2553_s12 + $0x158] sm:$0xff] %v529_v43 }
  0x46   : > { %532 = vst [vmem:[%s2553_s12 + $0x160] sm:$0xff] %v531_v44  ;;  %v533_v45 = vld [vmem:[%s2548_s11 + $0x5a0] sm:$0xff] }
  0x47   : > { %v535_v46 = vld [vmem:[%s2548_s11 + $0x5c0] sm:$0xff]  ;;  %534 = vst [vmem:[%s2553_s12 + $0x168] sm:$0xff] %v533_v45 }
  0x48   : > { %v537_v47 = vld [vmem:[%s2548_s11 + $0x5e0] sm:$0xff]  ;;  %536 = vst [vmem:[%s2553_s12 + $0x170] sm:$0xff] %v535_v46 }
  0x49   : > { %538 = vst [vmem:[%s2553_s12 + $0x178] sm:$0xff] %v537_v47  ;;  %v539_v48 = vld [vmem:[%s2548_s11 + $0x600] sm:$0xff] }
  0x4a   : > { %v541_v49 = vld [vmem:[%s2548_s11 + $0x620] sm:$0xff]  ;;  %540 = vst [vmem:[%s2553_s12 + $0x180] sm:$0xff] %v539_v48 }
  0x4b   : > { %v543_v50 = vld [vmem:[%s2548_s11 + $0x640] sm:$0xff]  ;;  %542 = vst [vmem:[%s2553_s12 + $0x188] sm:$0xff] %v541_v49 }
  0x4c   : > { %544 = vst [vmem:[%s2553_s12 + $0x190] sm:$0xff] %v543_v50  ;;  %v545_v51 = vld [vmem:[%s2548_s11 + $0x660] sm:$0xff] }
  0x4d   : > { %v547_v52 = vld [vmem:[%s2548_s11 + $0x680] sm:$0xff]  ;;  %546 = vst [vmem:[%s2553_s12 + $0x198] sm:$0xff] %v545_v51 }
  0x4e   : > { %v549_v53 = vld [vmem:[%s2548_s11 + $0x6a0] sm:$0xff]  ;;  %548 = vst [vmem:[%s2553_s12 + $0x1a0] sm:$0xff] %v547_v52 }
  0x4f   : > { %550 = vst [vmem:[%s2553_s12 + $0x1a8] sm:$0xff] %v549_v53  ;;  %v551_v54 = vld [vmem:[%s2548_s11 + $0x6c0] sm:$0xff] }
  0x50   : > { %v553_v55 = vld [vmem:[%s2548_s11 + $0x6e0] sm:$0xff]  ;;  %552 = vst [vmem:[%s2553_s12 + $0x1b0] sm:$0xff] %v551_v54 }
  0x51   : > { %v555_v56 = vld [vmem:[%s2548_s11 + $0x700] sm:$0xff]  ;;  %554 = vst [vmem:[%s2553_s12 + $0x1b8] sm:$0xff] %v553_v55 }
  0x52   : > { %556 = vst [vmem:[%s2553_s12 + $0x1c0] sm:$0xff] %v555_v56  ;;  %v557_v57 = vld [vmem:[%s2548_s11 + $0x720] sm:$0xff] }
  0x53   : > { %v559_v58 = vld [vmem:[%s2548_s11 + $0x740] sm:$0xff]  ;;  %558 = vst [vmem:[%s2553_s12 + $0x1c8] sm:$0xff] %v557_v57 }
  0x54   : > { %v561_v59 = vld [vmem:[%s2548_s11 + $0x760] sm:$0xff]  ;;  %560 = vst [vmem:[%s2553_s12 + $0x1d0] sm:$0xff] %v559_v58 }
  0x55   : > { %562 = vst [vmem:[%s2553_s12 + $0x1d8] sm:$0xff] %v561_v59  ;;  %v563_v60 = vld [vmem:[%s2548_s11 + $0x780] sm:$0xff] }
  0x56   : > { %v565_v61 = vld [vmem:[%s2548_s11 + $0x7a0] sm:$0xff]  ;;  %564 = vst [vmem:[%s2553_s12 + $0x1e0] sm:$0xff] %v563_v60 }
  0x57   : > { %v567_v62 = vld [vmem:[%s2548_s11 + $0x7c0] sm:$0xff]  ;;  %566 = vst [vmem:[%s2553_s12 + $0x1e8] sm:$0xff] %v565_v61 }
  0x58   : > { %568 = vst [vmem:[%s2553_s12 + $0x1f0] sm:$0xff] %v567_v62  ;;  %v569_v63 = vld [vmem:[%s2548_s11 + $0x7e0] sm:$0xff] }
  0x59   : > { %v571_v0 = vld [vmem:[%s2548_s11 + $0x800] sm:$0xff]  ;;  %570 = vst [vmem:[%s2553_s12 + $0x1f8] sm:$0xff] %v569_v63 }
  0x5a   : > { %v573_v1 = vld [vmem:[%s2548_s11 + $0x820] sm:$0xff]  ;;  %572 = vst [vmem:[%s2553_s12 + $0x200] sm:$0xff] %v571_v0 }
  0x5b   : > { %574 = vst [vmem:[%s2553_s12 + $0x208] sm:$0xff] %v573_v1  ;;  %v575_v2 = vld [vmem:[%s2548_s11 + $0x840] sm:$0xff] }
  0x5c   : > { %v577_v3 = vld [vmem:[%s2548_s11 + $0x860] sm:$0xff]  ;;  %576 = vst [vmem:[%s2553_s12 + $0x210] sm:$0xff] %v575_v2 }
  0x5d   : > { %v579_v4 = vld [vmem:[%s2548_s11 + $0x880] sm:$0xff]  ;;  %578 = vst [vmem:[%s2553_s12 + $0x218] sm:$0xff] %v577_v3 }
  0x5e   : > { %580 = vst [vmem:[%s2553_s12 + $0x220] sm:$0xff] %v579_v4  ;;  %v581_v5 = vld [vmem:[%s2548_s11 + $0x8a0] sm:$0xff] }
  0x5f   : > { %v583_v6 = vld [vmem:[%s2548_s11 + $0x8c0] sm:$0xff]  ;;  %582 = vst [vmem:[%s2553_s12 + $0x228] sm:$0xff] %v581_v5 }
  0x60   : > { %v585_v7 = vld [vmem:[%s2548_s11 + $0x8e0] sm:$0xff]  ;;  %584 = vst [vmem:[%s2553_s12 + $0x230] sm:$0xff] %v583_v6 }
  0x61   : > { %586 = vst [vmem:[%s2553_s12 + $0x238] sm:$0xff] %v585_v7  ;;  %v587_v8 = vld [vmem:[%s2548_s11 + $0x900] sm:$0xff] }
  0x62   : > { %v589_v9 = vld [vmem:[%s2548_s11 + $0x920] sm:$0xff]  ;;  %588 = vst [vmem:[%s2553_s12 + $0x240] sm:$0xff] %v587_v8 }
  0x63   : > { %v591_v10 = vld [vmem:[%s2548_s11 + $0x940] sm:$0xff]  ;;  %590 = vst [vmem:[%s2553_s12 + $0x248] sm:$0xff] %v589_v9 }
  0x64   : > { %592 = vst [vmem:[%s2553_s12 + $0x250] sm:$0xff] %v591_v10  ;;  %v593_v11 = vld [vmem:[%s2548_s11 + $0x960] sm:$0xff] }
  0x65   : > { %v595_v12 = vld [vmem:[%s2548_s11 + $0x980] sm:$0xff]  ;;  %594 = vst [vmem:[%s2553_s12 + $0x258] sm:$0xff] %v593_v11 }
  0x66   : > { %v597_v13 = vld [vmem:[%s2548_s11 + $0x9a0] sm:$0xff]  ;;  %596 = vst [vmem:[%s2553_s12 + $0x260] sm:$0xff] %v595_v12 }
  0x67   : > { %598 = vst [vmem:[%s2553_s12 + $0x268] sm:$0xff] %v597_v13  ;;  %v599_v14 = vld [vmem:[%s2548_s11 + $0x9c0] sm:$0xff] }
  0x68   : > { %v601_v15 = vld [vmem:[%s2548_s11 + $0x9e0] sm:$0xff]  ;;  %600 = vst [vmem:[%s2553_s12 + $0x270] sm:$0xff] %v599_v14 }
  0x69   : > { %v603_v16 = vld [vmem:[%s2548_s11 + $0xa00] sm:$0xff]  ;;  %602 = vst [vmem:[%s2553_s12 + $0x278] sm:$0xff] %v601_v15 }
  0x6a   : > { %604 = vst [vmem:[%s2553_s12 + $0x280] sm:$0xff] %v603_v16  ;;  %v605_v17 = vld [vmem:[%s2548_s11 + $0xa20] sm:$0xff] }
  0x6b   : > { %v607_v18 = vld [vmem:[%s2548_s11 + $0xa40] sm:$0xff]  ;;  %606 = vst [vmem:[%s2553_s12 + $0x288] sm:$0xff] %v605_v17 }
  0x6c   : > { %v609_v19 = vld [vmem:[%s2548_s11 + $0xa60] sm:$0xff]  ;;  %608 = vst [vmem:[%s2553_s12 + $0x290] sm:$0xff] %v607_v18 }
  0x6d   : > { %610 = vst [vmem:[%s2553_s12 + $0x298] sm:$0xff] %v609_v19  ;;  %v611_v20 = vld [vmem:[%s2548_s11 + $0xa80] sm:$0xff] }
  0x6e   : > { %v613_v21 = vld [vmem:[%s2548_s11 + $0xaa0] sm:$0xff]  ;;  %612 = vst [vmem:[%s2553_s12 + $0x2a0] sm:$0xff] %v611_v20 }
  0x6f   : > { %v615_v22 = vld [vmem:[%s2548_s11 + $0xac0] sm:$0xff]  ;;  %614 = vst [vmem:[%s2553_s12 + $0x2a8] sm:$0xff] %v613_v21 }
  0x70   : > { %616 = vst [vmem:[%s2553_s12 + $0x2b0] sm:$0xff] %v615_v22  ;;  %v617_v23 = vld [vmem:[%s2548_s11 + $0xae0] sm:$0xff] }
  0x71   : > { %v619_v24 = vld [vmem:[%s2548_s11 + $0xb00] sm:$0xff]  ;;  %618 = vst [vmem:[%s2553_s12 + $0x2b8] sm:$0xff] %v617_v23 }
  0x72   : > { %v621_v25 = vld [vmem:[%s2548_s11 + $0xb20] sm:$0xff]  ;;  %620 = vst [vmem:[%s2553_s12 + $0x2c0] sm:$0xff] %v619_v24 }
  0x73   : > { %622 = vst [vmem:[%s2553_s12 + $0x2c8] sm:$0xff] %v621_v25  ;;  %v623_v26 = vld [vmem:[%s2548_s11 + $0xb40] sm:$0xff] }
  0x74   : > { %v625_v27 = vld [vmem:[%s2548_s11 + $0xb60] sm:$0xff]  ;;  %624 = vst [vmem:[%s2553_s12 + $0x2d0] sm:$0xff] %v623_v26 }
  0x75   : > { %v627_v28 = vld [vmem:[%s2548_s11 + $0xb80] sm:$0xff]  ;;  %626 = vst [vmem:[%s2553_s12 + $0x2d8] sm:$0xff] %v625_v27 }
  0x76   : > { %628 = vst [vmem:[%s2553_s12 + $0x2e0] sm:$0xff] %v627_v28  ;;  %v629_v29 = vld [vmem:[%s2548_s11 + $0xba0] sm:$0xff] }
  0x77   : > { %v631_v30 = vld [vmem:[%s2548_s11 + $0xbc0] sm:$0xff]  ;;  %630 = vst [vmem:[%s2553_s12 + $0x2e8] sm:$0xff] %v629_v29 }
  0x78   : > { %v633_v31 = vld [vmem:[%s2548_s11 + $0xbe0] sm:$0xff]  ;;  %632 = vst [vmem:[%s2553_s12 + $0x2f0] sm:$0xff] %v631_v30 }
  0x79   : > { %634 = vst [vmem:[%s2553_s12 + $0x2f8] sm:$0xff] %v633_v31  ;;  %v635_v32 = vld [vmem:[%s2548_s11 + $0xc00] sm:$0xff] }
  0x7a   : > { %v637_v33 = vld [vmem:[%s2548_s11 + $0xc20] sm:$0xff]  ;;  %636 = vst [vmem:[%s2553_s12 + $0x300] sm:$0xff] %v635_v32 }
  0x7b   : > { %v639_v34 = vld [vmem:[%s2548_s11 + $0xc40] sm:$0xff]  ;;  %638 = vst [vmem:[%s2553_s12 + $0x308] sm:$0xff] %v637_v33 }
  0x7c   : > { %640 = vst [vmem:[%s2553_s12 + $0x310] sm:$0xff] %v639_v34  ;;  %v641_v35 = vld [vmem:[%s2548_s11 + $0xc60] sm:$0xff] }
  0x7d   : > { %v643_v36 = vld [vmem:[%s2548_s11 + $0xc80] sm:$0xff]  ;;  %642 = vst [vmem:[%s2553_s12 + $0x318] sm:$0xff] %v641_v35 }
  0x7e   : > { %v645_v37 = vld [vmem:[%s2548_s11 + $0xca0] sm:$0xff]  ;;  %644 = vst [vmem:[%s2553_s12 + $0x320] sm:$0xff] %v643_v36 }
  0x7f   : > { %646 = vst [vmem:[%s2553_s12 + $0x328] sm:$0xff] %v645_v37  ;;  %v647_v38 = vld [vmem:[%s2548_s11 + $0xcc0] sm:$0xff] }
  0x80   : > { %v649_v39 = vld [vmem:[%s2548_s11 + $0xce0] sm:$0xff]  ;;  %648 = vst [vmem:[%s2553_s12 + $0x330] sm:$0xff] %v647_v38 }
  0x81   : > { %v651_v40 = vld [vmem:[%s2548_s11 + $0xd00] sm:$0xff]  ;;  %650 = vst [vmem:[%s2553_s12 + $0x338] sm:$0xff] %v649_v39 }
  0x82   : > { %652 = vst [vmem:[%s2553_s12 + $0x340] sm:$0xff] %v651_v40  ;;  %v653_v41 = vld [vmem:[%s2548_s11 + $0xd20] sm:$0xff] }
  0x83   : > { %v655_v42 = vld [vmem:[%s2548_s11 + $0xd40] sm:$0xff]  ;;  %654 = vst [vmem:[%s2553_s12 + $0x348] sm:$0xff] %v653_v41 }
  0x84   : > { %v657_v43 = vld [vmem:[%s2548_s11 + $0xd60] sm:$0xff]  ;;  %656 = vst [vmem:[%s2553_s12 + $0x350] sm:$0xff] %v655_v42 }
  0x85   : > { %658 = vst [vmem:[%s2553_s12 + $0x358] sm:$0xff] %v657_v43  ;;  %v659_v44 = vld [vmem:[%s2548_s11 + $0xd80] sm:$0xff] }
  0x86   : > { %v661_v45 = vld [vmem:[%s2548_s11 + $0xda0] sm:$0xff]  ;;  %660 = vst [vmem:[%s2553_s12 + $0x360] sm:$0xff] %v659_v44 }
  0x87   : > { %v663_v46 = vld [vmem:[%s2548_s11 + $0xdc0] sm:$0xff]  ;;  %662 = vst [vmem:[%s2553_s12 + $0x368] sm:$0xff] %v661_v45 }
  0x88   : > { %664 = vst [vmem:[%s2553_s12 + $0x370] sm:$0xff] %v663_v46  ;;  %v665_v47 = vld [vmem:[%s2548_s11 + $0xde0] sm:$0xff] }
  0x89   : > { %666 = vst [vmem:[%s2553_s12 + $0x378] sm:$0xff] %v665_v47 }
  0x8a PF: > { %p1986_p7 = scmp.ge.s32.totalorder %s2457_s21, 1  ;;  %p688_p8 = scmp.lt.s32.totalorder %s2457_s21, 29 }
  0x8c   : > { %p689_p9 = pnand %p1986_p7, %p688_p8 }
  0x8d   : > { %s695_s13 = sand.u32 (!%p689_p9), 1, %s2433_s15   ;;  %s732_s14 = smul.u32 (!%p689_p9), 7, %s2441_s17 }
  0x8e   : > { %692 = sbr.rel (%p689_p9) target bundleno = 746 (0x2ea), region = 70  ;;  %s1987_s25 = sshll.u32 (!%p689_p9), %s2445_s18, 1 }
  0x8f   : > { %s2157_s24 = smul.u32 (!%p689_p9), 896, %s695_s13  ;;  %p733_p10 = scmp.lt.s32.totalorder (!%p689_p9), %s732_s14, 48 }
  0x90   : > { %p740_p11 = scmp.lt.s32.totalorder (!%p689_p9), %s1987_s25, 7  ;;  %s1988_s26 = sshll.u32 (!%p689_p9), %s2445_s18, 5 }
  0x91   : > { %p745_p12 = scmp.lt.s32.totalorder (!%p689_p9), %s1988_s26, 127  ;;  %p750_p13 = scmp.lt.s32.totalorder (!%p689_p9), %s2445_s18, 3 }
  0x92   : > { %s2806_s29 = scalar_lea.vmem (!%p689_p9), [#allocation3], %s2157_s24  ;;  %p1991_p0 = scmp.ne.s32.totalorder (!%p689_p9), %s2441_s17, 0 }
  0x95   : > { %s3004_s14 = smov (!%p733_p10, %s732_s14), 48  ;;  %s3006_s25 = smov (!%p740_p11, %s1987_s25), 7 }
  0x96   : > { %s735_s30 = scalar_lea.vmem %s2986_s0, %s3004_s14  ;;  %s742_s15 = scalar_lea.vmem %s2988_s2, %s3006_s25  ;;  %v2459_v48 = vmov (!%p1991_p0), 0.0  }
  0x97   : > { %s3008_s26 = smov (!%p745_p12, %s1988_s26), 127  ;;  %s3010_s18 = smov (!%p750_p13, %s2445_s18), 3 }
  0x98   : > { %s1989_s7 = sshll.u32 %s3008_s26, 2  ;;  %s1990_s11 = sshll.u32 %s3010_s18, 1  ;;  %759 = vst [vmem:[#allocation2] sm:$0xf] (!%p1991_p0), %v2459_v48 }
  0x99   : > { %s2799_s10 = scalar_lea.vmem %s2989_s3, %s1989_s7  ;;  %s2804_s27 = scalar_lea.vmem %s2990_s4, %s1990_s11 }
  0x9a   : > { %758 = sbr.rel (%p1991_p0) target bundleno = 161 (0xa1), region = 78 }
  0xa1 PF: > { %v2218_v49 = vld [vmem:[%s2806_s29 + $0x4] ss:$8 sps:$4 sm:$0xff]   ;;  %v2222_v51 = vld [vmem:[%s2806_s29] ss:$8 sps:$4 sm:$0xff]   ;;  %v2224_v53 = vld [vmem:[%s2806_s29 + $0x14] ss:$8 sps:$4 sm:$0xff]   ;;  %v879_v23 = vlaneseq }
  0xa2   : > { %v2220_v50 = vld [vmem:[%s2806_s29 + $0x204] ss:$8 sps:$4 sm:$0xff]   ;;  %1490 = vmatprep.subr.bf16.mxu1 %v2218_v49  ;;  %v2223_v52 = vld [vmem:[%s2806_s29 + $0x200] ss:$8 sps:$4 sm:$0xff]   ;;  %v2226_v54 = vld [vmem:[%s2806_s29 + $0x214] ss:$8 sps:$4 sm:$0xff]  }
  0xa3   : > { %1572 = vmatprep.subr.bf16.mxu0 %v2220_v50  ;;  %1491 = vmatpush1.bf16.msra.mxu1 %v2222_v51  ;;  %v2228_v55 = vld [vmem:[%s2806_s29 + $0x10] ss:$8 sps:$4 sm:$0xff]   ;;  %v2230_v57 = vld [vmem:[%s2806_s29 + $0x24] ss:$8 sps:$4 sm:$0xff]   ;;  %v2234_v59 = vld [vmem:[%s2806_s29 + $0x20] ss:$8 sps:$4 sm:$0xff]  }
  0xa4   : > { %1573 = vmatpush1.bf16.msra.mxu0 %v2223_v52  ;;  %1492 = vmatprep.subr.bf16.mxu1 %v2224_v53  ;;  %v2229_v56 = vld [vmem:[%s2806_s29 + $0x210] ss:$8 sps:$4 sm:$0xff]   ;;  %v2232_v58 = vld [vmem:[%s2806_s29 + $0x224] ss:$8 sps:$4 sm:$0xff]   ;;  %v2235_v60 = vld [vmem:[%s2806_s29 + $0x220] ss:$8 sps:$4 sm:$0xff]  }
  0xa5   : > { %1574 = vmatprep.subr.bf16.mxu0 %v2226_v54  ;;  %v2236_v61 = vld [vmem:[%s2806_s29 + $0x34] ss:$8 sps:$4 sm:$0xff]   ;;  %v2240_v63 = vld [vmem:[%s2806_s29 + $0x30] ss:$8 sps:$4 sm:$0xff]   ;;  %v2242_v1 = vld [vmem:[%s2806_s29 + $0x44] ss:$8 sps:$4 sm:$0xff]  }
  0xa6   : > { %v2238_v62 = vld [vmem:[%s2806_s29 + $0x234] ss:$8 sps:$4 sm:$0xff]   ;;  %v2241_v0 = vld [vmem:[%s2806_s29 + $0x230] ss:$8 sps:$4 sm:$0xff]   ;;  %v2244_v2 = vld [vmem:[%s2806_s29 + $0x244] ss:$8 sps:$4 sm:$0xff]  }
  0xa7   : > { %1493 = vmatpush1.bf16.msra.mxu1 %v2228_v55  ;;  %v2246_v3 = vld [vmem:[%s2806_s29 + $0x40] ss:$8 sps:$4 sm:$0xff]   ;;  %v2248_v5 = vld [vmem:[%s2806_s29 + $0x54] ss:$8 sps:$4 sm:$0xff]   ;;  %v2252_v7 = vld [vmem:[%s2806_s29 + $0x50] ss:$8 sps:$4 sm:$0xff]  }
  0xa8   : > { %1575 = vmatpush1.bf16.msra.mxu0 %v2229_v56  ;;  %1494 = vmatprep.subr.bf16.mxu1 %v2230_v57  ;;  %v2247_v4 = vld [vmem:[%s2806_s29 + $0x240] ss:$8 sps:$4 sm:$0xff]   ;;  %v2250_v6 = vld [vmem:[%s2806_s29 + $0x254] ss:$8 sps:$4 sm:$0xff]   ;;  %v2253_v8 = vld [vmem:[%s2806_s29 + $0x250] ss:$8 sps:$4 sm:$0xff]  }
  0xa9   : > { %1576 = vmatprep.subr.bf16.mxu0 %v2232_v58  ;;  %v2254_v9 = vld [vmem:[%s2806_s29 + $0x64] ss:$8 sps:$4 sm:$0xff]   ;;  %v2258_v11 = vld [vmem:[%s2806_s29 + $0x60] ss:$8 sps:$4 sm:$0xff]   ;;  %v2260_v13 = vld [vmem:[%s2806_s29 + $0x74] ss:$8 sps:$4 sm:$0xff]  }
  0xaa   : > { %v2256_v10 = vld [vmem:[%s2806_s29 + $0x264] ss:$8 sps:$4 sm:$0xff]   ;;  %v2259_v12 = vld [vmem:[%s2806_s29 + $0x260] ss:$8 sps:$4 sm:$0xff]   ;;  %v2262_v14 = vld [vmem:[%s2806_s29 + $0x274] ss:$8 sps:$4 sm:$0xff]  }
  0xab   : > { %1495 = vmatpush1.bf16.msra.mxu1 %v2234_v59  ;;  %v2264_v15 = vld [vmem:[%s2806_s29 + $0x70] ss:$8 sps:$4 sm:$0xff]   ;;  %v2266_v17 = vld [vmem:[%s2806_s29 + $0x84] ss:$8 sps:$4 sm:$0xff]   ;;  %v2270_v19 = vld [vmem:[%s2806_s29 + $0x80] ss:$8 sps:$4 sm:$0xff]  }
  0xac   : > { %1577 = vmatpush1.bf16.msra.mxu0 %v2235_v60  ;;  %1496 = vmatprep.subr.bf16.mxu1 %v2236_v61  ;;  %v2265_v16 = vld [vmem:[%s2806_s29 + $0x270] ss:$8 sps:$4 sm:$0xff]   ;;  %v2268_v18 = vld [vmem:[%s2806_s29 + $0x284] ss:$8 sps:$4 sm:$0xff]   ;;  %v2271_v20 = vld [vmem:[%s2806_s29 + $0x280] ss:$8 sps:$4 sm:$0xff]  }
  0xad   : > { %1578 = vmatprep.subr.bf16.mxu0 %v2238_v62  ;;  %v2460_v21 = vmov 1966171168   ;;  %v2272_v24 = vld [vmem:[%s2806_s29 + $0x94] ss:$8 sps:$4 sm:$0xff]   ;;  %v2276_v26 = vld [vmem:[%s2806_s29 + $0x90] ss:$8 sps:$4 sm:$0xff]  }
  0xae   : > { %v877_v22 = vunpack.c.l.s4 %v2460_v21  ;;  %v2274_v25 = vld [vmem:[%s2806_s29 + $0x294] ss:$8 sps:$4 sm:$0xff]   ;;  %v2848_v28 = vshrl.u32 %v879_v23, 7  ;;  %v2277_v29 = vld [vmem:[%s2806_s29 + $0x290] ss:$8 sps:$4 sm:$0xff]   ;;  %p2104_p1 = scmp.ne.s32.totalorder %s2441_s17, 6 }
  0xaf   : > { %1497 = vmatpush1.bf16.msra.mxu1 %v2240_v63  ;;  %v2278_v30 = vld [vmem:[%s2806_s29 + $0xa4] ss:$8 sps:$4 sm:$0xff]   ;;  %v2282_v32 = vld [vmem:[%s2806_s29 + $0xa0] ss:$8 sps:$4 sm:$0xff]   ;;  %v2284_v35 = vld [vmem:[%s2806_s29 + $0xb4] ss:$8 sps:$4 sm:$0xff]  }
  0xb0   : > { %1579 = vmatpush1.bf16.msra.mxu0 %v2241_v0  ;;  %1498 = vmatprep.subr.bf16.mxu1 %v2242_v1  ;;  %v878_v27 = vunpack.c.0.s8 %v877_v22  ;;  %v2280_v31 = vld [vmem:[%s2806_s29 + $0x2a4] ss:$8 sps:$4 sm:$0xff]   ;;  %v2283_v33 = vld [vmem:[%s2806_s29 + $0x2a0] ss:$8 sps:$4 sm:$0xff]   ;;  %v2286_v36 = vld [vmem:[%s2806_s29 + $0x2b4] ss:$8 sps:$4 sm:$0xff]  }
  0xb1   : > { %1580 = vmatprep.subr.bf16.mxu0 %v2244_v2  ;;  %v761_v37 = vld [vmem:[%s735_s30] sm:$0x7f]  ;;  %v2288_v38 = vld [vmem:[%s2806_s29 + $0xb0] ss:$8 sps:$4 sm:$0xff]   ;;  %v2290_v42 = vld [vmem:[%s2806_s29 + $0xc4] ss:$8 sps:$4 sm:$0xff]  }
  0xb2   : > { %v881_v34 = vsub.s32 %v878_v27, %v2848_v28  ;;  %v875_v40 = vcombine.high %v761_v37, %v761_v37  ;;  %v2289_v41 = vld [vmem:[%s2806_s29 + $0x2b0] ss:$8 sps:$4 sm:$0xff]   ;;  %v2292_v43 = vld [vmem:[%s2806_s29 + $0x2c4] ss:$8 sps:$4 sm:$0xff]   ;;  %v2294_v46 = vld [vmem:[%s2806_s29 + $0xc0] ss:$8 sps:$4 sm:$0xff]  }
  0xb3   : > { %1499 = vmatpush1.bf16.msra.mxu1 %v2246_v3  ;;  %v2295_v49 = vld [vmem:[%s2806_s29 + $0x2c0] ss:$8 sps:$4 sm:$0xff]   ;;  %v2296_v50 = vld [vmem:[%s2806_s29 + $0xd4] ss:$8 sps:$4 sm:$0xff]   ;;  %v2300_v53 = vld [vmem:[%s2806_s29 + $0xd0] ss:$8 sps:$4 sm:$0xff]  }
  0xb4   : > { %1581 = vmatpush1.bf16.msra.mxu0 %v2247_v4  ;;  %1500 = vmatprep.subr.bf16.mxu1 %v2248_v5  ;;  %v882_v39 = vrot.slane %v761_v37, %v881_v34  ;;  %v889_v45 = vrot.slane %v875_v40, %v881_v34  ;;  %v2298_v51 = vld [vmem:[%s2806_s29 + $0x2d4] ss:$8 sps:$4 sm:$0xff]   ;;  %v2301_v54 = vld [vmem:[%s2806_s29 + $0x2d0] ss:$8 sps:$4 sm:$0xff]   ;;  %v2302_v55 = vld [vmem:[%s2806_s29 + $0xe4] ss:$8 sps:$4 sm:$0xff]  }
  0xb5   : > { %1582 = vmatprep.subr.bf16.mxu0 %v2250_v6  ;;  %v2304_v56 = vld [vmem:[%s2806_s29 + $0x2e4] ss:$8 sps:$4 sm:$0xff]   ;;  %v2306_v57 = vld [vmem:[%s2806_s29 + $0xe0] ss:$8 sps:$4 sm:$0xff]   ;;  %v2308_v59 = vld [vmem:[%s2806_s29 + $0xf4] ss:$8 sps:$4 sm:$0xff]  }
  0xb6   : > { %v890_v44 = vcombine.high %v882_v39, %v882_v39  ;;  %v891_v48 = vcombine.high %v889_v45, %v889_v45  ;;  %v2307_v58 = vld [vmem:[%s2806_s29 + $0x2e0] ss:$8 sps:$4 sm:$0xff]   ;;  %v2310_v60 = vld [vmem:[%s2806_s29 + $0x2f4] ss:$8 sps:$4 sm:$0xff]   ;;  %v2312_v61 = vld [vmem:[%s2806_s29 + $0xf0] ss:$8 sps:$4 sm:$0xff]   ;;  %v2884_v2 = vrot.slane %v882_v39, %v881_v34  ;;  %v2886_v3 = vrot.slane %v889_v45, %v881_v34 }
  0xb7   : > { %1501 = vmatpush1.bf16.msra.mxu1 %v2252_v7  ;;  %v2313_v62 = vld [vmem:[%s2806_s29 + $0x2f0] ss:$8 sps:$4 sm:$0xff]   ;;  %v2316_v63 = vld [vmem:[%s2806_s29 + $0x104] ss:$8 sps:$4 sm:$0xff]   ;;  %v2314_v1 = vld [vmem:[%s2806_s29 + $0x100] ss:$8 sps:$4 sm:$0xff]  }
  0xb8   : > { %1583 = vmatpush1.bf16.msra.mxu0 %v2253_v8  ;;  %1502 = vmatprep.subr.bf16.mxu1 %v2254_v9  ;;  %v912_v47 = vrot.slane %v890_v44, %v881_v34  ;;  %v919_v52 = vrot.slane %v891_v48, %v881_v34  ;;  %v2320_v0 = vld [vmem:[%s2806_s29 + $0x304] ss:$8 sps:$4 sm:$0xff]   ;;  %v2318_v4 = vld [vmem:[%s2806_s29 + $0x300] ss:$8 sps:$4 sm:$0xff]   ;;  %v2323_v5 = vld [vmem:[%s2806_s29 + $0x114] ss:$8 sps:$4 sm:$0xff]   ;;  %v921_v37 = vcombine.high %v2886_v3, %v2886_v3 }
  0xb9   : > { %1584 = vmatprep.subr.bf16.mxu0 %v2256_v10  ;;  %v2326_v6 = vld [vmem:[%s2806_s29 + $0x314] ss:$8 sps:$4 sm:$0xff]   ;;  %v2321_v8 = vld [vmem:[%s2806_s29 + $0x110] ss:$8 sps:$4 sm:$0xff]   ;;  %v2329_v10 = vld [vmem:[%s2806_s29 + $0x124] ss:$8 sps:$4 sm:$0xff]  }
  0xba   : > { %1522 = vmatprep.mubr.bf16.mxu1 %v912_v47  ;;  %1604 = vmatprep.mubr.bf16.mxu0 %v919_v52  ;;  %v922_v7 = vcombine.high %v912_v47, %v912_v47  ;;  %v2324_v9 = vld [vmem:[%s2806_s29 + $0x310] ss:$8 sps:$4 sm:$0xff]   ;;  %v2339_v21 = vld [vmem:[%s2806_s29 + $0x140] ss:$8 sps:$4 sm:$0xff]   ;;  %v2347_v23 = vld [vmem:[%s2806_s29 + $0x154] ss:$8 sps:$4 sm:$0xff]  }
  0xbb   : > { %1503 = vmatpush1.bf16.msra.mxu1 %v2258_v11  ;;  %v2332_v11 = vld [vmem:[%s2806_s29 + $0x324] ss:$8 sps:$4 sm:$0xff]   ;;  %v2342_v22 = vld [vmem:[%s2806_s29 + $0x340] ss:$8 sps:$4 sm:$0xff]   ;;  %v2357_v34 = vld [vmem:[%s2806_s29 + $0x170] ss:$8 sps:$4 sm:$0xff]  }
  0xbc   : > { %1585 = vmatpush1.bf16.msra.mxu0 %v2259_v12  ;;  %1504 = vmatprep.subr.bf16.mxu1 %v2260_v13  ;;  %v2461_v12 = vmov 0   ;;  %v2327_v13 = vld [vmem:[%s2806_s29 + $0x120] ss:$8 sps:$4 sm:$0xff]   ;;  %v2353_v27 = vld [vmem:[%s2806_s29 + $0x164] ss:$8 sps:$4 sm:$0xff]   ;;  %vm1874_vm0 = vcmask (!%p2104_p1), 25600  }
  0xbd   : > { %1586 = vmatprep.subr.bf16.mxu0 %v2262_v14  ;;  %v2330_v14 = vld [vmem:[%s2806_s29 + $0x320] ss:$8 sps:$4 sm:$0xff]   ;;  %v2368_v39 = vld [vmem:[%s2806_s29 + $0x194] ss:$8 sps:$4 sm:$0xff]   ;;  %v2366_v40 = vld [vmem:[%s2806_s29 + $0x190] ss:$8 sps:$4 sm:$0xff]  }
  0xbe   : > { %v2372_v44 = vld [vmem:[%s2806_s29 + $0x1b0] ss:$8 sps:$4 sm:$0xff]   ;;  %v2377_v45 = vld [vmem:[%s2806_s29 + $0x1c4] ss:$8 sps:$4 sm:$0xff]   ;;  %v2380_v47 = vld [vmem:[%s2806_s29 + $0x1d4] ss:$8 sps:$4 sm:$0xff]  }
  0xbf   : > { %1505 = vmatpush1.bf16.msra.mxu1 %v2264_v15  ;;  %v2335_v15 = vld [vmem:[%s2806_s29 + $0x134] ss:$8 sps:$4 sm:$0xff]   ;;  %v2378_v48 = vld [vmem:[%s2806_s29 + $0x1d0] ss:$8 sps:$4 sm:$0xff]  }
  0xc0   : > { %1587 = vmatpush1.bf16.msra.mxu0 %v2265_v16  ;;  %1506 = vmatprep.subr.bf16.mxu1 %v2266_v17  ;;  %v2338_v16 = vld [vmem:[%s2806_s29 + $0x334] ss:$8 sps:$4 sm:$0xff]   ;;  %v2333_v17 = vld [vmem:[%s2806_s29 + $0x130] ss:$8 sps:$4 sm:$0xff]  }
  0xc1   : > { %1588 = vmatprep.subr.bf16.mxu0 %v2268_v18  ;;  %v2336_v18 = vld [vmem:[%s2806_s29 + $0x330] ss:$8 sps:$4 sm:$0xff]  }
  0xc2   : > { %v2384_v52 = vld [vmem:[%s2806_s29 + $0x1f0] ss:$8 sps:$4 sm:$0xff]  }
  0xc3   : > { %1507 = vmatpush1.bf16.msra.mxu1 %v2270_v19  ;;  %v2341_v19 = vld [vmem:[%s2806_s29 + $0x144] ss:$8 sps:$4 sm:$0xff]  }
  0xc4   : > { %1589 = vmatpush1.bf16.msra.mxu0 %v2271_v20  ;;  %1508 = vmatprep.subr.bf16.mxu1 %v2272_v24  ;;  %v2344_v20 = vld [vmem:[%s2806_s29 + $0x344] ss:$8 sps:$4 sm:$0xff]   ;;  %v2350_v24 = vld [vmem:[%s2806_s29 + $0x354] ss:$8 sps:$4 sm:$0xff]  }
  0xc5   : > { %1590 = vmatprep.subr.bf16.mxu0 %v2274_v25  ;;  %v2345_v25 = vld [vmem:[%s2806_s29 + $0x150] ss:$8 sps:$4 sm:$0xff]  }
  0xc7   : > { %1509 = vmatpush1.bf16.msra.mxu1 %v2276_v26  ;;  %v2348_v26 = vld [vmem:[%s2806_s29 + $0x350] ss:$8 sps:$4 sm:$0xff]  }
  0xc8   : > { %1591 = vmatpush1.bf16.msra.mxu0 %v2277_v29  ;;  %1510 = vmatprep.subr.bf16.mxu1 %v2278_v30  ;;  %v2356_v29 = vld [vmem:[%s2806_s29 + $0x364] ss:$8 sps:$4 sm:$0xff]   ;;  %v2351_v30 = vld [vmem:[%s2806_s29 + $0x160] ss:$8 sps:$4 sm:$0xff]  }
  0xc9   : > { %1592 = vmatprep.subr.bf16.mxu0 %v2280_v31  ;;  %v2354_v31 = vld [vmem:[%s2806_s29 + $0x360] ss:$8 sps:$4 sm:$0xff]  }
  0xcb   : > { %1511 = vmatpush1.bf16.msra.mxu1 %v2282_v32  ;;  %v2359_v32 = vld [vmem:[%s2806_s29 + $0x174] ss:$8 sps:$4 sm:$0xff]  }
  0xcc   : > { %1593 = vmatpush1.bf16.msra.mxu0 %v2283_v33  ;;  %1512 = vmatprep.subr.bf16.mxu1 %v2284_v35  ;;  %v2362_v33 = vld [vmem:[%s2806_s29 + $0x374] ss:$8 sps:$4 sm:$0xff]   ;;  %v2360_v35 = vld [vmem:[%s2806_s29 + $0x370] ss:$8 sps:$4 sm:$0xff]  }
  0xcd   : > { %1594 = vmatprep.subr.bf16.mxu0 %v2286_v36  ;;  %v2365_v36 = vld [vmem:[%s2806_s29 + $0x184] ss:$8 sps:$4 sm:$0xff]  }
  0xcf   : > { %1513 = vmatpush1.bf16.msra.mxu1 %v2288_v38  ;;  %v2363_v38 = vld [vmem:[%s2806_s29 + $0x180] ss:$8 sps:$4 sm:$0xff]  }
  0xd0   : > { %1595 = vmatpush1.bf16.msra.mxu0 %v2289_v41  ;;  %1514 = vmatprep.subr.bf16.mxu1 %v2290_v42  ;;  %v2371_v41 = vld [vmem:[%s2806_s29 + $0x1a4] ss:$8 sps:$4 sm:$0xff]   ;;  %v2369_v42 = vld [vmem:[%s2806_s29 + $0x1a0] ss:$8 sps:$4 sm:$0xff]  }
  0xd1   : > { %1596 = vmatprep.subr.bf16.mxu0 %v2292_v43  ;;  %v2374_v43 = vld [vmem:[%s2806_s29 + $0x1b4] ss:$8 sps:$4 sm:$0xff]  }
  0xd3   : > { %1515 = vmatpush1.bf16.msra.mxu1 %v2294_v46  ;;  %v2375_v46 = vld [vmem:[%s2806_s29 + $0x1c0] ss:$8 sps:$4 sm:$0xff]  }
  0xd4   : > { %1597 = vmatpush1.bf16.msra.mxu0 %v2295_v49  ;;  %1516 = vmatprep.subr.bf16.mxu1 %v2296_v50  ;;  %v2383_v49 = vld [vmem:[%s2806_s29 + $0x1e4] ss:$8 sps:$4 sm:$0xff]   ;;  %v2381_v50 = vld [vmem:[%s2806_s29 + $0x1e0] ss:$8 sps:$4 sm:$0xff]  }
  0xd5   : > { %1598 = vmatprep.subr.bf16.mxu0 %v2298_v51  ;;  %v2386_v51 = vld [vmem:[%s2806_s29 + $0x1f4] ss:$8 sps:$4 sm:$0xff]  }
  0xd7   : > { %1517 = vmatpush1.bf16.msra.mxu1 %v2300_v53  ;;  %v920_v53 = vcombine.high %v2884_v2, %v2884_v2 }
  0xd8   : > { %1599 = vmatpush1.bf16.msra.mxu0 %v2301_v54  ;;  %1518 = vmatprep.subr.bf16.mxu1 %v2302_v55 }
  0xd9   : > { %1600 = vmatprep.subr.bf16.mxu0 %v2304_v56 }
  0xdb   : > { %1519 = vmatpush1.bf16.msra.mxu1 %v2306_v57 }
  0xdc   : > { %1601 = vmatpush1.bf16.msra.mxu0 %v2307_v58  ;;  %1520 = vmatprep.subr.bf16.mxu1 %v2308_v59  ;;  %v2462_v58 = vmov 1983009808  }
  0xdd   : > { %1602 = vmatprep.subr.bf16.mxu0 %v2310_v60  ;;  %v1658_v59 = vunpack.c.l.s4 %v2462_v58 }
  0xdf   : > { %1521 = vmatpush1.bf16.msra.mxu1 %v2312_v61  ;;  %v1659_v60 = vunpack.c.0.s8 %v1658_v59 }
  0xe0   : > { %1603 = vmatpush1.bf16.msra.mxu0 %v2313_v62  ;;  %1531 = vmatprep.subr.bf16.mxu1 %v2316_v63 }
  0xe1   : > { %1613 = vmatprep.subr.bf16.mxu0 %v2320_v0 }
  0xe2   : > { %1523 = vmatmul.mubr.bf16.vlgmr.msra.gmra.mrb[0].mxu1 %v2884_v2 }
  0xe3   : > { %1605 = vmatmul.mubr.bf16.vlgmr.msra.gmra.mrb[0].mxu0 %v2886_v3  ;;  %1532 = vmatpush1.bf16.msra.mxu1 %v2314_v1  ;;  %v1662_v1 = vsub.s32 %v1659_v60, %v2848_v28 }
  0xe4   : > { %1614 = vmatpush1.bf16.msra.mxu0 %v2318_v4  ;;  %1533 = vmatprep.subr.bf16.mxu1 %v2323_v5 }
  0xe5   : > { %1615 = vmatprep.subr.bf16.mxu0 %v2326_v6  ;;  %1645 = vmatprep.mubr.bf16.mxu0 %v2461_v12  ;;  %v760_v6 = vld [vmem:[#allocation2] sm:$0xf]  ;;  %v2391_v12 = vld [vmem:[%s2799_s10 + $0x50] sm:$0xff] (!%p2104_p1)  }
  0xe6   : > { %1563 = vmatprep.mubr.bf16.mxu1 %v922_v7 }
  0xe7   : > { %1534 = vmatpush1.bf16.msra.mxu1 %v2321_v8  ;;  %v2387_v8 = vld [vmem:[%s2799_s10 + $0x40] sm:$0xff] (!%p2104_p1)  }
  0xe8   : > { %1616 = vmatpush1.bf16.msra.mxu0 %v2324_v9  ;;  %1535 = vmatprep.subr.bf16.mxu1 %v2329_v10  ;;  %v2388_v9 = vld [vmem:[%s2799_s10] sm:$0xff] (!%p2104_p1)   ;;  %v2389_v10 = vld [vmem:[%s2799_s10 + $0x48] sm:$0xff] (!%p2104_p1)  }
  0xe9   : > { %1617 = vmatprep.subr.bf16.mxu0 %v2332_v11  ;;  %v2390_v11 = vld [vmem:[%s2799_s10 + $0x8] sm:$0xff] (!%p2104_p1)  }
  0xeb   : > { %1536 = vmatpush1.bf16.msra.mxu1 %v2327_v13  ;;  %v2392_v13 = vld [vmem:[%s2799_s10 + $0x10] sm:$0xff] (!%p2104_p1)  }
  0xec   : > { %1618 = vmatpush1.bf16.msra.mxu0 %v2330_v14  ;;  %1537 = vmatprep.subr.bf16.mxu1 %v2335_v15  ;;  %v2393_v14 = vld [vmem:[%s2799_s10 + $0x58] sm:$0xff] (!%p2104_p1)  }
  0xed   : > { %1619 = vmatprep.subr.bf16.mxu0 %v2338_v16  ;;  %v2394_v15 = vld [vmem:[%s2799_s10 + $0x18] sm:$0xff] (!%p2104_p1)   ;;  %v2395_v16 = vld [vmem:[%s2799_s10 + $0x60] sm:$0xff] (!%p2104_p1)  }
  0xef   : > { %1538 = vmatpush1.bf16.msra.mxu1 %v2333_v17  ;;  %v1676_v17 = vsub.s32 (!%p2104_p1), 0, %v2848_v28 }
  0xf0   : > { %1620 = vmatpush1.bf16.msra.mxu0 %v2336_v18  ;;  %1539 = vmatprep.subr.bf16.mxu1 %v2341_v19  ;;  %v1680_v18 = vsub.s32 (!%p2104_p1), 1, %v2848_v28  ;;  %v2396_v19 = vld [vmem:[%s2799_s10 + $0x20] sm:$0xff] (!%p2104_p1)  }
  0xf1   : > { %1621 = vmatprep.subr.bf16.mxu0 %v2344_v20  ;;  %v2397_v20 = vld [vmem:[%s2799_s10 + $0x68] sm:$0xff] (!%p2104_p1)  }
  0xf3   : > { %1540 = vmatpush1.bf16.msra.mxu1 %v2339_v21  ;;  %v1672_v21 = vld [vmem:[%s742_s15] sm:$0x3] (!%p2104_p1) }
  0xf4   : > { %1622 = vmatpush1.bf16.msra.mxu0 %v2342_v22  ;;  %1541 = vmatprep.subr.bf16.mxu1 %v2347_v23  ;;  %v1677_v22 = vrot.slane (!%p2104_p1), %v1672_v21, %v1676_v17  ;;  %v1681_v23 = vrot.slane (!%p2104_p1), %v1672_v21, %v1680_v18 }
  0xf5   : > { %1623 = vmatprep.subr.bf16.mxu0 %v2350_v24  ;;  %v2398_v24 = vld [vmem:[%s2799_s10 + $0x28] sm:$0xff] (!%p2104_p1)  }
  0xf7   : > { %1542 = vmatpush1.bf16.msra.mxu1 %v2345_v25  ;;  %v1682_v25 = vcombine.low (!%p2104_p1), %v1677_v22, %v1681_v23 }
  0xf8   : > { %1624 = vmatpush1.bf16.msra.mxu0 %v2348_v26  ;;  %1543 = vmatprep.subr.bf16.mxu1 %v2353_v27  ;;  %v2399_v26 = vld [vmem:[%s2799_s10 + $0x70] sm:$0xff] (!%p2104_p1)  }
  0xf9   : > { %1625 = vmatprep.subr.bf16.mxu0 %v2356_v29  ;;  %v1689_v27 = vrot.slane (!%p2104_p1), %v1682_v25, %v1662_v1  ;;  %v2400_v29 = vld [vmem:[%s2799_s10 + $0x30] sm:$0xff] (!%p2104_p1)  }
  0xfb   : > { %1544 = vmatpush1.bf16.msra.mxu1 %v2351_v30 }
  0xfc   : > { %1626 = vmatpush1.bf16.msra.mxu0 %v2354_v31  ;;  %1545 = vmatprep.subr.bf16.mxu1 %v2359_v32  ;;  %v2401_v31 = vld [vmem:[%s2799_s10 + $0x78] sm:$0xff] (!%p2104_p1)  }
  0xfd   : > { %1627 = vmatprep.subr.bf16.mxu0 %v2362_v33  ;;  %v2402_v33 = vld [vmem:[%s2799_s10 + $0x38] sm:$0xff] (!%p2104_p1)  }
  0xff   : > { %1546 = vmatpush1.bf16.msra.mxu1 %v2357_v34 }
 0x100   : > { %1628 = vmatpush1.bf16.msra.mxu0 %v2360_v35  ;;  %1547 = vmatprep.subr.bf16.mxu1 %v2365_v36 }
 0x101   : > { %2124 = vmatprep.subr.bf16.mxu0 (!%p2104_p1), %v2387_v8 }
 0x103   : > { %1646 = vmatmul.mubr.bf16.vlgmr.msra.gmra.mrb[0].mxu0 %v921_v37  ;;  %1548 = vmatpush1.bf16.msra.mxu1 %v2363_v38 }
 0x104   : > { %1549 = vmatprep.subr.bf16.mxu1 %v2368_v39  ;;  %2125 = vmatpush3.bf16.msra.mxu0 (!%p2104_p1), %v2388_v9 }
 0x105   : > { %2126 = vmatprep.subr.bf16.mxu0 (!%p2104_p1), %v2389_v10 }
 0x107   : > { %1550 = vmatpush1.bf16.msra.mxu1 %v2366_v40 }
 0x108   : > { %1551 = vmatprep.subr.bf16.mxu1 %v2371_v41  ;;  %2127 = vmatpush3.bf16.msra.mxu0 (!%p2104_p1), %v2390_v11 }
 0x109   : > { %2128 = vmatprep.subr.bf16.mxu0 (!%p2104_p1), %v2391_v12 }
 0x10b   : > { %1552 = vmatpush1.bf16.msra.mxu1 %v2369_v42 }
 0x10c   : > { %1553 = vmatprep.subr.bf16.mxu1 %v2374_v43  ;;  %2129 = vmatpush3.bf16.msra.mxu0 (!%p2104_p1), %v2392_v13 }
 0x10d   : > { %2130 = vmatprep.subr.bf16.mxu0 (!%p2104_p1), %v2393_v14 }
 0x10f   : > { %1554 = vmatpush1.bf16.msra.mxu1 %v2372_v44 }
 0x110   : > { %1555 = vmatprep.subr.bf16.mxu1 %v2377_v45  ;;  %2131 = vmatpush3.bf16.msra.mxu0 (!%p2104_p1), %v2394_v15 }
 0x111   : > { %2132 = vmatprep.subr.bf16.mxu0 (!%p2104_p1), %v2395_v16 }
 0x113   : > { %1556 = vmatpush1.bf16.msra.mxu1 %v2375_v46 }
 0x114   : > { %1557 = vmatprep.subr.bf16.mxu1 %v2380_v47  ;;  %2133 = vmatpush3.bf16.msra.mxu0 (!%p2104_p1), %v2396_v19 }
 0x115   : > { %2134 = vmatprep.subr.bf16.mxu0 (!%p2104_p1), %v2397_v20 }
 0x117   : > { %1558 = vmatpush1.bf16.msra.mxu1 %v2378_v48 }
 0x118   : > { %1559 = vmatprep.subr.bf16.mxu1 %v2383_v49  ;;  %2135 = vmatpush3.bf16.msra.mxu0 (!%p2104_p1), %v2398_v24 }
 0x119   : > { %2136 = vmatprep.subr.bf16.mxu0 (!%p2104_p1), %v2399_v26 }
 0x11b   : > { %1560 = vmatpush1.bf16.msra.mxu1 %v2381_v50 }
 0x11c   : > { %1561 = vmatprep.subr.bf16.mxu1 %v2386_v51  ;;  %2137 = vmatpush3.bf16.msra.mxu0 (!%p2104_p1), %v2400_v29 }
 0x11d   : > { %2138 = vmatprep.subr.bf16.mxu0 (!%p2104_p1), %v2401_v31 }
 0x11f   : > { %1562 = vmatpush1.bf16.msra.mxu1 %v2384_v52 }
 0x120   : > { %2139 = vmatpush3.bf16.msra.mxu0 (!%p2104_p1), %v2402_v33 }
 0x122   : > { %1564 = vmatmul.mubr.bf16.vlgmr.msra.gmra.mrb[0].mxu1 %v920_v53 }
 0x1d6   : > { %v1647_v54 = vpop.f32.mrb[0].mxu0 }
 0x1d7   : > { %v1649_v55 = vpop.f32.mrb[1].mxu0 }
 0x1d8   : > { %v1651_v56 = vpop.f32.mrb[2].mxu0 }
 0x1d9   : > { %v1652_v57 = vpop.f32.mrb[3].mxu0 }
 0x1f5   : > { %v1565_v61 = vpop.f32.mrb[0].mxu1 }
 0x1f6   : > { %v2146_v62 = vadd.f32 %v1647_v54, %v1565_v61  ;;  %v1567_v63 = vpop.f32.mrb[1].mxu1 }
 0x1f7   : > { %v2147_v0 = vadd.f32 %v1649_v55, %v1567_v63  ;;  %v1569_v3 = vpop.f32.mrb[2].mxu1 }
 0x1f8   : > { %v1570_v4 = vpop.f32.mrb[3].mxu1 }
 0x1f9   : > { %v1656_v5 = vcombine.low %v2146_v62, %v2147_v0  ;;  %1670 = sbr.rel (%p2104_p1) target bundleno = 746 (0x2ea), region = 82 }
 0x1fb   : > { %v1663_v2 = vrot.slane %v1656_v5, %v1662_v1 }
 0x1fd   : > { %v1665_v7 = vadd.f32 %v1663_v2, %v760_v6 }
 0x1ff   : > { %1666 = vst [vmem:[#allocation2] sm:$0xf] %v1665_v7 }
 0x206   : > { %v1671_v28 = vld [vmem:[#allocation2] sm:$0xf] }
 0x207   : > { %v1691_v30 = vadd.f32 %v1689_v27, %v1671_v28 }
 0x209   : > { %v1692_v32 = vmax.f32 %v1691_v30, 0.0 }
 0x20b   : > { %v1700_v34 = vrot.slane %v1692_v32, %v1662_v1 }
 0x20d   : > { %v1701_v35 = vcombine.high %v1700_v34, %v1700_v34  ;;  %v1704_v36 = vpack.c.bf16 %v1700_v34, %v1700_v34 }
 0x20f   : > { %v1705_v37 = vpack.c.bf16 %v1701_v35, %v1701_v35 }
 0x211   : > { %1866 = vmatprep.mubr.bf16.mxu0 %v1705_v37 }
 0x212   : > { %1867 = vmatmul.mubr.bf16.vlgmr.msra.gmra.mrb[0].mxu0 %v1704_v36 }
 0x2e5   : > { %v2140_v38 = vpop.f32.mrb[0].mxu0 }
 0x2e6   : > { %v2141_v39 = vpop.f32.mrb[1].mxu0 }
 0x2e7   : > { %v2142_v40 = vadd.f32 %v2141_v39, %v2140_v38  ;;  %v2143_v41 = vpop.f32.mrb[2].mxu0 }
 0x2e8   : > { %v2144_v42 = vpop.f32.mrb[3].mxu0 }
 0x2e9   : > { %1875 = vst.msk [vmem:[%s2804_s27] sm:$0x3] %vm1874_vm0, %v2142_v40 }
 0x2ea PF: > { %s14_s21 = sadd.s32 1, %s2457_s21   ;;  %s2991_s15 = smov %s2437_s16 }
 0x2eb   : > { %p11_p2 = scmp.ge.s32.totalorder %s14_s21, 30   ;;  %s2992_s16 = smov %s2539_s28 }
 0x2ec   : > { %s2993_s17 = smov %s2449_s19  ;;  %s2994_s18 = smov %s2453_s20 }
 0x2ed   : > { %s2995_s19 = smov %s2998_s22  ;;  %s2996_s20 = smov %s3002_s23 }
 0x2ee   :  { %13 = sbr.rel (!%p11_p2) target bundleno = 4 (0x4), region = 126 }

</bundles_post_ra>
